<compile_context>
chip_gen: v7x
topology: tpu7x:2x2x1
jax: 0.10.0
libtpu: 0.0.40
codegen_flags: <defaults>
</compile_context>

<pallas_src>
import jax
import jax.numpy as jnp
from jax.experimental import pallas as pl
from jax.experimental.pallas import tpu as pltpu


FH_PAD = 128   # padded hidden (lane-dense)
C_PAD = 128    # padded class dim (lane-dense)
NEG_BIG = -1e30


# ---------------------------------------------------------------------------
# Kernel 1: fused projection  h = x @ W,  e_src = x @ (W a_src),  e_dst = x @ (W a_dst)
# ---------------------------------------------------------------------------

def proj_kernel(x_ref, wcat_ref, h_ref, esrc_ref, edst_ref):
    xb = x_ref[...].astype(jnp.bfloat16)
    hf = jnp.dot(xb, wcat_ref[...], preferred_element_type=jnp.float32)  # [tq, FH_PAD+2]
    h_ref[...] = hf[:, :FH_PAD].astype(jnp.bfloat16)
    esrc_ref[...] = hf[:, FH_PAD:FH_PAD + 1]
    edst_ref[...] = hf[:, FH_PAD + 1:FH_PAD + 2]


# ---------------------------------------------------------------------------
# Kernel 2: flash-style GAT attention with fused extra head
# ---------------------------------------------------------------------------

def gat_attn_head_kernel(esrc_ref, edst_ref, bias_ref, hk_ref,
                         wft_ref, bft_ref, wcls_ref, bcls_ref,
                         out_ref, m_sc, l_sc, acc_sc):
    ki = pl.program_id(1)

    @pl.when(ki == 0)
    def _():
        m_sc[...] = jnp.full(m_sc.shape, NEG_BIG, jnp.float32)
        l_sc[...] = jnp.zeros(l_sc.shape, jnp.float32)
        acc_sc[...] = jnp.zeros(acc_sc.shape, jnp.float32)

    # scores for this (query-block, key-block) tile
    s = esrc_ref[...] + edst_ref[...]                 # [tq, tk] f32 (broadcast add)
    s = jnp.maximum(s, 0.2 * s)                       # LeakyReLU(0.2), no select needed
    s = s + bias_ref[...].astype(jnp.float32)         # adjacency mask as additive bias

    # online softmax update
    row_max = jnp.max(s, axis=1, keepdims=True)       # [tq, 1]
    m_new = jnp.maximum(m_sc[...], row_max)
    alpha = jnp.exp(m_sc[...] - m_new)
    p = jnp.exp(s - m_new)                            # masked entries underflow to 0
    l_sc[...] = alpha * l_sc[...] + jnp.sum(p, axis=1, keepdims=True)
    acc_sc[...] = alpha * acc_sc[...] + jnp.dot(
        p.astype(jnp.bfloat16), hk_ref[...], preferred_element_type=jnp.float32)
    m_sc[...] = m_new

    # epilogue: finish softmax, ELU, and the fused extra head
    @pl.when(ki == pl.num_programs(1) - 1)
    def _():
        l = jnp.maximum(l_sc[...], 1e-30)
        gat = acc_sc[...] * pl.reciprocal(l, approx=True)          # [tq, FH_PAD]
        # ELU (exp argument clamped to <= 0)
        gat = jnp.where(gat > 0.0, gat, jnp.exp(jnp.minimum(gat, 0.0)) - 1.0)
        # extra head: relu -> fine_tune_linear -> classification -> softmax(dim=1)
        hrelu = jnp.maximum(gat, 0.0).astype(jnp.bfloat16)
        ft = jnp.dot(hrelu, wft_ref[...],
                     preferred_element_type=jnp.float32) + bft_ref[...]
        logits = jnp.dot(ft.astype(jnp.bfloat16), wcls_ref[...],
                         preferred_element_type=jnp.float32) + bcls_ref[...]
        mm = jnp.max(logits, axis=1, keepdims=True)
        pp = jnp.exp(logits - mm)                                  # padded classes -> 0
        out_ref[...] = pp * pl.reciprocal(jnp.sum(pp, axis=1, keepdims=True),
                                          approx=False)           # exact for sum==1


# ---------------------------------------------------------------------------
# Wrapper
# ---------------------------------------------------------------------------

def gat_with_extra_head(x, adj, params, tq=256, tk=256):
    """Forward pass of Gat_with_extra_head (classification)."""
    N, F_in = x.shape
    F_h = params["gat_w"].shape[1]
    C = params["w_cls"].shape[1]
    assert F_h <= FH_PAD and C <= C_PAD

    tq = min(tq, N)
    tk = min(tk, N)
    assert N % tq == 0 and N % tk == 0, "N must divide the tile sizes"
    nq, nk = N // tq, N // tk

    f32, bf16 = jnp.float32, jnp.bfloat16

    # --- fold attention vectors into the projection weight (lane-dense pad) ---
    wa_src = params["gat_w"] @ params["gat_a_src"]                 # [F_in, 1]
    wa_dst = params["gat_w"] @ params["gat_a_dst"]                 # [F_in, 1]
    w_pad = jnp.zeros((F_in, FH_PAD), f32).at[:, :F_h].set(params["gat_w"])
    w_cat = jnp.concatenate([w_pad, wa_src, wa_dst], axis=1).astype(bf16)

    # --- projection kernel ---
    h, e_src, e_dst = pl.pallas_call(
        proj_kernel,
        grid=(nq,),
        in_specs=[
            pl.BlockSpec((tq, F_in), lambda i: (i, 0)),
            pl.BlockSpec((F_in, FH_PAD + 2), lambda i: (0, 0)),
        ],
        out_specs=[
            pl.BlockSpec((tq, FH_PAD), lambda i: (i, 0)),
            pl.BlockSpec((tq, 1), lambda i: (i, 0)),
            pl.BlockSpec((tq, 1), lambda i: (i, 0)),
        ],
        out_shape=[
            jax.ShapeDtypeStruct((N, FH_PAD), bf16),
            jax.ShapeDtypeStruct((N, 1), f32),
            jax.ShapeDtypeStruct((N, 1), f32),
        ],
        compiler_params=pltpu.CompilerParams(
            dimension_semantics=("parallel",),
            vmem_limit_bytes=32 << 20),
    )(x.astype(f32), w_cat)

    # layout plumbing only (no compute): key scores in row layout
    e_dst_row = jnp.transpose(e_dst)                               # [1, N]

    # adjacency as bf16 additive bias (0 where edge, -1e30 otherwise)
    bias = jnp.where(adj > 0, 0.0, NEG_BIG).astype(bf16)

    # head parameters, zero/neg-inf padded to lane-dense shapes
    w_ft = jnp.zeros((FH_PAD, FH_PAD), f32).at[:F_h, :F_h].set(params["w_ft"]).astype(bf16)
    b_ft = jnp.zeros((1, FH_PAD), f32).at[:, :F_h].set(params["b_ft"])
    w_cls = jnp.zeros((FH_PAD, C_PAD), f32).at[:F_h, :C].set(params["w_cls"]).astype(bf16)
    b_cls = jnp.full((1, C_PAD), NEG_BIG, f32).at[:, :C].set(params["b_cls"])

    # --- flash-style attention + fused head ---
    probs_pad = pl.pallas_call(
        gat_attn_head_kernel,
        grid=(nq, nk),
        in_specs=[
            pl.BlockSpec((tq, 1), lambda qi, ki: (qi, 0)),       # e_src (query block)
            pl.BlockSpec((1, tk), lambda qi, ki: (0, ki)),       # e_dst (key block, row layout)
            pl.BlockSpec((tq, tk), lambda qi, ki: (qi, ki)),     # adjacency bias tile
            pl.BlockSpec((tk, FH_PAD), lambda qi, ki: (ki, 0)),  # h (key block, bf16)
            pl.BlockSpec((FH_PAD, FH_PAD), lambda qi, ki: (0, 0)),
            pl.BlockSpec((1, FH_PAD), lambda qi, ki: (0, 0)),
            pl.BlockSpec((FH_PAD, C_PAD), lambda qi, ki: (0, 0)),
            pl.BlockSpec((1, C_PAD), lambda qi, ki: (0, 0)),
        ],
        out_specs=pl.BlockSpec((tq, C_PAD), lambda qi, ki: (qi, 0)),
        out_shape=jax.ShapeDtypeStruct((N, C_PAD), f32),
        scratch_shapes=[
            pltpu.VMEM((tq, 1), f32),        # running max
            pltpu.VMEM((tq, 1), f32),        # running sum
            pltpu.VMEM((tq, FH_PAD), f32),   # output accumulator
        ],
        compiler_params=pltpu.CompilerParams(
            dimension_semantics=("parallel", "arbitrary"),
            vmem_limit_bytes=32 << 20),
    )(e_src, e_dst_row, bias, h, w_ft, b_ft, w_cls, b_cls)

    return probs_pad[:, :C]


# ---------------------------------------------------------------------------
# Parameters
# ---------------------------------------------------------------------------

def init_params(key, f_in, mlp2_dim, n_classes):
    ks = jax.random.split(key, 7)
    scale = 0.1
    return {
        # GAT backbone (stand-in for GAT_model)
        "gat_w":     scale * jax.random.normal(ks[0], (f_in, mlp2_dim), jnp.float32),
        "gat_a_src": scale * jax.random.normal(ks[1], (mlp2_dim, 1), jnp.float32),
        "gat_a_dst": scale * jax.random.normal(ks[2], (mlp2_dim, 1), jnp.float32),
        # fine_tune_linear: Linear(mlp2_dim, mlp2_dim)
        "w_ft":  scale * jax.random.normal(ks[3], (mlp2_dim, mlp2_dim), jnp.float32),
        "b_ft":  scale * jax.random.normal(ks[4], (1, mlp2_dim), jnp.float32),
        # final_linear_classification: Linear(mlp2_dim, fine_tune_classes)
        "w_cls": scale * jax.random.normal(ks[5], (mlp2_dim, n_classes), jnp.float32),
        "b_cls": scale * jax.random.normal(ks[6], (1, n_classes), jnp.float32),
    }


if __name__ == "__main__":
    N = 512          # number of graph nodes (2x2 attention grid with 256-tiles)
    F_IN = 16        # input node-feature dim
    MLP2_DIM = 32    # gat_params['MLP2_dim']
    N_CLASSES = 4    # gat_params['fine_tune_classes']

    key = jax.random.PRNGKey(0)
    k_x, k_p = jax.random.split(key)

    x = jax.random.normal(k_x, (N, F_IN), jnp.float32)

    # deterministic adjacency: ring graph + self loops
    idx = jnp.arange(N)
    adj = (
        jnp.eye(N, dtype=jnp.float32)
        + (idx[:, None] == ((idx + 1) % N)[None, :]).astype(jnp.float32)
        + (idx[:, None] == ((idx - 1) % N)[None, :]).astype(jnp.float32)
    )

    params = init_params(k_p, F_IN, MLP2_DIM, N_CLASSES)

    fwd = jax.jit(gat_with_extra_head)
    probs = fwd(x, adj, params)
    probs = jax.block_until_ready(probs)

    assert probs.shape == (N, N_CLASSES)
    assert bool(jnp.all(jnp.isfinite(probs)))
    assert bool(jnp.allclose(jnp.sum(probs, axis=1), 1.0, atol=1e-5))

    print("KERNEL_OK")
</pallas_src>

<mosaic_0001>
module attributes {stable_mosaic.version = 11 : i64} {
  func.func @proj_kernel(%arg0: i32, %arg1: memref<256x16xf32, #tpu.memory_space<vmem>>, %arg2: memref<16x130xbf16, #tpu.memory_space<vmem>>, %arg3: memref<256x128xbf16, #tpu.memory_space<vmem>>, %arg4: memref<256x1xf32, #tpu.memory_space<vmem>>, %arg5: memref<256x1xf32, #tpu.memory_space<vmem>>) attributes {dimension_semantics = [#tpu.dimension_semantics<parallel>], iteration_bounds = array<i64: 2>, scalar_prefetch = 0 : i64, scratch_operands = 0 : i64, tpu.core_type = #tpu.core_type<tc>, window_params = [{transform_indices = @transform_0, window_bounds = array<i64: 256, 16>}, {pipeline_mode = #tpu.pipeline_mode<synchronous>, transform_indices = @transform_1, window_bounds = array<i64: 16, 130>}, {transform_indices = @transform_2, window_bounds = array<i64: 256, 128>}, {transform_indices = @transform_3, window_bounds = array<i64: 256, 1>}, {transform_indices = @transform_4, window_bounds = array<i64: 256, 1>}]} {
    %c0 = arith.constant 0 : index
    %c0_0 = arith.constant 0 : index
    %0 = vector.load %arg1[%c0, %c0_0] : memref<256x16xf32, #tpu.memory_space<vmem>>, vector<256x16xf32>
    %1 = arith.truncf %0 : vector<256x16xf32> to vector<256x16xbf16>
    %c0_1 = arith.constant 0 : index
    %c0_2 = arith.constant 0 : index
    %2 = vector.load %arg2[%c0_1, %c0_2] : memref<16x130xbf16, #tpu.memory_space<vmem>>, vector<16x130xbf16>
    %cst = arith.constant dense<0.000000e+00> : vector<256x130xf32>
    %3 = tpu.matmul %1, %2, %cst {dimension_numbers = #tpu.dot_dimension_numbers<[1], [0], [0], [1], [0, 0, 1, 1], [], []>} : vector<256x16xbf16>, vector<16x130xbf16>, vector<256x130xf32> -> vector<256x130xf32>
    %4 = vector.extract_strided_slice %3 {offsets = [0, 0], sizes = [256, 128], strides = [1, 1]} : vector<256x130xf32> to vector<256x128xf32>
    %5 = arith.truncf %4 : vector<256x128xf32> to vector<256x128xbf16>
    %c0_3 = arith.constant 0 : index
    %c0_4 = arith.constant 0 : index
    %6 = vector.load %arg3[%c0_3, %c0_4] : memref<256x128xbf16, #tpu.memory_space<vmem>>, vector<256x128xbf16>
    tpu.vector_store %arg3[%c0_3, %c0_4], %5 {strides = array<i32>} : memref<256x128xbf16, #tpu.memory_space<vmem>>, vector<256x128xbf16>,
    %7 = vector.extract_strided_slice %3 {offsets = [0, 128], sizes = [256, 1], strides = [1, 1]} : vector<256x130xf32> to vector<256x1xf32>
    %c0_5 = arith.constant 0 : index
    %c0_6 = arith.constant 0 : index
    %8 = vector.load %arg4[%c0_5, %c0_6] : memref<256x1xf32, #tpu.memory_space<vmem>>, vector<256x1xf32>
    tpu.vector_store %arg4[%c0_5, %c0_6], %7 {strides = array<i32>} : memref<256x1xf32, #tpu.memory_space<vmem>>, vector<256x1xf32>,
    %9 = vector.extract_strided_slice %3 {offsets = [0, 129], sizes = [256, 1], strides = [1, 1]} : vector<256x130xf32> to vector<256x1xf32>
    %c0_7 = arith.constant 0 : index
    %c0_8 = arith.constant 0 : index
    %10 = vector.load %arg5[%c0_7, %c0_8] : memref<256x1xf32, #tpu.memory_space<vmem>>, vector<256x1xf32>
    tpu.vector_store %arg5[%c0_7, %c0_8], %9 {strides = array<i32>} : memref<256x1xf32, #tpu.memory_space<vmem>>, vector<256x1xf32>,
    return
  }
  func.func @transform_0(%arg0: i32) -> (i32, i32) {
    %c0_i32 = arith.constant 0 : i32
    %c0_i32_0 = arith.constant 0 : i32
    return %arg0, %c0_i32 : i32, i32
  }
  func.func @transform_1(%arg0: i32) -> (i32, i32) {
    %c0_i32 = arith.constant 0 : i32
    %c0_i32_0 = arith.constant 0 : i32
    %c0_i32_1 = arith.constant 0 : i32
    return %c0_i32, %c0_i32_0 : i32, i32
  }
  func.func @transform_2(%arg0: i32) -> (i32, i32) {
    %c0_i32 = arith.constant 0 : i32
    %c0_i32_0 = arith.constant 0 : i32
    return %arg0, %c0_i32 : i32, i32
  }
  func.func @transform_3(%arg0: i32) -> (i32, i32) {
    %c0_i32 = arith.constant 0 : i32
    %c0_i32_0 = arith.constant 0 : i32
    return %arg0, %c0_i32 : i32, i32
  }
  func.func @transform_4(%arg0: i32) -> (i32, i32) {
    %c0_i32 = arith.constant 0 : i32
    %c0_i32_0 = arith.constant 0 : i32
    return %arg0, %c0_i32 : i32, i32
  }
}

module attributes {stable_mosaic.version = 11 : i64} {
  func.func @gat_attn_head_kernel(%arg0: i32, %arg1: i32, %arg2: memref<256x1xf32, #tpu.memory_space<vmem>>, %arg3: memref<1x256xf32, #tpu.memory_space<vmem>>, %arg4: memref<256x256xbf16, #tpu.memory_space<vmem>>, %arg5: memref<256x128xbf16, #tpu.memory_space<vmem>>, %arg6: memref<128x128xbf16, #tpu.memory_space<vmem>>, %arg7: memref<1x128xf32, #tpu.memory_space<vmem>>, %arg8: memref<128x128xbf16, #tpu.memory_space<vmem>>, %arg9: memref<1x128xf32, #tpu.memory_space<vmem>>, %arg10: memref<256x128xf32, #tpu.memory_space<vmem>>, %arg11: memref<256x1xf32, #tpu.memory_space<vmem>>, %arg12: memref<256x1xf32, #tpu.memory_space<vmem>>, %arg13: memref<256x128xf32, #tpu.memory_space<vmem>>) attributes {dimension_semantics = [#tpu.dimension_semantics<parallel>, #tpu.dimension_semantics<arbitrary>], iteration_bounds = array<i64: 2, 2>, scalar_prefetch = 0 : i64, scratch_operands = 3 : i64, tpu.core_type = #tpu.core_type<tc>, window_params = [{transform_indices = @transform_0, window_bounds = array<i64: 256, 1>}, {transform_indices = @transform_1, window_bounds = array<i64: 1, 256>}, {transform_indices = @transform_2, window_bounds = array<i64: 256, 256>}, {transform_indices = @transform_3, window_bounds = array<i64: 256, 128>}, {pipeline_mode = #tpu.pipeline_mode<synchronous>, transform_indices = @transform_4, window_bounds = array<i64: 128, 128>}, {pipeline_mode = #tpu.pipeline_mode<synchronous>, transform_indices = @transform_5, window_bounds = array<i64: 1, 128>}, {pipeline_mode = #tpu.pipeline_mode<synchronous>, transform_indices = @transform_6, window_bounds = array<i64: 128, 128>}, {pipeline_mode = #tpu.pipeline_mode<synchronous>, transform_indices = @transform_7, window_bounds = array<i64: 1, 128>}, {transform_indices = @transform_8, window_bounds = array<i64: 256, 128>}]} {
    %c0_i32 = arith.constant 0 : i32
    %0 = arith.cmpi eq, %arg1, %c0_i32 : i32
    %1 = arith.extui %0 : i1 to i32
    %c0_i32_0 = arith.constant 0 : i32
    %2 = arith.cmpi ne, %1, %c0_i32_0 : i32
    scf.if %2 {
      %cst_26 = arith.constant -1.000000e+30 : f32
      %42 = vector.broadcast %cst_26 : f32 to vector<256x1xf32>
      %c0_27 = arith.constant 0 : index
      %c0_28 = arith.constant 0 : index
      %43 = vector.load %arg11[%c0_27, %c0_28] : memref<256x1xf32, #tpu.memory_space<vmem>>, vector<256x1xf32>
      tpu.vector_store %arg11[%c0_27, %c0_28], %42 {strides = array<i32>} : memref<256x1xf32, #tpu.memory_space<vmem>>, vector<256x1xf32>,
      %cst_29 = arith.constant 0.000000e+00 : f32
      %44 = vector.broadcast %cst_29 : f32 to vector<256x1xf32>
      %c0_30 = arith.constant 0 : index
      %c0_31 = arith.constant 0 : index
      %45 = vector.load %arg12[%c0_30, %c0_31] : memref<256x1xf32, #tpu.memory_space<vmem>>, vector<256x1xf32>
      tpu.vector_store %arg12[%c0_30, %c0_31], %44 {strides = array<i32>} : memref<256x1xf32, #tpu.memory_space<vmem>>, vector<256x1xf32>,
      %cst_32 = arith.constant 0.000000e+00 : f32
      %46 = vector.broadcast %cst_32 : f32 to vector<256x128xf32>
      %c0_33 = arith.constant 0 : index
      %c0_34 = arith.constant 0 : index
      %47 = vector.load %arg13[%c0_33, %c0_34] : memref<256x128xf32, #tpu.memory_space<vmem>>, vector<256x128xf32>
      tpu.vector_store %arg13[%c0_33, %c0_34], %46 {strides = array<i32>} : memref<256x128xf32, #tpu.memory_space<vmem>>, vector<256x128xf32>,
    } else {
    }
    %c0 = arith.constant 0 : index
    %c0_1 = arith.constant 0 : index
    %3 = vector.load %arg2[%c0, %c0_1] : memref<256x1xf32, #tpu.memory_space<vmem>>, vector<256x1xf32>
    %c0_2 = arith.constant 0 : index
    %c0_3 = arith.constant 0 : index
    %4 = vector.load %arg3[%c0_2, %c0_3] : memref<1x256xf32, #tpu.memory_space<vmem>>, vector<1x256xf32>
    %5 = vector.broadcast %3 : vector<256x1xf32> to vector<256x256xf32>
    %6 = vector.broadcast %4 : vector<1x256xf32> to vector<256x256xf32>
    %7 = arith.addf %5, %6 : vector<256x256xf32>
    %cst = arith.constant 2.000000e-01 : f32
    %8 = vector.broadcast %cst : f32 to vector<256x256xf32>
    %9 = arith.mulf %8, %7 : vector<256x256xf32>
    %10 = arith.maximumf %7, %9 : vector<256x256xf32>
    %c0_4 = arith.constant 0 : index
    %c0_5 = arith.constant 0 : index
    %11 = vector.load %arg4[%c0_4, %c0_5] : memref<256x256xbf16, #tpu.memory_space<vmem>>, vector<256x256xbf16>
    %12 = arith.extf %11 : vector<256x256xbf16> to vector<256x256xf32>
    %13 = arith.addf %10, %12 : vector<256x256xf32>
    %cst_6 = arith.constant dense<0xFF800000> : vector<256xf32>
    %14 = vector.multi_reduction <maximumf>, %13, %cst_6 [1] : vector<256x256xf32> to vector<256xf32>
    %15 = vector.shape_cast %14 : vector<256xf32> to vector<256x1xf32>
    %c0_7 = arith.constant 0 : index
    %c0_8 = arith.constant 0 : index
    %16 = vector.load %arg11[%c0_7, %c0_8] : memref<256x1xf32, #tpu.memory_space<vmem>>, vector<256x1xf32>
    %17 = arith.maximumf %16, %15 : vector<256x1xf32>
    %c0_9 = arith.constant 0 : index
    %c0_10 = arith.constant 0 : index
    %18 = vector.load %arg11[%c0_9, %c0_10] : memref<256x1xf32, #tpu.memory_space<vmem>>, vector<256x1xf32>
    %19 = arith.subf %18, %17 : vector<256x1xf32>
    %20 = math.exp %19 : vector<256x1xf32>
    %21 = vector.broadcast %17 : vector<256x1xf32> to vector<256x256xf32>
    %22 = arith.subf %13, %21 : vector<256x256xf32>
    %23 = math.exp %22 : vector<256x256xf32>
    %c0_11 = arith.constant 0 : index
    %c0_12 = arith.constant 0 : index
    %24 = vector.load %arg12[%c0_11, %c0_12] : memref<256x1xf32, #tpu.memory_space<vmem>>, vector<256x1xf32>
    %25 = arith.mulf %20, %24 : vector<256x1xf32>
    %cst_13 = arith.constant dense<0.000000e+00> : vector<256xf32>
    %26 = vector.multi_reduction <add>, %23, %cst_13 [1] : vector<256x256xf32> to vector<256xf32>
    %27 = vector.shape_cast %26 : vector<256xf32> to vector<256x1xf32>
    %28 = arith.addf %25, %27 : vector<256x1xf32>
    %c0_14 = arith.constant 0 : index
    %c0_15 = arith.constant 0 : index
    %29 = vector.load %arg12[%c0_14, %c0_15] : memref<256x1xf32, #tpu.memory_space<vmem>>, vector<256x1xf32>
    tpu.vector_store %arg12[%c0_14, %c0_15], %28 {strides = array<i32>} : memref<256x1xf32, #tpu.memory_space<vmem>>, vector<256x1xf32>,
    %c0_16 = arith.constant 0 : index
    %c0_17 = arith.constant 0 : index
    %30 = vector.load %arg13[%c0_16, %c0_17] : memref<256x128xf32, #tpu.memory_space<vmem>>, vector<256x128xf32>
    %31 = vector.broadcast %20 : vector<256x1xf32> to vector<256x128xf32>
    %32 = arith.mulf %31, %30 : vector<256x128xf32>
    %33 = arith.truncf %23 : vector<256x256xf32> to vector<256x256xbf16>
    %c0_18 = arith.constant 0 : index
    %c0_19 = arith.constant 0 : index
    %34 = vector.load %arg5[%c0_18, %c0_19] : memref<256x128xbf16, #tpu.memory_space<vmem>>, vector<256x128xbf16>
    %cst_20 = arith.constant dense<0.000000e+00> : vector<256x128xf32>
    %35 = tpu.matmul %33, %34, %cst_20 {dimension_numbers = #tpu.dot_dimension_numbers<[1], [0], [0], [1], [0, 0, 1, 1], [], []>} : vector<256x256xbf16>, vector<256x128xbf16>, vector<256x128xf32> -> vector<256x128xf32>
    %36 = arith.addf %32, %35 : vector<256x128xf32>
    %c0_21 = arith.constant 0 : index
    %c0_22 = arith.constant 0 : index
    %37 = vector.load %arg13[%c0_21, %c0_22] : memref<256x128xf32, #tpu.memory_space<vmem>>, vector<256x128xf32>
    tpu.vector_store %arg13[%c0_21, %c0_22], %36 {strides = array<i32>} : memref<256x128xf32, #tpu.memory_space<vmem>>, vector<256x128xf32>,
    %c0_23 = arith.constant 0 : index
    %c0_24 = arith.constant 0 : index
    %38 = vector.load %arg11[%c0_23, %c0_24] : memref<256x1xf32, #tpu.memory_space<vmem>>, vector<256x1xf32>
    tpu.vector_store %arg11[%c0_23, %c0_24], %17 {strides = array<i32>} : memref<256x1xf32, #tpu.memory_space<vmem>>, vector<256x1xf32>,
    %c1_i32 = arith.constant 1 : i32
    %39 = arith.cmpi eq, %arg1, %c1_i32 : i32
    %40 = arith.extui %39 : i1 to i32
    %c0_i32_25 = arith.constant 0 : i32
    %41 = arith.cmpi ne, %40, %c0_i32_25 : i32
    scf.if %41 {
      %c0_26 = arith.constant 0 : index
      %c0_27 = arith.constant 0 : index
      %42 = vector.load %arg12[%c0_26, %c0_27] : memref<256x1xf32, #tpu.memory_space<vmem>>, vector<256x1xf32>
      %cst_28 = arith.constant 1.000000e-30 : f32
      %43 = vector.broadcast %cst_28 : f32 to vector<256x1xf32>
      %44 = arith.maximumf %42, %43 : vector<256x1xf32>
      %c0_29 = arith.constant 0 : index
      %c0_30 = arith.constant 0 : index
      %45 = vector.load %arg13[%c0_29, %c0_30] : memref<256x128xf32, #tpu.memory_space<vmem>>, vector<256x128xf32>
      %46 = tpu.reciprocal %44 {approx = true} : vector<256x1xf32> -> vector<256x1xf32>
      %47 = vector.broadcast %46 : vector<256x1xf32> to vector<256x128xf32>
      %48 = arith.mulf %45, %47 : vector<256x128xf32>
      %cst_31 = arith.constant 0.000000e+00 : f32
      %49 = vector.broadcast %cst_31 : f32 to vector<256x128xf32>
      %50 = arith.cmpf ogt, %48, %49 : vector<256x128xf32>
      %cst_32 = arith.constant 0.000000e+00 : f32
      %51 = vector.broadcast %cst_32 : f32 to vector<256x128xf32>
      %52 = arith.minimumf %48, %51 : vector<256x128xf32>
      %53 = math.exp %52 : vector<256x128xf32>
      %cst_33 = arith.constant 1.000000e+00 : f32
      %54 = vector.broadcast %cst_33 : f32 to vector<256x128xf32>
      %55 = arith.subf %53, %54 : vector<256x128xf32>
      %56 = arith.select %50, %48, %55 : vector<256x128xi1>, vector<256x128xf32>
      %cst_34 = arith.constant 0.000000e+00 : f32
      %57 = vector.broadcast %cst_34 : f32 to vector<256x128xf32>
      %58 = arith.maximumf %56, %57 : vector<256x128xf32>
      %59 = arith.truncf %58 : vector<256x128xf32> to vector<256x128xbf16>
      %c0_35 = arith.constant 0 : index
      %c0_36 = arith.constant 0 : index
      %60 = vector.load %arg6[%c0_35, %c0_36] : memref<128x128xbf16, #tpu.memory_space<vmem>>, vector<128x128xbf16>
      %cst_37 = arith.constant dense<0.000000e+00> : vector<256x128xf32>
      %61 = tpu.matmul %59, %60, %cst_37 {dimension_numbers = #tpu.dot_dimension_numbers<[1], [0], [0], [1], [0, 0, 1, 1], [], []>} : vector<256x128xbf16>, vector<128x128xbf16>, vector<256x128xf32> -> vector<256x128xf32>
      %c0_38 = arith.constant 0 : index
      %c0_39 = arith.constant 0 : index
      %62 = vector.load %arg7[%c0_38, %c0_39] : memref<1x128xf32, #tpu.memory_space<vmem>>, vector<1x128xf32>
      %63 = vector.broadcast %62 : vector<1x128xf32> to vector<256x128xf32>
      %64 = arith.addf %61, %63 : vector<256x128xf32>
      %65 = arith.truncf %64 : vector<256x128xf32> to vector<256x128xbf16>
      %c0_40 = arith.constant 0 : index
      %c0_41 = arith.constant 0 : index
      %66 = vector.load %arg8[%c0_40, %c0_41] : memref<128x128xbf16, #tpu.memory_space<vmem>>, vector<128x128xbf16>
      %cst_42 = arith.constant dense<0.000000e+00> : vector<256x128xf32>
      %67 = tpu.matmul %65, %66, %cst_42 {dimension_numbers = #tpu.dot_dimension_numbers<[1], [0], [0], [1], [0, 0, 1, 1], [], []>} : vector<256x128xbf16>, vector<128x128xbf16>, vector<256x128xf32> -> vector<256x128xf32>
      %c0_43 = arith.constant 0 : index
      %c0_44 = arith.constant 0 : index
      %68 = vector.load %arg9[%c0_43, %c0_44] : memref<1x128xf32, #tpu.memory_space<vmem>>, vector<1x128xf32>
      %69 = vector.broadcast %68 : vector<1x128xf32> to vector<256x128xf32>
      %70 = arith.addf %67, %69 : vector<256x128xf32>
      %cst_45 = arith.constant dense<0xFF800000> : vector<256xf32>
      %71 = vector.multi_reduction <maximumf>, %70, %cst_45 [1] : vector<256x128xf32> to vector<256xf32>
      %72 = vector.shape_cast %71 : vector<256xf32> to vector<256x1xf32>
      %73 = vector.broadcast %72 : vector<256x1xf32> to vector<256x128xf32>
      %74 = arith.subf %70, %73 : vector<256x128xf32>
      %75 = math.exp %74 : vector<256x128xf32>
      %cst_46 = arith.constant dense<0.000000e+00> : vector<256xf32>
      %76 = vector.multi_reduction <add>, %75, %cst_46 [1] : vector<256x128xf32> to vector<256xf32>
      %77 = vector.shape_cast %76 : vector<256xf32> to vector<256x1xf32>
      %78 = tpu.reciprocal %77 : vector<256x1xf32> -> vector<256x1xf32>
      %79 = vector.broadcast %78 : vector<256x1xf32> to vector<256x128xf32>
      %80 = arith.mulf %75, %79 : vector<256x128xf32>
      %c0_47 = arith.constant 0 : index
      %c0_48 = arith.constant 0 : index
      %81 = vector.load %arg10[%c0_47, %c0_48] : memref<256x128xf32, #tpu.memory_space<vmem>>, vector<256x128xf32>
      tpu.vector_store %arg10[%c0_47, %c0_48], %80 {strides = array<i32>} : memref<256x128xf32, #tpu.memory_space<vmem>>, vector<256x128xf32>,
    } else {
    }
    return
  }
  func.func @transform_0(%arg0: i32, %arg1: i32) -> (i32, i32) {
    %c0_i32 = arith.constant 0 : i32
    %c0_i32_0 = arith.constant 0 : i32
    return %arg0, %c0_i32 : i32, i32
  }
  func.func @transform_1(%arg0: i32, %arg1: i32) -> (i32, i32) {
    %c0_i32 = arith.constant 0 : i32
    %c0_i32_0 = arith.constant 0 : i32
    return %c0_i32, %arg1 : i32, i32
  }
  func.func @transform_2(%arg0: i32, %arg1: i32) -> (i32, i32) {
    %c0_i32 = arith.constant 0 : i32
    return %arg0, %arg1 : i32, i32
  }
  func.func @transform_3(%arg0: i32, %arg1: i32) -> (i32, i32) {
    %c0_i32 = arith.constant 0 : i32
    %c0_i32_0 = arith.constant 0 : i32
    return %arg1, %c0_i32 : i32, i32
  }
  func.func @transform_4(%arg0: i32, %arg1: i32) -> (i32, i32) {
    %c0_i32 = arith.constant 0 : i32
    %c0_i32_0 = arith.constant 0 : i32
    %c0_i32_1 = arith.constant 0 : i32
    return %c0_i32, %c0_i32_0 : i32, i32
  }
  func.func @transform_5(%arg0: i32, %arg1: i32) -> (i32, i32) {
    %c0_i32 = arith.constant 0 : i32
    %c0_i32_0 = arith.constant 0 : i32
    %c0_i32_1 = arith.constant 0 : i32
    return %c0_i32, %c0_i32_0 : i32, i32
  }
  func.func @transform_6(%arg0: i32, %arg1: i32) -> (i32, i32) {
    %c0_i32 = arith.constant 0 : i32
    %c0_i32_0 = arith.constant 0 : i32
    %c0_i32_1 = arith.constant 0 : i32
    return %c0_i32, %c0_i32_0 : i32, i32
  }
  func.func @transform_7(%arg0: i32, %arg1: i32) -> (i32, i32) {
    %c0_i32 = arith.constant 0 : i32
    %c0_i32_0 = arith.constant 0 : i32
    %c0_i32_1 = arith.constant 0 : i32
    return %c0_i32, %c0_i32_0 : i32, i32
  }
  func.func @transform_8(%arg0: i32, %arg1: i32) -> (i32, i32) {
    %c0_i32 = arith.constant 0 : i32
    %c0_i32_0 = arith.constant 0 : i32
    return %arg0, %c0_i32 : i32, i32
  }
}

</mosaic_0001>

<bundles_post_ra>
// kernel: gat_with_extra_head.2
= control target key start
LH: loop header
LB: loop body
LE: loop exit
PB: predicated region body
PF: predicated region fallthrough
CT: control target
= control target key end

     0   :  { %s1250_s15 = smov 0   ;;  %s1536_s0 = inlined_call_operand.vmem [shape: f32[512,16], index: 0, kind: input, shape index: {}]   ;;  %s1537_s1 = inlined_call_operand.vmem [shape: bf16[16,130], index: 1, kind: input, shape index: {}]   ;;  %s1538_s2 = inlined_call_operand.vmem [shape: bf16[512,128], index: 2, kind: output, shape index: {0}]   ;;  %s1539_s3 = inlined_call_operand.vmem [shape: f32[512,1], index: 3, kind: output, shape index: {1}]   ;;  %s1540_s4 = inlined_call_operand.vmem [shape: f32[512,1], index: 4, kind: output, shape index: {2}]  }
   0x1 LB: > { %s1008_s16 = sadd.s32 4294967295, %s1221_s15   ;;  %p1012_p0 = scmp.ge.s32.totalorder %s1221_s15, 1  ;;  %s1221_s15 = sphi %s1250_s15, %s15_s15  }
   0x2   : > { %p168_p1 = scmp.lt.s32.totalorder %s1221_s15, 3 }
   0x4   : > { %p169_p2 = pnand %p1012_p0, %p168_p1 }
   0x5   : > { %v1212_v0 = vld [vmem:[%s1537_s1 + $0x4] ss:$8 sps:$4 sm:$0xff] (!%p169_p2)   ;;  %s1013_s19 = sshll.u32 (!%p169_p2), %s1008_s16, 5  ;;  %v1214_v1 = vld [vmem:[%s1537_s1] ss:$8 sps:$4 sm:$0xff] (!%p169_p2)   ;;  %v1223_v2 = vmov (!%p169_p2), 0  }
   0x6   : > { %172 = sbr.rel (%p169_p2) target bundleno = 412 (0x19c), region = 28  ;;  %370 = vmatprep.mubr.bf16.mxu0 (!%p169_p2), %v1223_v2  ;;  %450 = vmatprep.mubr.bf16.mxu1 (!%p169_p2), %v1223_v2  ;;  %p205_p3 = scmp.lt.s32.totalorder (!%p169_p2), %s1013_s19, 63  ;;  %vm289_vm0 = vcmask (!%p169_p2), 130048   ;;  %vm691_vm1 = vcmask (!%p169_p2), 7168  }
   0x7   : > { %338 = vmatprep.subr.bf16.mxu0 (!%p169_p2), %v1212_v0  ;;  %1200 = vmatprep.subr.bf16.mxu1 (!%p169_p2), %v1212_v0  ;;  %s1224_s7 = smov (!%p169_p2), 127  }
   0x8   : > { %339 = vmatpush1.bf16.msra.mxu0 (!%p169_p2), %v1214_v1  ;;  %1201 = vmatpush1.bf16.msra.mxu1 (!%p169_p2), %v1214_v1 }
   0xd   : > { %s1542_s19 = smov (!%p205_p3, %s1013_s19), 63 }
   0xe   : > { %s1269_s22 = sshll.u32 %s1542_s19, 3  ;;  %s1016_s29 = sshll.u32 %s1542_s19, 2 }
   0xf   : > { %s1275_s25 = scalar_lea.vmem %s1536_s0, %s1269_s22  ;;  %s1343_s28 = scalar_lea.vmem %s1539_s3, %s1269_s22 }
  0x10   : > { %v229_v3 = vld [vmem:[%s1275_s25] sm:$0xff]  ;;  %v230_v4 = vld [vmem:[%s1275_s25 + $0x8] sm:$0xff]  ;;  %v231_v9 = vld [vmem:[%s1275_s25 + $0x10] sm:$0xff]  ;;  %s1351_s6 = scalar_lea.vmem %s1538_s2, %s1016_s29  ;;  %s1467_s10 = scalar_lea.vmem %s1540_s4, %s1269_s22 }
  0x11   : > { %v245_v5 = vld [vmem:[%s1275_s25 + $0x80] sm:$0xff]  ;;  %v261_v6 = vpack.c.bf16 %v230_v4, %v229_v3  ;;  %v246_v7 = vld [vmem:[%s1275_s25 + $0x88] sm:$0xff]  ;;  %v232_v10 = vld [vmem:[%s1275_s25 + $0x18] sm:$0xff] }
  0x12   : > { %v269_v8 = vpack.c.bf16 %v246_v7, %v245_v5  ;;  %v247_v11 = vld [vmem:[%s1275_s25 + $0x90] sm:$0xff]  ;;  %v248_v12 = vld [vmem:[%s1275_s25 + $0x98] sm:$0xff]  ;;  %v262_v13 = vpack.c.bf16 %v232_v10, %v231_v9  ;;  %v233_v15 = vld [vmem:[%s1275_s25 + $0x20] sm:$0xff] }
  0x13   : > { %1023 = vmatmul.mubr.msk.bf16.vlgmr.msra.gmra.mrb[0].mxu0 %vm289_vm0, %v261_v6  ;;  %v270_v14 = vpack.c.bf16 %v248_v12, %v247_v11  ;;  %v234_v16 = vld [vmem:[%s1275_s25 + $0x28] sm:$0xff]  ;;  %v249_v17 = vld [vmem:[%s1275_s25 + $0xa0] sm:$0xff]  ;;  %v235_v21 = vld [vmem:[%s1275_s25 + $0x30] sm:$0xff] }
  0x14   : > { %1031 = vmatmul.mubr.msk.bf16.vlgmr.msra.gmra.mrb[0].mxu1 %vm289_vm0, %v269_v8  ;;  %380 = vmatprep.mubr.bf16.mxu0 %v1223_v2  ;;  %v250_v18 = vld [vmem:[%s1275_s25 + $0xa8] sm:$0xff]  ;;  %v263_v19 = vpack.c.bf16 %v234_v16, %v233_v15  ;;  %v236_v22 = vld [vmem:[%s1275_s25 + $0x38] sm:$0xff]  ;;  %v251_v23 = vld [vmem:[%s1275_s25 + $0xb0] sm:$0xff] }
  0x15   : > { %460 = vmatprep.mubr.bf16.mxu1 %v1223_v2  ;;  %v271_v20 = vpack.c.bf16 %v250_v18, %v249_v17  ;;  %v252_v24 = vld [vmem:[%s1275_s25 + $0xb8] sm:$0xff]  ;;  %v264_v25 = vpack.c.bf16 %v236_v22, %v235_v21  ;;  %v237_v27 = vld [vmem:[%s1275_s25 + $0x40] sm:$0xff]  ;;  %v238_v28 = vld [vmem:[%s1275_s25 + $0x48] sm:$0xff] }
  0x16   : > { %v272_v26 = vpack.c.bf16 %v252_v24, %v251_v23  ;;  %v253_v29 = vld [vmem:[%s1275_s25 + $0xc0] sm:$0xff]  ;;  %v254_v30 = vld [vmem:[%s1275_s25 + $0xc8] sm:$0xff]  ;;  %v265_v31 = vpack.c.bf16 %v238_v28, %v237_v27  ;;  %v239_v33 = vld [vmem:[%s1275_s25 + $0x50] sm:$0xff] }
  0x17   : > { %v273_v32 = vpack.c.bf16 %v254_v30, %v253_v29  ;;  %v240_v34 = vld [vmem:[%s1275_s25 + $0x58] sm:$0xff]  ;;  %v255_v35 = vld [vmem:[%s1275_s25 + $0xd0] sm:$0xff]  ;;  %v241_v39 = vld [vmem:[%s1275_s25 + $0x60] sm:$0xff] }
  0x18   : > { %v256_v36 = vld [vmem:[%s1275_s25 + $0xd8] sm:$0xff]  ;;  %v266_v37 = vpack.c.bf16 %v240_v34, %v239_v33  ;;  %v242_v40 = vld [vmem:[%s1275_s25 + $0x68] sm:$0xff]  ;;  %v257_v41 = vld [vmem:[%s1275_s25 + $0xe0] sm:$0xff] }
  0x19   : > { %v274_v38 = vpack.c.bf16 %v256_v36, %v255_v35  ;;  %v258_v42 = vld [vmem:[%s1275_s25 + $0xe8] sm:$0xff]  ;;  %v267_v43 = vpack.c.bf16 %v242_v40, %v241_v39  ;;  %v243_v45 = vld [vmem:[%s1275_s25 + $0x70] sm:$0xff]  ;;  %v244_v46 = vld [vmem:[%s1275_s25 + $0x78] sm:$0xff] }
  0x1a   : > { %v275_v44 = vpack.c.bf16 %v258_v42, %v257_v41  ;;  %v259_v47 = vld [vmem:[%s1275_s25 + $0xf0] sm:$0xff]  ;;  %v260_v48 = vld [vmem:[%s1275_s25 + $0xf8] sm:$0xff]  ;;  %v268_v49 = vpack.c.bf16 %v244_v46, %v243_v45 }
  0x1b   : > { %1024 = vmatmul.mubr.msk.bf16.gmra.mrb[4].mxu0 %vm289_vm0, %v262_v13  ;;  %v276_v50 = vpack.c.bf16 %v260_v48, %v259_v47 }
  0x1c   : > { %1032 = vmatmul.mubr.msk.bf16.gmra.mrb[4].mxu1 %vm289_vm0, %v270_v14  ;;  %390 = vmatprep.mubr.bf16.mxu0 %v1223_v2 }
  0x1d   : > { %470 = vmatprep.mubr.bf16.mxu1 %v1223_v2 }
  0x23   : > { %1025 = vmatmul.mubr.msk.bf16.gmra.mrb[8].mxu0 %vm289_vm0, %v263_v19 }
  0x24   : > { %1033 = vmatmul.mubr.msk.bf16.gmra.mrb[8].mxu1 %vm289_vm0, %v271_v20  ;;  %400 = vmatprep.mubr.bf16.mxu0 %v1223_v2 }
  0x25   : > { %480 = vmatprep.mubr.bf16.mxu1 %v1223_v2 }
  0x2b   : > { %1026 = vmatmul.mubr.msk.bf16.gmra.mrb[12].mxu0 %vm289_vm0, %v264_v25 }
  0x2c   : > { %1034 = vmatmul.mubr.msk.bf16.gmra.mrb[12].mxu1 %vm289_vm0, %v272_v26  ;;  %410 = vmatprep.mubr.bf16.mxu0 %v1223_v2 }
  0x2d   : > { %490 = vmatprep.mubr.bf16.mxu1 %v1223_v2 }
  0x33   : > { %1027 = vmatmul.mubr.msk.bf16.gmra.mrb[16].mxu0 %vm289_vm0, %v265_v31 }
  0x34   : > { %1035 = vmatmul.mubr.msk.bf16.gmra.mrb[16].mxu1 %vm289_vm0, %v273_v32  ;;  %420 = vmatprep.mubr.bf16.mxu0 %v1223_v2 }
  0x35   : > { %500 = vmatprep.mubr.bf16.mxu1 %v1223_v2 }
  0x3b   : > { %1028 = vmatmul.mubr.msk.bf16.gmra.mrb[20].mxu0 %vm289_vm0, %v266_v37 }
  0x3c   : > { %1036 = vmatmul.mubr.msk.bf16.gmra.mrb[20].mxu1 %vm289_vm0, %v274_v38  ;;  %430 = vmatprep.mubr.bf16.mxu0 %v1223_v2 }
  0x3d   : > { %510 = vmatprep.mubr.bf16.mxu1 %v1223_v2 }
  0x43   : > { %1029 = vmatmul.mubr.msk.bf16.gmra.mrb[24].mxu0 %vm289_vm0, %v267_v43 }
  0x44   : > { %1037 = vmatmul.mubr.msk.bf16.gmra.mrb[24].mxu1 %vm289_vm0, %v275_v44  ;;  %440 = vmatprep.mubr.bf16.mxu0 %v1223_v2 }
  0x45   : > { %520 = vmatprep.mubr.bf16.mxu1 %v1223_v2 }
  0x4b   : > { %1030 = vmatmul.mubr.msk.bf16.gmra.mrb[28].mxu0 %vm289_vm0, %v268_v49 }
  0x4c   : > { %1038 = vmatmul.mubr.msk.bf16.gmra.mrb[28].mxu1 %vm289_vm0, %v276_v50 }
  0xe6   : > { %v372_v51 = vpop.f32.mrb[0].mxu0 }
  0xe7   : > { %v452_v52 = vpop.f32.mrb[0].mxu1  ;;  %v374_v53 = vpop.f32.mrb[1].mxu0 }
  0xe8   : > { %692 = vst.msk [vmem:[%s1343_s28] sm:$0xff] %vm691_vm1, %v374_v53  ;;  %v454_v54 = vpop.f32.mrb[1].mxu1  ;;  %756 = vrot.lane.b32.xlu0 %v374_v53, %s1224_s7  ;;  %v376_v55 = vpop.f32.mrb[2].mxu0 }
  0xe9   : > { %708 = vst.msk [vmem:[%s1343_s28 + $0x80] sm:$0xff] %vm691_vm1, %v454_v54  ;;  %v456_v56 = vpop.f32.mrb[2].mxu1  ;;  %v1108_v57 = vpack.c.bf16 %v376_v55, %v372_v51  ;;  %v378_v58 = vpop.f32.mrb[3].mxu0 }
  0xea   : > { %v1148_v59 = vpack.c.bf16 %v456_v56, %v452_v52  ;;  %693 = vst.msk [vmem:[%s1343_s28 + $0x8] sm:$0xff] %vm691_vm1, %v378_v58  ;;  %v458_v60 = vpop.f32.mrb[3].mxu1 }
  0xeb   : > { %1109 = vst [vmem:[%s1351_s6] sm:$0xff] %v1108_v57   ;;  %709 = vst.msk [vmem:[%s1343_s28 + $0x88] sm:$0xff] %vm691_vm1, %v458_v60  ;;  %790 = vrot.lane.b32.xlu1 %v458_v60, %s1224_s7 }
  0xec   : > { %1192 = vst [vmem:[%s1351_s6 + $0x40] sm:$0xff] %v1148_v59   ;;  %788 = vrot.lane.b32.xlu0 %v454_v54, %s1224_s7 }
  0xee   : > { %v382_v61 = vpop.f32.mrb[4].mxu0 }
  0xef   : > { %v384_v62 = vpop.f32.mrb[5].mxu0  ;;  %v462_v63 = vpop.f32.mrb[4].mxu1 }
  0xf0   : > { %694 = vst.msk [vmem:[%s1343_s28 + $0x10] sm:$0xff] %vm691_vm1, %v384_v62  ;;  %758 = vrot.lane.b32.xlu0 %v378_v58, %s1224_s7  ;;  %760 = vrot.lane.b32.xlu1 %v384_v62, %s1224_s7  ;;  %v386_v0 = vpop.f32.mrb[6].mxu0  ;;  %v464_v1 = vpop.f32.mrb[5].mxu1 }
  0xf1   : > { %v1113_v2 = vpack.c.bf16 %v386_v0, %v382_v61  ;;  %v388_v3 = vpop.f32.mrb[7].mxu0  ;;  %710 = vst.msk [vmem:[%s1343_s28 + $0x90] sm:$0xff] %vm691_vm1, %v464_v1  ;;  %v466_v4 = vpop.f32.mrb[6].mxu1 }
  0xf2   : > { %695 = vst.msk [vmem:[%s1343_s28 + $0x18] sm:$0xff] %vm691_vm1, %v388_v3  ;;  %v1153_v5 = vpack.c.bf16 %v466_v4, %v462_v63  ;;  %v468_v6 = vpop.f32.mrb[7].mxu1 }
  0xf3   : > { %1185 = vst [vmem:[%s1351_s6 + $0x8] sm:$0xff] %v1113_v2   ;;  %711 = vst.msk [vmem:[%s1343_s28 + $0x98] sm:$0xff] %vm691_vm1, %v468_v6 }
  0xf4   : > { %1193 = vst [vmem:[%s1351_s6 + $0x48] sm:$0xff] %v1153_v5   ;;  %762 = vrot.lane.b32.xlu1 %v388_v3, %s1224_s7  ;;  %792 = vrot.lane.b32.xlu0 %v464_v1, %s1224_s7 }
  0xf6   : > { %v392_v7 = vpop.f32.mrb[8].mxu0 }
  0xf7   : > { %v394_v8 = vpop.f32.mrb[9].mxu0  ;;  %v472_v9 = vpop.f32.mrb[8].mxu1 }
  0xf8   : > { %696 = vst.msk [vmem:[%s1343_s28 + $0x20] sm:$0xff] %vm691_vm1, %v394_v8  ;;  %794 = vrot.lane.b32.xlu1 %v468_v6, %s1224_s7  ;;  %v396_v10 = vpop.f32.mrb[10].mxu0  ;;  %764 = vrot.lane.b32.xlu0 %v394_v8, %s1224_s7  ;;  %v474_v11 = vpop.f32.mrb[9].mxu1 }
  0xf9   : > { %v1118_v12 = vpack.c.bf16 %v396_v10, %v392_v7  ;;  %v398_v13 = vpop.f32.mrb[11].mxu0  ;;  %712 = vst.msk [vmem:[%s1343_s28 + $0xa0] sm:$0xff] %vm691_vm1, %v474_v11  ;;  %v476_v14 = vpop.f32.mrb[10].mxu1 }
  0xfa   : > { %697 = vst.msk [vmem:[%s1343_s28 + $0x28] sm:$0xff] %vm691_vm1, %v398_v13  ;;  %v1158_v15 = vpack.c.bf16 %v476_v14, %v472_v9  ;;  %v478_v16 = vpop.f32.mrb[11].mxu1 }
  0xfb   : > { %1186 = vst [vmem:[%s1351_s6 + $0x10] sm:$0xff] %v1118_v12   ;;  %713 = vst.msk [vmem:[%s1343_s28 + $0xa8] sm:$0xff] %vm691_vm1, %v478_v16 }
  0xfc   : > { %1194 = vst [vmem:[%s1351_s6 + $0x50] sm:$0xff] %v1158_v15   ;;  %766 = vrot.lane.b32.xlu1 %v398_v13, %s1224_s7  ;;  %796 = vrot.lane.b32.xlu0 %v474_v11, %s1224_s7 }
  0xfe   : > { %v402_v17 = vpop.f32.mrb[12].mxu0 }
  0xff   : > { %v404_v18 = vpop.f32.mrb[13].mxu0  ;;  %v482_v19 = vpop.f32.mrb[12].mxu1 }
 0x100   : > { %698 = vst.msk [vmem:[%s1343_s28 + $0x30] sm:$0xff] %vm691_vm1, %v404_v18  ;;  %798 = vrot.lane.b32.xlu1 %v478_v16, %s1224_s7  ;;  %v406_v20 = vpop.f32.mrb[14].mxu0  ;;  %768 = vrot.lane.b32.xlu0 %v404_v18, %s1224_s7  ;;  %v484_v21 = vpop.f32.mrb[13].mxu1 }
 0x101   : > { %v1123_v22 = vpack.c.bf16 %v406_v20, %v402_v17  ;;  %v408_v23 = vpop.f32.mrb[15].mxu0  ;;  %714 = vst.msk [vmem:[%s1343_s28 + $0xb0] sm:$0xff] %vm691_vm1, %v484_v21  ;;  %v486_v24 = vpop.f32.mrb[14].mxu1 }
 0x102   : > { %699 = vst.msk [vmem:[%s1343_s28 + $0x38] sm:$0xff] %vm691_vm1, %v408_v23  ;;  %v1163_v25 = vpack.c.bf16 %v486_v24, %v482_v19  ;;  %v488_v26 = vpop.f32.mrb[15].mxu1 }
 0x103   : > { %1187 = vst [vmem:[%s1351_s6 + $0x18] sm:$0xff] %v1123_v22   ;;  %715 = vst.msk [vmem:[%s1343_s28 + $0xb8] sm:$0xff] %vm691_vm1, %v488_v26 }
 0x104   : > { %1195 = vst [vmem:[%s1351_s6 + $0x58] sm:$0xff] %v1163_v25   ;;  %770 = vrot.lane.b32.xlu1 %v408_v23, %s1224_s7  ;;  %800 = vrot.lane.b32.xlu0 %v484_v21, %s1224_s7 }
 0x106   : > { %v412_v27 = vpop.f32.mrb[16].mxu0 }
 0x107   : > { %v414_v28 = vpop.f32.mrb[17].mxu0  ;;  %v492_v29 = vpop.f32.mrb[16].mxu1 }
 0x108   : > { %700 = vst.msk [vmem:[%s1343_s28 + $0x40] sm:$0xff] %vm691_vm1, %v414_v28  ;;  %802 = vrot.lane.b32.xlu1 %v488_v26, %s1224_s7  ;;  %v416_v30 = vpop.f32.mrb[18].mxu0  ;;  %772 = vrot.lane.b32.xlu0 %v414_v28, %s1224_s7  ;;  %v494_v31 = vpop.f32.mrb[17].mxu1 }
 0x109   : > { %v1128_v32 = vpack.c.bf16 %v416_v30, %v412_v27  ;;  %v418_v33 = vpop.f32.mrb[19].mxu0  ;;  %716 = vst.msk [vmem:[%s1343_s28 + $0xc0] sm:$0xff] %vm691_vm1, %v494_v31  ;;  %v496_v34 = vpop.f32.mrb[18].mxu1 }
 0x10a   : > { %701 = vst.msk [vmem:[%s1343_s28 + $0x48] sm:$0xff] %vm691_vm1, %v418_v33  ;;  %v1168_v35 = vpack.c.bf16 %v496_v34, %v492_v29  ;;  %v498_v36 = vpop.f32.mrb[19].mxu1 }
 0x10b   : > { %1188 = vst [vmem:[%s1351_s6 + $0x20] sm:$0xff] %v1128_v32   ;;  %717 = vst.msk [vmem:[%s1343_s28 + $0xc8] sm:$0xff] %vm691_vm1, %v498_v36 }
 0x10c   : > { %1196 = vst [vmem:[%s1351_s6 + $0x60] sm:$0xff] %v1168_v35   ;;  %774 = vrot.lane.b32.xlu1 %v418_v33, %s1224_s7  ;;  %804 = vrot.lane.b32.xlu0 %v494_v31, %s1224_s7 }
 0x10e   : > { %v422_v37 = vpop.f32.mrb[20].mxu0 }
 0x10f   : > { %v424_v38 = vpop.f32.mrb[21].mxu0  ;;  %v502_v39 = vpop.f32.mrb[20].mxu1 }
 0x110   : > { %702 = vst.msk [vmem:[%s1343_s28 + $0x50] sm:$0xff] %vm691_vm1, %v424_v38  ;;  %806 = vrot.lane.b32.xlu1 %v498_v36, %s1224_s7  ;;  %v426_v40 = vpop.f32.mrb[22].mxu0  ;;  %776 = vrot.lane.b32.xlu0 %v424_v38, %s1224_s7  ;;  %v504_v41 = vpop.f32.mrb[21].mxu1 }
 0x111   : > { %v1133_v42 = vpack.c.bf16 %v426_v40, %v422_v37  ;;  %v428_v43 = vpop.f32.mrb[23].mxu0  ;;  %718 = vst.msk [vmem:[%s1343_s28 + $0xd0] sm:$0xff] %vm691_vm1, %v504_v41  ;;  %v506_v44 = vpop.f32.mrb[22].mxu1 }
 0x112   : > { %703 = vst.msk [vmem:[%s1343_s28 + $0x58] sm:$0xff] %vm691_vm1, %v428_v43  ;;  %v1173_v45 = vpack.c.bf16 %v506_v44, %v502_v39  ;;  %v508_v46 = vpop.f32.mrb[23].mxu1 }
 0x113   : > { %1189 = vst [vmem:[%s1351_s6 + $0x28] sm:$0xff] %v1133_v42   ;;  %719 = vst.msk [vmem:[%s1343_s28 + $0xd8] sm:$0xff] %vm691_vm1, %v508_v46 }
 0x114   : > { %1197 = vst [vmem:[%s1351_s6 + $0x68] sm:$0xff] %v1173_v45   ;;  %778 = vrot.lane.b32.xlu1 %v428_v43, %s1224_s7  ;;  %808 = vrot.lane.b32.xlu0 %v504_v41, %s1224_s7 }
 0x116   : > { %v432_v47 = vpop.f32.mrb[24].mxu0 }
 0x117   : > { %v434_v48 = vpop.f32.mrb[25].mxu0  ;;  %v512_v49 = vpop.f32.mrb[24].mxu1 }
 0x118   : > { %704 = vst.msk [vmem:[%s1343_s28 + $0x60] sm:$0xff] %vm691_vm1, %v434_v48  ;;  %810 = vrot.lane.b32.xlu1 %v508_v46, %s1224_s7  ;;  %v436_v50 = vpop.f32.mrb[26].mxu0  ;;  %780 = vrot.lane.b32.xlu0 %v434_v48, %s1224_s7  ;;  %v514_v51 = vpop.f32.mrb[25].mxu1 }
 0x119   : > { %v1138_v52 = vpack.c.bf16 %v436_v50, %v432_v47  ;;  %v438_v53 = vpop.f32.mrb[27].mxu0  ;;  %720 = vst.msk [vmem:[%s1343_s28 + $0xe0] sm:$0xff] %vm691_vm1, %v514_v51  ;;  %v516_v54 = vpop.f32.mrb[26].mxu1 }
 0x11a   : > { %705 = vst.msk [vmem:[%s1343_s28 + $0x68] sm:$0xff] %vm691_vm1, %v438_v53  ;;  %v1178_v55 = vpack.c.bf16 %v516_v54, %v512_v49  ;;  %v518_v56 = vpop.f32.mrb[27].mxu1 }
 0x11b   : > { %1190 = vst [vmem:[%s1351_s6 + $0x30] sm:$0xff] %v1138_v52   ;;  %721 = vst.msk [vmem:[%s1343_s28 + $0xe8] sm:$0xff] %vm691_vm1, %v518_v56 }
 0x11c   : > { %1198 = vst [vmem:[%s1351_s6 + $0x70] sm:$0xff] %v1178_v55   ;;  %782 = vrot.lane.b32.xlu1 %v438_v53, %s1224_s7  ;;  %812 = vrot.lane.b32.xlu0 %v514_v51, %s1224_s7 }
 0x11e   : > { %v442_v57 = vpop.f32.mrb[28].mxu0 }
 0x11f   : > { %v444_v58 = vpop.f32.mrb[29].mxu0  ;;  %v522_v59 = vpop.f32.mrb[28].mxu1 }
 0x120   : > { %706 = vst.msk [vmem:[%s1343_s28 + $0x70] sm:$0xff] %vm691_vm1, %v444_v58  ;;  %814 = vrot.lane.b32.xlu1 %v518_v56, %s1224_s7  ;;  %v446_v60 = vpop.f32.mrb[30].mxu0  ;;  %784 = vrot.lane.b32.xlu0 %v444_v58, %s1224_s7  ;;  %v524_v61 = vpop.f32.mrb[29].mxu1 }
 0x121   : > { %v1143_v62 = vpack.c.bf16 %v446_v60, %v442_v57  ;;  %v448_v63 = vpop.f32.mrb[31].mxu0  ;;  %722 = vst.msk [vmem:[%s1343_s28 + $0xf0] sm:$0xff] %vm691_vm1, %v524_v61  ;;  %v526_v0 = vpop.f32.mrb[30].mxu1 }
 0x122   : > { %707 = vst.msk [vmem:[%s1343_s28 + $0x78] sm:$0xff] %vm691_vm1, %v448_v63  ;;  %v1183_v1 = vpack.c.bf16 %v526_v0, %v522_v59  ;;  %v528_v2 = vpop.f32.mrb[31].mxu1 }
 0x123   : > { %1191 = vst [vmem:[%s1351_s6 + $0x38] sm:$0xff] %v1143_v62   ;;  %723 = vst.msk [vmem:[%s1343_s28 + $0xf8] sm:$0xff] %vm691_vm1, %v528_v2 }
 0x124   : > { %1199 = vst [vmem:[%s1351_s6 + $0x78] sm:$0xff] %v1183_v1   ;;  %786 = vrot.lane.b32.xlu1 %v448_v63, %s1224_s7  ;;  %816 = vrot.lane.b32.xlu0 %v524_v61, %s1224_s7 }
 0x128   : > { %818 = vrot.lane.b32.xlu1 %v528_v2, %s1224_s7 }
 0x15a   : > { %v757_v3 = vpop.permute.xlu0 %756 }
 0x15b   : > { %852 = vst.msk [vmem:[%s1467_s10] sm:$0xff] %vm691_vm1, %v757_v3 }
 0x15d   : > { %v791_v4 = vpop.permute.xlu1 %790 }
 0x15e   : > { %869 = vst.msk [vmem:[%s1467_s10 + $0x88] sm:$0xff] %vm691_vm1, %v791_v4  ;;  %v789_v5 = vpop.permute.xlu0 %788 }
 0x15f   : > { %868 = vst.msk [vmem:[%s1467_s10 + $0x80] sm:$0xff] %vm691_vm1, %v789_v5 }
 0x162   : > { %v759_v6 = vpop.permute.xlu0 %758  ;;  %v761_v7 = vpop.permute.xlu1 %760 }
 0x163   : > { %853 = vst.msk [vmem:[%s1467_s10 + $0x8] sm:$0xff] %vm691_vm1, %v759_v6  ;;  %854 = vst.msk [vmem:[%s1467_s10 + $0x10] sm:$0xff] %vm691_vm1, %v761_v7 }
 0x166   : > { %v763_v8 = vpop.permute.xlu1 %762  ;;  %v793_v9 = vpop.permute.xlu0 %792 }
 0x167   : > { %855 = vst.msk [vmem:[%s1467_s10 + $0x18] sm:$0xff] %vm691_vm1, %v763_v8  ;;  %870 = vst.msk [vmem:[%s1467_s10 + $0x90] sm:$0xff] %vm691_vm1, %v793_v9 }
 0x16a   : > { %v795_v10 = vpop.permute.xlu1 %794  ;;  %v765_v11 = vpop.permute.xlu0 %764 }
 0x16b   : > { %871 = vst.msk [vmem:[%s1467_s10 + $0x98] sm:$0xff] %vm691_vm1, %v795_v10  ;;  %856 = vst.msk [vmem:[%s1467_s10 + $0x20] sm:$0xff] %vm691_vm1, %v765_v11 }
 0x16e   : > { %v767_v12 = vpop.permute.xlu1 %766  ;;  %v797_v13 = vpop.permute.xlu0 %796 }
 0x16f   : > { %857 = vst.msk [vmem:[%s1467_s10 + $0x28] sm:$0xff] %vm691_vm1, %v767_v12  ;;  %872 = vst.msk [vmem:[%s1467_s10 + $0xa0] sm:$0xff] %vm691_vm1, %v797_v13 }
 0x172   : > { %v799_v14 = vpop.permute.xlu1 %798  ;;  %v769_v15 = vpop.permute.xlu0 %768 }
 0x173   : > { %873 = vst.msk [vmem:[%s1467_s10 + $0xa8] sm:$0xff] %vm691_vm1, %v799_v14  ;;  %858 = vst.msk [vmem:[%s1467_s10 + $0x30] sm:$0xff] %vm691_vm1, %v769_v15 }
 0x176   : > { %v771_v16 = vpop.permute.xlu1 %770  ;;  %v801_v17 = vpop.permute.xlu0 %800 }
 0x177   : > { %859 = vst.msk [vmem:[%s1467_s10 + $0x38] sm:$0xff] %vm691_vm1, %v771_v16  ;;  %874 = vst.msk [vmem:[%s1467_s10 + $0xb0] sm:$0xff] %vm691_vm1, %v801_v17 }
 0x17a   : > { %v803_v18 = vpop.permute.xlu1 %802  ;;  %v773_v19 = vpop.permute.xlu0 %772 }
 0x17b   : > { %875 = vst.msk [vmem:[%s1467_s10 + $0xb8] sm:$0xff] %vm691_vm1, %v803_v18  ;;  %860 = vst.msk [vmem:[%s1467_s10 + $0x40] sm:$0xff] %vm691_vm1, %v773_v19 }
 0x17e   : > { %v775_v20 = vpop.permute.xlu1 %774  ;;  %v805_v21 = vpop.permute.xlu0 %804 }
 0x17f   : > { %861 = vst.msk [vmem:[%s1467_s10 + $0x48] sm:$0xff] %vm691_vm1, %v775_v20  ;;  %876 = vst.msk [vmem:[%s1467_s10 + $0xc0] sm:$0xff] %vm691_vm1, %v805_v21 }
 0x182   : > { %v807_v22 = vpop.permute.xlu1 %806  ;;  %v777_v23 = vpop.permute.xlu0 %776 }
 0x183   : > { %877 = vst.msk [vmem:[%s1467_s10 + $0xc8] sm:$0xff] %vm691_vm1, %v807_v22  ;;  %862 = vst.msk [vmem:[%s1467_s10 + $0x50] sm:$0xff] %vm691_vm1, %v777_v23 }
 0x186   : > { %v779_v24 = vpop.permute.xlu1 %778  ;;  %v809_v25 = vpop.permute.xlu0 %808 }
 0x187   : > { %863 = vst.msk [vmem:[%s1467_s10 + $0x58] sm:$0xff] %vm691_vm1, %v779_v24  ;;  %878 = vst.msk [vmem:[%s1467_s10 + $0xd0] sm:$0xff] %vm691_vm1, %v809_v25 }
 0x18a   : > { %v811_v26 = vpop.permute.xlu1 %810  ;;  %v781_v27 = vpop.permute.xlu0 %780 }
 0x18b   : > { %879 = vst.msk [vmem:[%s1467_s10 + $0xd8] sm:$0xff] %vm691_vm1, %v811_v26  ;;  %864 = vst.msk [vmem:[%s1467_s10 + $0x60] sm:$0xff] %vm691_vm1, %v781_v27 }
 0x18e   : > { %v783_v28 = vpop.permute.xlu1 %782  ;;  %v813_v29 = vpop.permute.xlu0 %812 }
 0x18f   : > { %865 = vst.msk [vmem:[%s1467_s10 + $0x68] sm:$0xff] %vm691_vm1, %v783_v28  ;;  %880 = vst.msk [vmem:[%s1467_s10 + $0xe0] sm:$0xff] %vm691_vm1, %v813_v29 }
 0x192   : > { %v815_v30 = vpop.permute.xlu1 %814  ;;  %v785_v31 = vpop.permute.xlu0 %784 }
 0x193   : > { %881 = vst.msk [vmem:[%s1467_s10 + $0xe8] sm:$0xff] %vm691_vm1, %v815_v30  ;;  %866 = vst.msk [vmem:[%s1467_s10 + $0x70] sm:$0xff] %vm691_vm1, %v785_v31 }
 0x196   : > { %v787_v32 = vpop.permute.xlu1 %786  ;;  %v817_v33 = vpop.permute.xlu0 %816 }
 0x197   : > { %867 = vst.msk [vmem:[%s1467_s10 + $0x78] sm:$0xff] %vm691_vm1, %v787_v32  ;;  %882 = vst.msk [vmem:[%s1467_s10 + $0xf0] sm:$0xff] %vm691_vm1, %v817_v33 }
 0x19a   : > { %v819_v34 = vpop.permute.xlu1 %818 }
 0x19b   : > { %883 = vst.msk [vmem:[%s1467_s10 + $0xf8] sm:$0xff] %vm691_vm1, %v819_v34 }
 0x19c PF: > { %s15_s15 = sadd.s32 1, %s1221_s15  }
 0x19d   : > { %p12_p4 = scmp.ge.s32.totalorder %s15_s15, 4  }
 0x19f   :  { %14 = sbr.rel (!%p12_p4) target bundleno = 1 (0x1), region = 82 }

// kernel: gat_with_extra_head.3
= control target key start
LH: loop header
LB: loop body
LE: loop exit
PB: predicated region body
PF: predicated region fallthrough
CT: control target
= control target key end

     0   :  { %s7683_s0 = inlined_call_operand.vmem [shape: f32[512,1], index: 0, kind: input, shape index: {}]   ;;  %s7684_s1 = inlined_call_operand.vmem [shape: f32[1,512], index: 1, kind: input, shape index: {}]   ;;  %s7685_s2 = inlined_call_operand.vmem [shape: bf16[512,512], index: 2, kind: input, shape index: {}]   ;;  %s7686_s3 = inlined_call_operand.vmem [shape: bf16[512,128], index: 3, kind: input, shape index: {}]   ;;  %s7687_s4 = inlined_call_operand.vmem [shape: bf16[128,128], index: 4, kind: input, shape index: {}]   ;;  %s7688_s5 = inlined_call_operand.vmem [shape: f32[1,128], index: 5, kind: input, shape index: {}]   ;;  %s7689_s6 = inlined_call_operand.vmem [shape: bf16[128,128], index: 6, kind: input, shape index: {}]   ;;  %s7690_s7 = inlined_call_operand.vmem [shape: f32[1,128], index: 7, kind: input, shape index: {}]   ;;  %s7691_s8 = inlined_call_operand.vmem [shape: f32[512,128], index: 8, kind: output, shape index: {}]  }
   0x1   :  { %7793 = sst [smem:[#allocation80_spill]] %s7685_s2 }
   0x2   :  { %s5164_s27 = smov 0   ;;  %s5166_s28 = smov 0  }
   0x3   :  { %s5168_s29 = smov 0   ;;  %s5170_s30 = smov 0  }
   0x4   :  { %s5172_s9 = smov 0   ;;  %s5174_s10 = smov 0  }
   0x5   :  { %s5176_s11 = smov 0  }
   0x6 LB: > { %s27_s12 = sadd.s32 1, %s5105_s9  ;;  %s30_s13 = sadd.s32 1, %s5109_s10  ;;  %s5113_s11 = sphi %s5176_s11, %s18_s11   ;;  %s5109_s10 = sphi %s5174_s10, %s8048_s10   ;;  %s5105_s9 = sphi %s5172_s9, %s8047_s9   ;;  %s5101_s30 = sphi %s5170_s30, %s8046_s30   ;;  %s5097_s29 = sphi %s5168_s29, %s8045_s29   ;;  %s5093_s28 = sphi %s5166_s28, %s8044_s28   ;;  %s5089_s27 = sphi %s5164_s27, %s8043_s27  }
   0x7   : > { %p28_p0 = scmp.ge.s32.totalorder %s27_s12, 2  ;;  %p98_p1 = scmp.ne.s32.totalorder %s5093_s28, %s5089_s27 }
   0x8   : > { %p99_p2 = scmp.eq.s32.totalorder %s5113_s11, 0  ;;  %s91_s17 = sadd.s32 1, %s5093_s28 }
   0x9   : > { %s8050_s12 = smov (%p28_p0, %s27_s12), 0  ;;  %s8052_s13 = smov (!%p28_p0, %s30_s13), %s5109_s10 }
   0xa   : > { %p100_p3 = por %p99_p2, %p98_p1  ;;  %p32_p4 = scmp.ge.s32.totalorder %s8052_s13, 2 }
   0xb   : > { %s87_s14 = ssub.s32 %s5105_s9, %s8050_s12  ;;  %p4157_p6 = scmp.ge.s32.totalorder %s5113_s11, 4 }
   0xc   : > { %s8054_s13 = smov (%p32_p4, %s8052_s13), 0 }
   0xd   : > { %7794 = sst [smem:[#allocation6_spill]] %s8054_s13  ;;  %s86_s15 = ssub.s32 %s5109_s10, %s8054_s13 }
   0xe   : > { %s88_s16 = sor.u32 %s87_s14, %s86_s15  ;;  %272 = sbr.rel (%p4157_p6) target bundleno = 47 (0x2f), region = 32 }
   0xf   : > { %p89_p5 = scmp.eq.s32.totalorder %s88_s16, 0 }
  0x11   : > { %s5215_s18 = scalar_select %p89_p5, %s5093_s28, %s91_s17  }
  0x15   : > { %292 = sbr.rel (!%p100_p3) target bundleno = 47 (0x2f), region = 44  ;;  %s294_s19 = sand.u32 (%p100_p3), 1, %s5093_s28  }
  0x16   : > { %s4160_s20 = sshll.u32 (%p100_p3), %s5105_s9, 1  ;;  %s4158_s21 = sshll.u32 (%p100_p3), %s294_s19, 8 }
  0x17   : > { %s4242_s22 = sshll.u32 (%p100_p3), %s5109_s10, 7  ;;  %s7795_s2 = sld [smem:[#allocation80_spill]] (%p100_p3) }
  0x18   : > { %s300_s23 = sadd.s32 (%p100_p3), %s4242_s22, %s4160_s20  ;;  %s5229_s15 = scalar_lea.vmem (%p100_p3), [#allocation5], %s4158_s21 }
  0x19   : > { %s4162_s24 = sshll.u32 (%p100_p3), %s300_s23, 2 }
  0x1d   : > { %s5224_s14 = scalar_lea.vmem %s7795_s2, %s4162_s24 }
  0x1e   : > { %v392_v0 = vld [vmem:[%s5224_s14] sm:$0xff]  ;;  %v394_v1 = vld [vmem:[%s5224_s14 + $0x10] sm:$0xff] }
  0x1f   : > { %v396_v2 = vld [vmem:[%s5224_s14 + $0x20] sm:$0xff]  ;;  %393 = vst [vmem:[%s5229_s15] sm:$0xff] %v392_v0  ;;  %395 = vst [vmem:[%s5229_s15 + $0x8] sm:$0xff] %v394_v1  ;;  %v398_v3 = vld [vmem:[%s5224_s14 + $0x30] sm:$0xff] }
  0x20   : > { %397 = vst [vmem:[%s5229_s15 + $0x10] sm:$0xff] %v396_v2  ;;  %v400_v4 = vld [vmem:[%s5224_s14 + $0x40] sm:$0xff]  ;;  %v402_v5 = vld [vmem:[%s5224_s14 + $0x50] sm:$0xff]  ;;  %399 = vst [vmem:[%s5229_s15 + $0x18] sm:$0xff] %v398_v3 }
  0x21   : > { %401 = vst [vmem:[%s5229_s15 + $0x20] sm:$0xff] %v400_v4  ;;  %403 = vst [vmem:[%s5229_s15 + $0x28] sm:$0xff] %v402_v5  ;;  %v404_v6 = vld [vmem:[%s5224_s14 + $0x60] sm:$0xff]  ;;  %v406_v7 = vld [vmem:[%s5224_s14 + $0x70] sm:$0xff] }
  0x22   : > { %v408_v8 = vld [vmem:[%s5224_s14 + $0x80] sm:$0xff]  ;;  %405 = vst [vmem:[%s5229_s15 + $0x30] sm:$0xff] %v404_v6  ;;  %407 = vst [vmem:[%s5229_s15 + $0x38] sm:$0xff] %v406_v7  ;;  %v410_v9 = vld [vmem:[%s5224_s14 + $0x90] sm:$0xff] }
  0x23   : > { %409 = vst [vmem:[%s5229_s15 + $0x40] sm:$0xff] %v408_v8  ;;  %v412_v10 = vld [vmem:[%s5224_s14 + $0xa0] sm:$0xff]  ;;  %v414_v11 = vld [vmem:[%s5224_s14 + $0xb0] sm:$0xff]  ;;  %411 = vst [vmem:[%s5229_s15 + $0x48] sm:$0xff] %v410_v9 }
  0x24   : > { %413 = vst [vmem:[%s5229_s15 + $0x50] sm:$0xff] %v412_v10  ;;  %415 = vst [vmem:[%s5229_s15 + $0x58] sm:$0xff] %v414_v11  ;;  %v416_v12 = vld [vmem:[%s5224_s14 + $0xc0] sm:$0xff]  ;;  %v418_v13 = vld [vmem:[%s5224_s14 + $0xd0] sm:$0xff] }
  0x25   : > { %v420_v14 = vld [vmem:[%s5224_s14 + $0xe0] sm:$0xff]  ;;  %417 = vst [vmem:[%s5229_s15 + $0x60] sm:$0xff] %v416_v12  ;;  %419 = vst [vmem:[%s5229_s15 + $0x68] sm:$0xff] %v418_v13  ;;  %v422_v15 = vld [vmem:[%s5224_s14 + $0xf0] sm:$0xff] }
  0x26   : > { %421 = vst [vmem:[%s5229_s15 + $0x70] sm:$0xff] %v420_v14  ;;  %v424_v16 = vld [vmem:[%s5224_s14 + $0x100] sm:$0xff]  ;;  %v426_v17 = vld [vmem:[%s5224_s14 + $0x110] sm:$0xff]  ;;  %423 = vst [vmem:[%s5229_s15 + $0x78] sm:$0xff] %v422_v15 }
  0x27   : > { %425 = vst [vmem:[%s5229_s15 + $0x80] sm:$0xff] %v424_v16  ;;  %427 = vst [vmem:[%s5229_s15 + $0x88] sm:$0xff] %v426_v17  ;;  %v428_v18 = vld [vmem:[%s5224_s14 + $0x120] sm:$0xff]  ;;  %v430_v19 = vld [vmem:[%s5224_s14 + $0x130] sm:$0xff] }
  0x28   : > { %v432_v20 = vld [vmem:[%s5224_s14 + $0x140] sm:$0xff]  ;;  %429 = vst [vmem:[%s5229_s15 + $0x90] sm:$0xff] %v428_v18  ;;  %431 = vst [vmem:[%s5229_s15 + $0x98] sm:$0xff] %v430_v19  ;;  %v434_v21 = vld [vmem:[%s5224_s14 + $0x150] sm:$0xff] }
  0x29   : > { %433 = vst [vmem:[%s5229_s15 + $0xa0] sm:$0xff] %v432_v20  ;;  %v436_v22 = vld [vmem:[%s5224_s14 + $0x160] sm:$0xff]  ;;  %v438_v23 = vld [vmem:[%s5224_s14 + $0x170] sm:$0xff]  ;;  %435 = vst [vmem:[%s5229_s15 + $0xa8] sm:$0xff] %v434_v21 }
  0x2a   : > { %437 = vst [vmem:[%s5229_s15 + $0xb0] sm:$0xff] %v436_v22  ;;  %439 = vst [vmem:[%s5229_s15 + $0xb8] sm:$0xff] %v438_v23  ;;  %v440_v24 = vld [vmem:[%s5224_s14 + $0x180] sm:$0xff]  ;;  %v442_v25 = vld [vmem:[%s5224_s14 + $0x190] sm:$0xff] }
  0x2b   : > { %v444_v26 = vld [vmem:[%s5224_s14 + $0x1a0] sm:$0xff]  ;;  %441 = vst [vmem:[%s5229_s15 + $0xc0] sm:$0xff] %v440_v24  ;;  %443 = vst [vmem:[%s5229_s15 + $0xc8] sm:$0xff] %v442_v25  ;;  %v446_v27 = vld [vmem:[%s5224_s14 + $0x1b0] sm:$0xff] }
  0x2c   : > { %445 = vst [vmem:[%s5229_s15 + $0xd0] sm:$0xff] %v444_v26  ;;  %v448_v28 = vld [vmem:[%s5224_s14 + $0x1c0] sm:$0xff]  ;;  %v450_v29 = vld [vmem:[%s5224_s14 + $0x1d0] sm:$0xff]  ;;  %447 = vst [vmem:[%s5229_s15 + $0xd8] sm:$0xff] %v446_v27 }
  0x2d   : > { %449 = vst [vmem:[%s5229_s15 + $0xe0] sm:$0xff] %v448_v28  ;;  %451 = vst [vmem:[%s5229_s15 + $0xe8] sm:$0xff] %v450_v29  ;;  %v452_v30 = vld [vmem:[%s5224_s14 + $0x1e0] sm:$0xff]  ;;  %v454_v31 = vld [vmem:[%s5224_s14 + $0x1f0] sm:$0xff] }
  0x2e   : > { %453 = vst [vmem:[%s5229_s15 + $0xf0] sm:$0xff] %v452_v30  ;;  %455 = vst [vmem:[%s5229_s15 + $0xf8] sm:$0xff] %v454_v31 }
  0x2f PF: > { %p4163_p7 = scmp.ge.s32.totalorder %s5113_s11, 1  ;;  %p469_p8 = scmp.lt.s32.totalorder %s5113_s11, 5 }
  0x31   : > { %p470_p9 = pnand %p4163_p7, %p469_p8 }
  0x33   : > { %473 = sbr.rel (%p470_p9) target bundleno = 1837 (0x72d), region = 86 }
  0x3a   : > { %s476_s16 = sand.u32 1, %s5089_s27   ;;  %s4165_s17 = sshll.u32 %s5101_s30, 5 }
  0x3b   : > { %s4164_s19 = sshll.u32 %s476_s16, 8  ;;  %p524_p10 = scmp.lt.s32.totalorder %s4165_s17, 63 }
  0x3c   : > { %s4167_s20 = sshll.u32 %s5097_s29, 1  ;;  %s4168_s21 = sshll.u32 %s5097_s29, 5 }
  0x3d   : > { %s8056_s17 = smov (!%p524_p10, %s4165_s17), 63  ;;  %p530_p11 = scmp.lt.s32.totalorder %s4167_s20, 3 }
  0x3e   : > { %s4166_s22 = sshll.u32 %s8056_s17, 3  ;;  %p537_p12 = scmp.lt.s32.totalorder %s4168_s21, 63 }
  0x3f   : > { %s5301_s25 = scalar_lea.vmem %s7683_s0, %s4166_s22  ;;  %s5306_s15 = scalar_lea.vmem %s7691_s8, %s4166_s22 }
  0x40   : > { %s8058_s20 = smov (!%p530_p11, %s4167_s20), 3  ;;  %s8060_s21 = smov (!%p537_p12, %s4168_s21), 63 }
  0x41   : > { %s532_s16 = scalar_lea.vmem %s7684_s1, %s8058_s20  ;;  %s4169_s17 = sshll.u32 %s8060_s21, 2 }
  0x42   : > { %s5317_s23 = scalar_lea.vmem %s7686_s3, %s4169_s17  ;;  %s5319_s24 = scalar_lea.vmem [#allocation5], %s4164_s19 }
  0x43   : > { %p4172_p13 = scmp.ne.s32.totalorder %s5097_s29, 0 }
  0x44   : > { %vm553_vm0 = vcmask (!%p4172_p13), 7168   ;;  %v5115_v32 = vmov (!%p4172_p13), -1e+30   ;;  %v5116_v33 = vmov (!%p4172_p13), 0.0  }
  0x45   : > { %552 = sbr.rel (%p4172_p13) target bundleno = 117 (0x75), region = 94  ;;  %554 = vst.msk [vmem:[#allocation2] sm:$0xff] (!%p4172_p13), %vm553_vm0, %v5115_v32  ;;  %555 = vst.msk [vmem:[#allocation2 + $0x8] sm:$0xff] (!%p4172_p13), %vm553_vm0, %v5115_v32 }
  0x46   : > { %556 = vst.msk [vmem:[#allocation2 + $0x10] sm:$0xff] (!%p4172_p13), %vm553_vm0, %v5115_v32  ;;  %557 = vst.msk [vmem:[#allocation2 + $0x18] sm:$0xff] (!%p4172_p13), %vm553_vm0, %v5115_v32 }
  0x47   : > { %558 = vst.msk [vmem:[#allocation2 + $0x20] sm:$0xff] (!%p4172_p13), %vm553_vm0, %v5115_v32  ;;  %559 = vst.msk [vmem:[#allocation2 + $0x28] sm:$0xff] (!%p4172_p13), %vm553_vm0, %v5115_v32 }
  0x48   : > { %560 = vst.msk [vmem:[#allocation2 + $0x30] sm:$0xff] (!%p4172_p13), %vm553_vm0, %v5115_v32  ;;  %561 = vst.msk [vmem:[#allocation2 + $0x38] sm:$0xff] (!%p4172_p13), %vm553_vm0, %v5115_v32 }
  0x49   : > { %562 = vst.msk [vmem:[#allocation2 + $0x40] sm:$0xff] (!%p4172_p13), %vm553_vm0, %v5115_v32  ;;  %563 = vst.msk [vmem:[#allocation2 + $0x48] sm:$0xff] (!%p4172_p13), %vm553_vm0, %v5115_v32 }
  0x4a   : > { %564 = vst.msk [vmem:[#allocation2 + $0x50] sm:$0xff] (!%p4172_p13), %vm553_vm0, %v5115_v32  ;;  %565 = vst.msk [vmem:[#allocation2 + $0x58] sm:$0xff] (!%p4172_p13), %vm553_vm0, %v5115_v32 }
  0x4b   : > { %566 = vst.msk [vmem:[#allocation2 + $0x60] sm:$0xff] (!%p4172_p13), %vm553_vm0, %v5115_v32  ;;  %567 = vst.msk [vmem:[#allocation2 + $0x68] sm:$0xff] (!%p4172_p13), %vm553_vm0, %v5115_v32 }
  0x4c   : > { %568 = vst.msk [vmem:[#allocation2 + $0x70] sm:$0xff] %vm553_vm0, %v5115_v32  ;;  %569 = vst.msk [vmem:[#allocation2 + $0x78] sm:$0xff] %vm553_vm0, %v5115_v32 }
  0x4d   : > { %570 = vst.msk [vmem:[#allocation2 + $0x80] sm:$0xff] %vm553_vm0, %v5115_v32  ;;  %571 = vst.msk [vmem:[#allocation2 + $0x88] sm:$0xff] %vm553_vm0, %v5115_v32 }
  0x4e   : > { %572 = vst.msk [vmem:[#allocation2 + $0x90] sm:$0xff] %vm553_vm0, %v5115_v32  ;;  %573 = vst.msk [vmem:[#allocation2 + $0x98] sm:$0xff] %vm553_vm0, %v5115_v32 }
  0x4f   : > { %574 = vst.msk [vmem:[#allocation2 + $0xa0] sm:$0xff] %vm553_vm0, %v5115_v32  ;;  %575 = vst.msk [vmem:[#allocation2 + $0xa8] sm:$0xff] %vm553_vm0, %v5115_v32 }
  0x50   : > { %576 = vst.msk [vmem:[#allocation2 + $0xb0] sm:$0xff] %vm553_vm0, %v5115_v32  ;;  %577 = vst.msk [vmem:[#allocation2 + $0xb8] sm:$0xff] %vm553_vm0, %v5115_v32 }
  0x51   : > { %578 = vst.msk [vmem:[#allocation2 + $0xc0] sm:$0xff] %vm553_vm0, %v5115_v32  ;;  %579 = vst.msk [vmem:[#allocation2 + $0xc8] sm:$0xff] %vm553_vm0, %v5115_v32 }
  0x52   : > { %580 = vst.msk [vmem:[#allocation2 + $0xd0] sm:$0xff] %vm553_vm0, %v5115_v32  ;;  %581 = vst.msk [vmem:[#allocation2 + $0xd8] sm:$0xff] %vm553_vm0, %v5115_v32 }
  0x53   : > { %582 = vst.msk [vmem:[#allocation2 + $0xe0] sm:$0xff] %vm553_vm0, %v5115_v32  ;;  %583 = vst.msk [vmem:[#allocation2 + $0xe8] sm:$0xff] %vm553_vm0, %v5115_v32 }
  0x54   : > { %584 = vst.msk [vmem:[#allocation2 + $0xf0] sm:$0xff] %vm553_vm0, %v5115_v32  ;;  %585 = vst.msk [vmem:[#allocation2 + $0xf8] sm:$0xff] %vm553_vm0, %v5115_v32 }
  0x55   : > { %586 = vst.msk [vmem:[#allocation3] sm:$0xff] %vm553_vm0, %v5116_v33  ;;  %587 = vst.msk [vmem:[#allocation3 + $0x8] sm:$0xff] %vm553_vm0, %v5116_v33 }
  0x56   : > { %588 = vst.msk [vmem:[#allocation3 + $0x10] sm:$0xff] %vm553_vm0, %v5116_v33  ;;  %589 = vst.msk [vmem:[#allocation3 + $0x18] sm:$0xff] %vm553_vm0, %v5116_v33 }
  0x57   : > { %590 = vst.msk [vmem:[#allocation3 + $0x20] sm:$0xff] %vm553_vm0, %v5116_v33  ;;  %591 = vst.msk [vmem:[#allocation3 + $0x28] sm:$0xff] %vm553_vm0, %v5116_v33 }
  0x58   : > { %592 = vst.msk [vmem:[#allocation3 + $0x30] sm:$0xff] %vm553_vm0, %v5116_v33  ;;  %593 = vst.msk [vmem:[#allocation3 + $0x38] sm:$0xff] %vm553_vm0, %v5116_v33 }
  0x59   : > { %594 = vst.msk [vmem:[#allocation3 + $0x40] sm:$0xff] %vm553_vm0, %v5116_v33  ;;  %595 = vst.msk [vmem:[#allocation3 + $0x48] sm:$0xff] %vm553_vm0, %v5116_v33 }
  0x5a   : > { %596 = vst.msk [vmem:[#allocation3 + $0x50] sm:$0xff] %vm553_vm0, %v5116_v33  ;;  %597 = vst.msk [vmem:[#allocation3 + $0x58] sm:$0xff] %vm553_vm0, %v5116_v33 }
  0x5b   : > { %598 = vst.msk [vmem:[#allocation3 + $0x60] sm:$0xff] %vm553_vm0, %v5116_v33  ;;  %599 = vst.msk [vmem:[#allocation3 + $0x68] sm:$0xff] %vm553_vm0, %v5116_v33 }
  0x5c   : > { %600 = vst.msk [vmem:[#allocation3 + $0x70] sm:$0xff] %vm553_vm0, %v5116_v33  ;;  %601 = vst.msk [vmem:[#allocation3 + $0x78] sm:$0xff] %vm553_vm0, %v5116_v33 }
  0x5d   : > { %602 = vst.msk [vmem:[#allocation3 + $0x80] sm:$0xff] %vm553_vm0, %v5116_v33  ;;  %603 = vst.msk [vmem:[#allocation3 + $0x88] sm:$0xff] %vm553_vm0, %v5116_v33 }
  0x5e   : > { %604 = vst.msk [vmem:[#allocation3 + $0x90] sm:$0xff] %vm553_vm0, %v5116_v33  ;;  %605 = vst.msk [vmem:[#allocation3 + $0x98] sm:$0xff] %vm553_vm0, %v5116_v33 }
  0x5f   : > { %606 = vst.msk [vmem:[#allocation3 + $0xa0] sm:$0xff] %vm553_vm0, %v5116_v33  ;;  %607 = vst.msk [vmem:[#allocation3 + $0xa8] sm:$0xff] %vm553_vm0, %v5116_v33 }
  0x60   : > { %608 = vst.msk [vmem:[#allocation3 + $0xb0] sm:$0xff] %vm553_vm0, %v5116_v33  ;;  %609 = vst.msk [vmem:[#allocation3 + $0xb8] sm:$0xff] %vm553_vm0, %v5116_v33 }
  0x61   : > { %610 = vst.msk [vmem:[#allocation3 + $0xc0] sm:$0xff] %vm553_vm0, %v5116_v33  ;;  %611 = vst.msk [vmem:[#allocation3 + $0xc8] sm:$0xff] %vm553_vm0, %v5116_v33 }
  0x62   : > { %612 = vst.msk [vmem:[#allocation3 + $0xd0] sm:$0xff] %vm553_vm0, %v5116_v33  ;;  %613 = vst.msk [vmem:[#allocation3 + $0xd8] sm:$0xff] %vm553_vm0, %v5116_v33 }
  0x63   : > { %614 = vst.msk [vmem:[#allocation3 + $0xe0] sm:$0xff] %vm553_vm0, %v5116_v33  ;;  %615 = vst.msk [vmem:[#allocation3 + $0xe8] sm:$0xff] %vm553_vm0, %v5116_v33 }
  0x64   : > { %616 = vst.msk [vmem:[#allocation3 + $0xf0] sm:$0xff] %vm553_vm0, %v5116_v33  ;;  %617 = vst.msk [vmem:[#allocation3 + $0xf8] sm:$0xff] %vm553_vm0, %v5116_v33 }
  0x65   : > { %618 = vst [vmem:[#allocation4] sm:$0xff] %v5116_v33  ;;  %619 = vst [vmem:[#allocation4 + $0x8] sm:$0xff] %v5116_v33 }
  0x66   : > { %620 = vst [vmem:[#allocation4 + $0x10] sm:$0xff] %v5116_v33  ;;  %621 = vst [vmem:[#allocation4 + $0x18] sm:$0xff] %v5116_v33 }
  0x67   : > { %622 = vst [vmem:[#allocation4 + $0x20] sm:$0xff] %v5116_v33  ;;  %623 = vst [vmem:[#allocation4 + $0x28] sm:$0xff] %v5116_v33 }
  0x68   : > { %624 = vst [vmem:[#allocation4 + $0x30] sm:$0xff] %v5116_v33  ;;  %625 = vst [vmem:[#allocation4 + $0x38] sm:$0xff] %v5116_v33 }
  0x69   : > { %626 = vst [vmem:[#allocation4 + $0x40] sm:$0xff] %v5116_v33  ;;  %627 = vst [vmem:[#allocation4 + $0x48] sm:$0xff] %v5116_v33 }
  0x6a   : > { %628 = vst [vmem:[#allocation4 + $0x50] sm:$0xff] %v5116_v33  ;;  %629 = vst [vmem:[#allocation4 + $0x58] sm:$0xff] %v5116_v33 }
  0x6b   : > { %630 = vst [vmem:[#allocation4 + $0x60] sm:$0xff] %v5116_v33  ;;  %631 = vst [vmem:[#allocation4 + $0x68] sm:$0xff] %v5116_v33 }
  0x6c   : > { %632 = vst [vmem:[#allocation4 + $0x70] sm:$0xff] %v5116_v33  ;;  %633 = vst [vmem:[#allocation4 + $0x78] sm:$0xff] %v5116_v33 }
  0x6d   : > { %634 = vst [vmem:[#allocation4 + $0x80] sm:$0xff] %v5116_v33  ;;  %635 = vst [vmem:[#allocation4 + $0x88] sm:$0xff] %v5116_v33 }
  0x6e   : > { %636 = vst [vmem:[#allocation4 + $0x90] sm:$0xff] %v5116_v33  ;;  %637 = vst [vmem:[#allocation4 + $0x98] sm:$0xff] %v5116_v33 }
  0x6f   : > { %638 = vst [vmem:[#allocation4 + $0xa0] sm:$0xff] %v5116_v33  ;;  %639 = vst [vmem:[#allocation4 + $0xa8] sm:$0xff] %v5116_v33 }
  0x70   : > { %640 = vst [vmem:[#allocation4 + $0xb0] sm:$0xff] %v5116_v33  ;;  %641 = vst [vmem:[#allocation4 + $0xb8] sm:$0xff] %v5116_v33 }
  0x71   : > { %642 = vst [vmem:[#allocation4 + $0xc0] sm:$0xff] %v5116_v33  ;;  %643 = vst [vmem:[#allocation4 + $0xc8] sm:$0xff] %v5116_v33 }
  0x72   : > { %644 = vst [vmem:[#allocation4 + $0xd0] sm:$0xff] %v5116_v33  ;;  %645 = vst [vmem:[#allocation4 + $0xd8] sm:$0xff] %v5116_v33 }
  0x73   : > { %646 = vst [vmem:[#allocation4 + $0xe0] sm:$0xff] %v5116_v33  ;;  %647 = vst [vmem:[#allocation4 + $0xe8] sm:$0xff] %v5116_v33 }
  0x74   : > { %648 = vst [vmem:[#allocation4 + $0xf0] sm:$0xff] %v5116_v33  ;;  %649 = vst [vmem:[#allocation4 + $0xf8] sm:$0xff] %v5116_v33 }
  0x75 PF: > { %v652_v34 = vld [vmem:[%s5301_s25 + $0x10] sm:$0xff]  ;;  %v650_v35 = vld [vmem:[%s5301_s25] sm:$0xff]  ;;  %v5117_v36 = vmov 0   ;;  %v653_v37 = vld [vmem:[%s5301_s25 + $0x18] sm:$0xff]  ;;  %v844_v3 = vlaneseq  ;;  %vm2006_vm1 = vcmask 7168   ;;  %p4189_p0 = scmp.ne.s32.totalorder %s5097_s29, 1 }
  0x76   : > { %4576 = vset.pattern.permute.xlu1 %v5117_v36  ;;  %4575 = vset.pattern.permute.xlu0 %v5117_v36  ;;  %v651_v38 = vld [vmem:[%s5301_s25 + $0x8] sm:$0xff]  ;;  %v654_v40 = vld [vmem:[%s5301_s25 + $0x20] sm:$0xff]  ;;  %v657_v41 = vld [vmem:[%s5301_s25 + $0x38] sm:$0xff] }
  0x77   : > { %695 = vperm.xlu1 %4576, %v652_v34   ;;  %685 = vperm.xlu0 %4575, %v650_v35   ;;  %v655_v39 = vld [vmem:[%s5301_s25 + $0x28] sm:$0xff]  ;;  %v656_v42 = vld [vmem:[%s5301_s25 + $0x30] sm:$0xff]  ;;  %v658_v44 = vld [vmem:[%s5301_s25 + $0x40] sm:$0xff]  ;;  %v845_v4 = vshrl.u32 %v844_v3, 7 }
  0x78   : > { %v659_v43 = vld [vmem:[%s5301_s25 + $0x48] sm:$0xff]  ;;  %v661_v45 = vld [vmem:[%s5301_s25 + $0x58] sm:$0xff]  ;;  %v660_v46 = vld [vmem:[%s5301_s25 + $0x50] sm:$0xff] }
  0x79   : > { %v663_v47 = vld [vmem:[%s5301_s25 + $0x68] sm:$0xff]  ;;  %v662_v48 = vld [vmem:[%s5301_s25 + $0x60] sm:$0xff]  ;;  %v665_v49 = vld [vmem:[%s5301_s25 + $0x78] sm:$0xff]  ;;  %v846_v5 = vsub.s32 0, %v845_v4  ;;  %v850_v6 = vsub.s32 1, %v845_v4 }
  0x7a   : > { %v664_v50 = vld [vmem:[%s5301_s25 + $0x70] sm:$0xff]  ;;  %v667_v51 = vld [vmem:[%s5301_s25 + $0x88] sm:$0xff]  ;;  %v666_v52 = vld [vmem:[%s5301_s25 + $0x80] sm:$0xff] }
  0x7b   : > { %700 = vperm.xlu1 %4576, %v653_v37   ;;  %690 = vperm.xlu0 %4575, %v651_v38   ;;  %v669_v53 = vld [vmem:[%s5301_s25 + $0x98] sm:$0xff]  ;;  %v668_v54 = vld [vmem:[%s5301_s25 + $0x90] sm:$0xff]  ;;  %v671_v55 = vld [vmem:[%s5301_s25 + $0xa8] sm:$0xff] }
  0x7c   : > { %v670_v56 = vld [vmem:[%s5301_s25 + $0xa0] sm:$0xff]  ;;  %v673_v57 = vld [vmem:[%s5301_s25 + $0xb8] sm:$0xff]  ;;  %v672_v58 = vld [vmem:[%s5301_s25 + $0xb0] sm:$0xff] }
  0x7d   : > { %v675_v59 = vld [vmem:[%s5301_s25 + $0xc8] sm:$0xff]  ;;  %v674_v60 = vld [vmem:[%s5301_s25 + $0xc0] sm:$0xff]  ;;  %v677_v61 = vld [vmem:[%s5301_s25 + $0xd8] sm:$0xff] }
  0x7e   : > { %v676_v62 = vld [vmem:[%s5301_s25 + $0xd0] sm:$0xff]  ;;  %v679_v63 = vld [vmem:[%s5301_s25 + $0xe8] sm:$0xff]  ;;  %v678_v0 = vld [vmem:[%s5301_s25 + $0xe0] sm:$0xff] }
  0x7f   : > { %710 = vperm.xlu1 %4576, %v655_v39   ;;  %705 = vperm.xlu0 %4575, %v654_v40   ;;  %v681_v1 = vld [vmem:[%s5301_s25 + $0xf8] sm:$0xff]  ;;  %v680_v2 = vld [vmem:[%s5301_s25 + $0xf0] sm:$0xff]  ;;  %v682_v7 = vld [vmem:[%s532_s16] sm:$0x3] }
  0x80   : > { %v5487_v8 = vrot.slane %v682_v7, %v846_v5  ;;  %v5489_v9 = vrot.slane %v682_v7, %v850_v6  ;;  %v1046_v15 = vld [vmem:[%s5319_s24] sm:$0xff]  ;;  %v1047_v23 = vld [vmem:[%s5319_s24 + $0x8] sm:$0xff]  ;;  %v1048_v30 = vld [vmem:[%s5319_s24 + $0x10] sm:$0xff] }
  0x81   : > { %v1078_v21 = vunpack.c.l.bf16 %v1046_v15  ;;  %v1079_v22 = vunpack.c.h.bf16 %v1046_v15  ;;  %v1080_v32 = vunpack.c.l.bf16 %v1047_v23  ;;  %v1081_v38 = vunpack.c.h.bf16 %v1047_v23  ;;  %v5511_v39 = vld [vmem:[%s5319_s24 + $0x18] sm:$0xff]  ;;  %v5558_v4 = vld [vmem:[%s5319_s24 + $0x80] sm:$0xff]  ;;  %v5565_v7 = vld [vmem:[%s5319_s24 + $0x88] sm:$0xff] }
  0x82   : > { %v5562_v6 = vld [vmem:[%s5319_s24 + $0x58] sm:$0xff]  ;;  %v5648_v5 = vld [vmem:[%s5319_s24 + $0x68] sm:$0xff] }
  0x83   : > { %720 = vperm.xlu1 %4576, %v657_v41   ;;  %715 = vperm.xlu0 %4575, %v656_v42   ;;  %v1082_v41 = vunpack.c.l.bf16 %v1048_v30  ;;  %v1083_v42 = vunpack.c.h.bf16 %v1048_v30  ;;  %7803 = vst [vmem:[#allocation14_spill] sm:$0xff] %v5562_v6  ;;  %7807 = vst [vmem:[#allocation18_spill] sm:$0xff] %v5648_v5  ;;  %v5682_v30 = vld [vmem:[%s5319_s24 + $0xe0] sm:$0xff] }
  0x84   : > { %7810 = vst [vmem:[#allocation21_spill] sm:$0xff] %v5682_v30 }
  0x87   : > { %730 = vperm.xlu1 %4576, %v659_v43   ;;  %725 = vperm.xlu0 %4575, %v658_v44   ;;  %v5514_v43 = vld [vmem:[%s5319_s24 + $0x20] sm:$0xff] }
  0x88   : > { %v7820_v5 = vunpack.c.h.bf16 %v5514_v43 }
  0x8b   : > { %740 = vperm.xlu1 %4576, %v661_v45   ;;  %735 = vperm.xlu0 %4575, %v660_v46  }
  0x8f   : > { %750 = vperm.xlu1 %4576, %v663_v47   ;;  %745 = vperm.xlu0 %4575, %v662_v48   ;;  %v5519_v48 = vld [vmem:[%s5319_s24 + $0x28] sm:$0xff] }
  0x93   : > { %760 = vperm.xlu1 %4576, %v665_v49   ;;  %755 = vperm.xlu0 %4575, %v664_v50   ;;  %v5522_v49 = vld [vmem:[%s5319_s24 + $0x30] sm:$0xff] }
  0x97   : > { %770 = vperm.xlu1 %4576, %v667_v51   ;;  %765 = vperm.xlu0 %4575, %v666_v52  }
  0x9b   : > { %780 = vperm.xlu1 %4576, %v669_v53   ;;  %775 = vperm.xlu0 %4575, %v668_v54  }
  0x9f   : > { %790 = vperm.xlu1 %4576, %v671_v55   ;;  %785 = vperm.xlu0 %4575, %v670_v56  }
  0xa3   : > { %800 = vperm.xlu1 %4576, %v673_v57   ;;  %795 = vperm.xlu0 %4575, %v672_v58   ;;  %v5536_v57 = vld [vmem:[%s5319_s24 + $0x38] sm:$0xff]  ;;  %v5539_v58 = vld [vmem:[%s5319_s24 + $0x40] sm:$0xff] }
  0xa7   : > { %810 = vperm.xlu1 %4576, %v675_v59   ;;  %805 = vperm.xlu0 %4575, %v674_v60  }
  0xab   : > { %820 = vperm.xlu1 %4576, %v677_v61   ;;  %815 = vperm.xlu0 %4575, %v676_v62  }
  0xaf   : > { %830 = vperm.xlu1 %4576, %v679_v63   ;;  %825 = vperm.xlu0 %4575, %v678_v0   ;;  %v5546_v63 = vld [vmem:[%s5319_s24 + $0x48] sm:$0xff]  ;;  %v5549_v0 = vld [vmem:[%s5319_s24 + $0x50] sm:$0xff] }
  0xb0   : > { %7800 = vst [vmem:[#allocation11_spill] sm:$0xff] %v5549_v0 }
  0xb3   : > { %840 = vperm.xlu1 %4576, %v681_v1   ;;  %835 = vperm.xlu0 %4575, %v680_v2  }
  0xf6   : > { %v696_v10 = vpop.permute.xlu1 %695  ;;  %v686_v11 = vpop.permute.xlu0 %685 }
  0xf7   : > { %v858_v12 = vadd.f32 %v5487_v8, %v696_v10  ;;  %v854_v13 = vadd.f32 %v5487_v8, %v686_v11  ;;  %v855_v14 = vadd.f32 %v5489_v9, %v686_v11  ;;  %v859_v16 = vadd.f32 %v5489_v9, %v696_v10  ;;  %v5645_v10 = vld [vmem:[%s5319_s24 + $0xd0] sm:$0xff] }
  0xf8   : > { %7806 = vst [vmem:[#allocation17_spill] sm:$0xff] %v5645_v10 }
  0xf9   : > { %v918_v17 = vmul.f32 0.2, %v854_v13  ;;  %v919_v18 = vmul.f32 0.2, %v855_v14  ;;  %v922_v24 = vmul.f32 0.2, %v858_v12 }
  0xfa   : > { %v5496_v19 = vpop.permute.xlu1 %700  ;;  %v691_v20 = vpop.permute.xlu0 %690  ;;  %v923_v27 = vmul.f32 0.2, %v859_v16 }
  0xfb   : > { %v856_v25 = vadd.f32 %v5487_v8, %v691_v20  ;;  %v857_v26 = vadd.f32 %v5489_v9, %v691_v20  ;;  %v982_v28 = vmax.f32 %v854_v13, %v918_v17  ;;  %v983_v29 = vmax.f32 %v855_v14, %v919_v18  ;;  %v5572_v14 = vld [vmem:[%s5319_s24 + $0x60] sm:$0xff]  ;;  %v5579_v17 = vld [vmem:[%s5319_s24 + $0x90] sm:$0xff] }
  0xfc   : > { %v986_v40 = vmax.f32 %v858_v12, %v922_v24  ;;  %v987_v47 = vmax.f32 %v859_v16, %v923_v27  ;;  %7804 = vst [vmem:[#allocation15_spill] sm:$0xff] %v5572_v14  ;;  %v5655_v20 = vld [vmem:[%s5319_s24 + $0x70] sm:$0xff] }
  0xfd   : > { %v920_v31 = vmul.f32 0.2, %v856_v25  ;;  %v921_v33 = vmul.f32 0.2, %v857_v26  ;;  %v5506_v36 = vadd.f32 %v1078_v21, %v982_v28  ;;  %v5508_v37 = vadd.f32 %v1079_v22, %v983_v29  ;;  %7808 = vst [vmem:[#allocation19_spill] sm:$0xff] %v5655_v20  ;;  %v5700_v29 = vld [vmem:[%s5319_s24 + $0xe8] sm:$0xff] }
  0xfe   : > { %v5502_v34 = vpop.permute.xlu1 %710  ;;  %v5504_v35 = vpop.permute.xlu0 %705  ;;  %v5553_v2 = vadd.f32 %v1082_v41, %v986_v40  ;;  %v5555_v3 = vadd.f32 %v1083_v42, %v987_v47  ;;  %v5610_v42 = vld [vmem:[%s5319_s24 + $0xb0] sm:$0xff]  ;;  %v5679_v40 = vld [vmem:[%s5319_s24 + $0xd8] sm:$0xff]  ;;  %7811 = vst [vmem:[#allocation22_spill] sm:$0xff] %v5700_v29 }
  0xff   : > { %7796 = vst [vmem:[#allocation7_spill] sm:$0xff] %v5506_v36  ;;  %7797 = vst [vmem:[#allocation8_spill] sm:$0xff] %v5508_v37  ;;  %v1206_v44 = vmax.f32 %v5506_v36, %v5508_v37  ;;  %v984_v45 = vmax.f32 %v856_v25, %v920_v31  ;;  %v985_v46 = vmax.f32 %v857_v26, %v921_v33  ;;  %v5588_v25 = vld [vmem:[%s5319_s24 + $0x98] sm:$0xff]  ;;  %v5597_v31 = vld [vmem:[%s5319_s24 + $0xa0] sm:$0xff] }
 0x100   : > { %7801 = vst [vmem:[#allocation12_spill] sm:$0xff] %v5553_v2  ;;  %7802 = vst [vmem:[#allocation13_spill] sm:$0xff] %v5555_v3  ;;  %v1212_v28 = vmax.f32 %v5553_v2, %v5555_v3  ;;  %v5622_v47 = vadd.f32 %v5487_v8, %v5504_v35  ;;  %v863_v11 = vadd.f32 %v5489_v9, %v5504_v35  ;;  %v7816_v3 = vunpack.c.h.bf16 %v5511_v39 }
 0x101   : > { %1207 = vmax.xlane.f32.xlu0 %v1206_v44  ;;  %v5529_v53 = vadd.f32 %v1080_v32, %v984_v45  ;;  %v5531_v54 = vadd.f32 %v1081_v38, %v985_v46  ;;  %v5600_v32 = vld [vmem:[%s5319_s24 + $0xa8] sm:$0xff]  ;;  %v5605_v38 = vadd.f32 %v5487_v8, %v5496_v19  ;;  %v5613_v44 = vld [vmem:[%s5319_s24 + $0xb8] sm:$0xff]  ;;  %v5618_v46 = vadd.f32 %v5489_v9, %v5496_v19  ;;  %v5631_v45 = vld [vmem:[%s5319_s24 + $0xc0] sm:$0xff] }
 0x102   : > { %v5525_v51 = vpop.permute.xlu1 %720  ;;  %v5527_v52 = vpop.permute.xlu0 %715  ;;  %v5634_v19 = vld [vmem:[%s5319_s24 + $0xc8] sm:$0xff]  ;;  %v926_v13 = vmul.f32 0.2, %v5622_v47  ;;  %v5672_v35 = vadd.f32 %v5487_v8, %v5502_v34  ;;  %v5676_v41 = vadd.f32 %v5489_v9, %v5502_v34  ;;  %7809 = vst [vmem:[#allocation20_spill] sm:$0xff] %v5679_v40  ;;  %v927_v24 = vmul.f32 0.2, %v863_v11 }
 0x103   : > { %7798 = vst [vmem:[#allocation9_spill] sm:$0xff] %v5529_v53  ;;  %7799 = vst [vmem:[#allocation10_spill] sm:$0xff] %v5531_v54  ;;  %v1209_v1 = vmax.f32 %v5529_v53, %v5531_v54  ;;  %v924_v62 = vmul.f32 0.2, %v5605_v38  ;;  %v925_v12 = vmul.f32 0.2, %v5618_v46  ;;  %v5688_v27 = vadd.f32 %v5487_v8, %v5525_v51 }
 0x104   : > { %7805 = vst [vmem:[#allocation16_spill] sm:$0xff] %v5634_v19  ;;  %v5692_v61 = vadd.f32 %v5489_v9, %v5525_v51  ;;  %v5696_v34 = vadd.f32 %v5487_v8, %v5527_v52  ;;  %v5704_v18 = vadd.f32 %v5489_v9, %v5527_v52  ;;  %v990_v60 = vmax.f32 %v5622_v47, %v926_v13 }
 0x105   : > { %1210 = vmax.xlane.f32.xlu1 %v1209_v1  ;;  %v988_v21 = vmax.f32 %v5605_v38, %v924_v62  ;;  %v989_v51 = vmax.f32 %v5618_v46, %v925_v12  ;;  %v928_v55 = vmul.f32 0.2, %v5672_v35  ;;  %v5718_v52 = vmul.f32 0.2, %v5676_v41 }
 0x106   : > { %v5574_v15 = vpop.permute.xlu1 %730  ;;  %v5576_v16 = vpop.permute.xlu0 %725  ;;  %v5723_v12 = vmul.f32 0.2, %v5688_v27  ;;  %v5726_v13 = vmul.f32 0.2, %v5692_v61  ;;  %v5729_v46 = vmul.f32 0.2, %v5696_v34  ;;  %v7814_v47 = vunpack.c.l.bf16 %v5511_v39 }
 0x107   : > { %v5736_v62 = vmul.f32 0.2, %v5704_v18  ;;  %v5740_v59 = vadd.f32 %v7816_v3, %v989_v51  ;;  %v991_v2 = vmax.f32 %v863_v11, %v927_v24  ;;  %v7818_v54 = vunpack.c.l.bf16 %v5514_v43 }
 0x108   : > { %v5733_v38 = vadd.f32 %v7814_v47, %v988_v21  ;;  %v5752_v29 = vadd.f32 %v5487_v8, %v5574_v15  ;;  %v5756_v39 = vadd.f32 %v5489_v9, %v5574_v15 }
 0x109   : > { %1213 = vmax.xlane.f32.xlu1 %v1212_v28  ;;  %7817 = vst [vmem:[#allocation26_spill] sm:$0xff] %v5740_v59  ;;  %v5744_v53 = vadd.f32 %v7818_v54, %v990_v60  ;;  %v5760_v54 = vadd.f32 %v5487_v8, %v5576_v16  ;;  %v992_v60 = vmax.f32 %v5672_v35, %v928_v55 }
 0x10a   : > { %v5624_v1 = vpop.permute.xlu1 %740  ;;  %v5626_v33 = vpop.permute.xlu0 %735  ;;  %7815 = vst [vmem:[#allocation25_spill] sm:$0xff] %v5733_v38  ;;  %v5771_v30 = vadd.f32 %v7820_v5, %v991_v2  ;;  %v993_v55 = vmax.f32 %v5676_v41, %v5718_v52  ;;  %v5780_v15 = vmul.f32 0.2, %v5752_v29  ;;  %v5783_v43 = vmul.f32 0.2, %v5756_v39 }
 0x10b   : > { %7819 = vst [vmem:[#allocation27_spill] sm:$0xff] %v5744_v53  ;;  %v7822_v5 = vunpack.c.l.bf16 %v5519_v48 }
 0x10c   : > { %7821 = vst [vmem:[#allocation28_spill] sm:$0xff] %v5771_v30 }
 0x10d   : > { %v5787_v41 = vadd.f32 %v7822_v5, %v992_v60  ;;  %v7827_v60 = vunpack.c.l.bf16 %v5565_v7 }
 0x10e   : > { %v5661_v22 = vpop.permute.xlu1 %750  ;;  %v5663_v26 = vpop.permute.xlu0 %745 }
 0x10f   : > { %7823 = vst [vmem:[#allocation29_spill] sm:$0xff] %v5787_v41 }
 0x112   : > { %v5706_v28 = vpop.permute.xlu1 %760  ;;  %v5708_v23 = vpop.permute.xlu0 %755 }
 0x113   : > { %7812 = vst [vmem:[#allocation23_spill] sm:$0xff] %v5706_v28  ;;  %7813 = vst [vmem:[#allocation24_spill] sm:$0xff] %v5708_v23 }
 0x116   : > { %v771_v56 = vpop.permute.xlu1 %770  ;;  %v766_v50 = vpop.permute.xlu0 %765 }
 0x117   : > { %v888_v37 = vadd.f32 %v5487_v8, %v771_v56  ;;  %v889_v36 = vadd.f32 %v5489_v9, %v771_v56  ;;  %v886_v21 = vadd.f32 %v5487_v8, %v766_v50  ;;  %v887_v47 = vadd.f32 %v5489_v9, %v766_v50 }
 0x118   : > { %v5765_v56 = vadd.f32 %v5489_v9, %v5576_v16 }
 0x119   : > { %v952_v3 = vmul.f32 0.2, %v888_v37  ;;  %v953_v50 = vmul.f32 0.2, %v889_v36  ;;  %v950_v11 = vmul.f32 0.2, %v886_v21 }
 0x11a   : > { %v951_v24 = vmul.f32 0.2, %v887_v47  ;;  %v781_v51 = vpop.permute.xlu1 %780  ;;  %v776_v20 = vpop.permute.xlu0 %775 }
 0x11b   : > { %v892_v35 = vadd.f32 %v5487_v8, %v781_v51  ;;  %v893_v16 = vadd.f32 %v5489_v9, %v781_v51  ;;  %v890_v40 = vadd.f32 %v5487_v8, %v776_v20  ;;  %v891_v28 = vadd.f32 %v5489_v9, %v776_v20 }
 0x11c   : > { %v1014_v14 = vmax.f32 %v886_v21, %v950_v11  ;;  %v1015_v6 = vmax.f32 %v887_v47, %v951_v24  ;;  %v1016_v10 = vmax.f32 %v888_v37, %v952_v3  ;;  %v1017_v19 = vmax.f32 %v889_v36, %v953_v50 }
 0x11d   : > { %v954_v2 = vmul.f32 0.2, %v890_v40  ;;  %v956_v52 = vmul.f32 0.2, %v892_v35  ;;  %v955_v51 = vmul.f32 0.2, %v891_v28  ;;  %v7824_v20 = vunpack.c.l.bf16 %v5558_v4 }
 0x11e   : > { %v786_v23 = vpop.permute.xlu0 %785  ;;  %v7825_v36 = vunpack.c.h.bf16 %v5558_v4  ;;  %v957_v47 = vmul.f32 0.2, %v893_v16  ;;  %v791_v3 = vpop.permute.xlu1 %790  ;;  %v5801_v24 = vadd.f32 %v7827_v60, %v1016_v10  ;;  %v994_v10 = vmax.f32 %v5696_v34, %v5729_v46 }
 0x11f   : > { %v5791_v21 = vadd.f32 %v7824_v20, %v1014_v14  ;;  %v894_v50 = vadd.f32 %v5487_v8, %v786_v23  ;;  %v895_v11 = vadd.f32 %v5489_v9, %v786_v23  ;;  %v7828_v14 = vunpack.c.h.bf16 %v5565_v7 }
 0x120   : > { %v5795_v37 = vadd.f32 %v7825_v36, %v1015_v6  ;;  %v1018_v4 = vmax.f32 %v890_v40, %v954_v2  ;;  %v1019_v6 = vmax.f32 %v891_v28, %v955_v51  ;;  %v5810_v36 = vmul.f32 0.2, %v5760_v54 }
 0x121   : > { %v5807_v20 = vadd.f32 %v7828_v14, %v1017_v19  ;;  %v958_v0 = vmul.f32 0.2, %v894_v50  ;;  %v1218_v23 = vmax.f32 %v5744_v53, %v5771_v30  ;;  %v5817_v60 = vadd.f32 %v5487_v8, %v791_v3 }
 0x122   : > { %7826 = vst [vmem:[#allocation30_spill] sm:$0xff] %v5795_v37  ;;  %v1254_v5 = vmax.f32 %v5791_v21, %v5795_v37  ;;  %v959_v37 = vmul.f32 0.2, %v895_v11  ;;  %v796_v7 = vpop.permute.xlu0 %795  ;;  %v7830_v19 = vunpack.c.l.bf16 %v5579_v17  ;;  %v7832_v28 = vunpack.c.h.bf16 %v5579_v17 }
 0x123   : > { %7829 = vst [vmem:[#allocation31_spill] sm:$0xff] %v5807_v20  ;;  %v897_v51 = vadd.f32 %v5489_v9, %v791_v3  ;;  %v5829_v14 = vadd.f32 %v5487_v8, %v796_v7  ;;  %v1257_v34 = vmax.f32 %v5801_v24, %v5807_v20  ;;  %v1020_v46 = vmax.f32 %v892_v35, %v956_v52 }
 0x124   : > { %1255 = vmax.xlane.f32.xlu0 %v1254_v5  ;;  %v5821_v40 = vadd.f32 %v7830_v19, %v1018_v4  ;;  %v5825_v2 = vadd.f32 %v7832_v28, %v1019_v6  ;;  %v899_v5 = vadd.f32 %v5489_v9, %v796_v7  ;;  %v1021_v4 = vmax.f32 %v893_v16, %v957_v47 }
 0x125   : > { %v1022_v19 = vmax.f32 %v894_v50, %v958_v0  ;;  %v5838_v17 = vadd.f32 %v5487_v8, %v5624_v1  ;;  %v1023_v6 = vmax.f32 %v895_v11, %v959_v37  ;;  %v7834_v3 = vunpack.c.h.bf16 %v5519_v48 }
 0x126   : > { %7831 = vst [vmem:[#allocation32_spill] sm:$0xff] %v5821_v40  ;;  %7833 = vst [vmem:[#allocation33_spill] sm:$0xff] %v5825_v2  ;;  %v1260_v30 = vmax.f32 %v5821_v40, %v5825_v2  ;;  %v995_v53 = vmax.f32 %v5704_v18, %v5736_v62  ;;  %v5847_v35 = vmul.f32 0.2, %v5765_v56  ;;  %v5851_v52 = vadd.f32 %v5489_v9, %v5624_v1  ;;  %v801_v62 = vpop.permute.xlu1 %800  ;;  %v806_v50 = vpop.permute.xlu0 %805 }
 0x127   : > { %v5842_v28 = vadd.f32 %v7834_v3, %v993_v55  ;;  %v5855_v0 = vadd.f32 %v5487_v8, %v5626_v33  ;;  %v5859_v16 = vadd.f32 %v5489_v9, %v5626_v33  ;;  %v960_v48 = vmul.f32 0.2, %v5817_v60 }
 0x128   : > { %1258 = vmax.xlane.f32.xlu0 %v1257_v34  ;;  %1261 = vmax.xlane.f32.xlu1 %v1260_v30  ;;  %v961_v18 = vmul.f32 0.2, %v897_v51  ;;  %v962_v55 = vmul.f32 0.2, %v5829_v14  ;;  %v7836_v37 = vunpack.c.l.bf16 %v5588_v25  ;;  %v963_v47 = vmul.f32 0.2, %v899_v5 }
 0x129   : > { %7835 = vst [vmem:[#allocation34_spill] sm:$0xff] %v5842_v28  ;;  %v7838_v11 = vunpack.c.h.bf16 %v5588_v25  ;;  %v7840_v33 = vunpack.c.l.bf16 %v5597_v31  ;;  %v7842_v30 = vunpack.c.h.bf16 %v5597_v31  ;;  %v1221_v2 = vmax.f32 %v5787_v41, %v5842_v28 }
 0x12a   : > { %v5865_v1 = vadd.f32 %v7836_v37, %v1020_v46  ;;  %v7844_v46 = vunpack.c.l.bf16 %v5522_v49  ;;  %v7846_v40 = vunpack.c.h.bf16 %v5522_v49  ;;  %v5895_v31 = vmul.f32 0.2, %v5851_v52 }
 0x12b   : > { %v5869_v7 = vadd.f32 %v7838_v11, %v1021_v4  ;;  %v5873_v34 = vadd.f32 %v7840_v33, %v1022_v19  ;;  %v5877_v3 = vadd.f32 %v7842_v30, %v1023_v6  ;;  %v996_v4 = vmax.f32 %v5688_v27, %v5723_v12 }
 0x12c   : > { %7837 = vst [vmem:[#allocation35_spill] sm:$0xff] %v5865_v1  ;;  %v5883_v37 = vadd.f32 %v7844_v46, %v994_v10  ;;  %v5887_v25 = vadd.f32 %v7846_v40, %v995_v53  ;;  %v5892_v19 = vmul.f32 0.2, %v5838_v17  ;;  %v5898_v6 = vadd.f32 %v5487_v8, %v801_v62  ;;  %1219 = vmax.xlane.f32.xlu1 %v1218_v23 }
 0x12d   : > { %7839 = vst [vmem:[#allocation36_spill] sm:$0xff] %v5869_v7  ;;  %7841 = vst [vmem:[#allocation37_spill] sm:$0xff] %v5873_v34  ;;  %v5901_v11 = vadd.f32 %v5489_v9, %v801_v62  ;;  %v7848_v49 = vmax.f32 %v5733_v38, %v5740_v59  ;;  %v5907_v53 = vadd.f32 %v5487_v8, %v806_v50  ;;  %v6492_v59 = vld [vmem:[#allocation2 + $0xe8] sm:$0xff] }
 0x12e   : > { %7843 = vst [vmem:[#allocation38_spill] sm:$0xff] %v5877_v3  ;;  %7845 = vst [vmem:[#allocation39_spill] sm:$0xff] %v5883_v37  ;;  %v5910_v27 = vadd.f32 %v5489_v9, %v806_v50  ;;  %v1024_v12 = vmax.f32 %v5817_v60, %v960_v48  ;;  %v1025_v10 = vmax.f32 %v897_v51, %v961_v18  ;;  %v7849_v50 = vunpack.c.l.bf16 %v5536_v57 }
 0x12f   : > { %7847 = vst [vmem:[#allocation40_spill] sm:$0xff] %v5887_v25  ;;  %1216 = vmax.xlane.f32.xlu0 %v7848_v49  ;;  %v1263_v40 = vmax.f32 %v5865_v1, %v5869_v7  ;;  %v1266_v62 = vmax.f32 %v5873_v34, %v5877_v3  ;;  %v1026_v33 = vmax.f32 %v5829_v14, %v962_v55  ;;  %v938_v51 = vmul.f32 0.2, %v5855_v0  ;;  %v6474_v7 = vld [vmem:[#allocation2 + $0x70] sm:$0xff]  ;;  %v6476_v1 = vld [vmem:[#allocation2 + $0x68] sm:$0xff] }
 0x130   : > { %v1027_v30 = vmax.f32 %v899_v5, %v963_v47  ;;  %v1224_v23 = vmax.f32 %v5883_v37, %v5887_v25  ;;  %v997_v46 = vmax.f32 %v5692_v61, %v5726_v13  ;;  %v5924_v49 = vadd.f32 %v7849_v50, %v996_v4  ;;  %v6453_v25 = vld [vmem:[#allocation2 + $0xe0] sm:$0xff]  ;;  %v6455_v37 = vld [vmem:[#allocation2 + $0xd8] sm:$0xff] }
 0x131   : > { %v998_v60 = vmax.f32 %v5760_v54, %v5810_v36  ;;  %v5931_v48 = vadd.f32 %v5487_v8, %v5661_v22  ;;  %v5935_v14 = vadd.f32 %v5489_v9, %v5661_v22  ;;  %1267 = vmax.xlane.f32.xlu1 %v1266_v62  ;;  %v999_v61 = vmax.f32 %v5765_v56, %v5847_v35  ;;  %v811_v54 = vpop.permute.xlu1 %810 }
 0x132   : > { %7850 = vst [vmem:[#allocation41_spill] sm:$0xff] %v5924_v49  ;;  %v964_v13 = vmul.f32 0.2, %v5898_v6  ;;  %v965_v5 = vmul.f32 0.2, %v5901_v11  ;;  %v7851_v36 = vunpack.c.l.bf16 %v5600_v32  ;;  %v7853_v55 = vunpack.c.h.bf16 %v5600_v32 }
 0x133   : > { %1264 = vmax.xlane.f32.xlu0 %v1263_v40  ;;  %v966_v22 = vmul.f32 0.2, %v5907_v53  ;;  %v967_v4 = vmul.f32 0.2, %v5910_v27  ;;  %v816_v40 = vpop.permute.xlu0 %815  ;;  %v7855_v56 = vunpack.c.l.bf16 %v5610_v42  ;;  %v7857_v62 = vunpack.c.h.bf16 %v5610_v42 }
 0x134   : > { %v5943_v18 = vadd.f32 %v7851_v36, %v1024_v12  ;;  %v5947_v47 = vadd.f32 %v7853_v55, %v1025_v10  ;;  %v5961_v12 = vadd.f32 %v5487_v8, %v5663_v26  ;;  %v5965_v32 = vadd.f32 %v5489_v9, %v5663_v26 }
 0x135   : > { %v5953_v35 = vadd.f32 %v7855_v56, %v1026_v33  ;;  %v5957_v50 = vadd.f32 %v7857_v62, %v1027_v30  ;;  %v7859_v10 = vunpack.c.h.bf16 %v5536_v57  ;;  %v7861_v55 = vunpack.c.l.bf16 %v5539_v58  ;;  %1225 = vmax.xlane.f32.xlu1 %v1224_v23 }
 0x136   : > { %7852 = vst [vmem:[#allocation42_spill] sm:$0xff] %v5943_v18  ;;  %7854 = vst [vmem:[#allocation43_spill] sm:$0xff] %v5947_v47  ;;  %v939_v42 = vmul.f32 0.2, %v5859_v16  ;;  %v5977_v30 = vadd.f32 %v5487_v8, %v811_v54  ;;  %v5980_v56 = vadd.f32 %v5489_v9, %v811_v54  ;;  %v7863_v26 = vunpack.c.h.bf16 %v5539_v58 }
 0x137   : > { %7856 = vst [vmem:[#allocation44_spill] sm:$0xff] %v5953_v35  ;;  %7858 = vst [vmem:[#allocation45_spill] sm:$0xff] %v5957_v50  ;;  %v5969_v36 = vadd.f32 %v7859_v10, %v997_v46  ;;  %v5973_v33 = vadd.f32 %v7861_v55, %v998_v60  ;;  %1222 = vmax.xlane.f32.xlu0 %v1221_v2  ;;  %v5987_v57 = vadd.f32 %v5487_v8, %v816_v40 }
 0x138   : > { %v5984_v62 = vadd.f32 %v7863_v26, %v999_v61  ;;  %v5990_v46 = vadd.f32 %v5489_v9, %v816_v40  ;;  %v1269_v60 = vmax.f32 %v5943_v18, %v5947_v47  ;;  %v1028_v10 = vmax.f32 %v5898_v6, %v964_v13 }
 0x139   : > { %7860 = vst [vmem:[#allocation46_spill] sm:$0xff] %v5969_v36  ;;  %7862 = vst [vmem:[#allocation47_spill] sm:$0xff] %v5973_v33  ;;  %v1272_v54 = vmax.f32 %v5953_v35, %v5957_v50  ;;  %v1029_v2 = vmax.f32 %v5901_v11, %v965_v5  ;;  %v1030_v58 = vmax.f32 %v5907_v53, %v966_v22  ;;  %v6001_v61 = vmul.f32 0.2, %v5931_v48  ;;  %v6437_v50 = vld [vmem:[#allocation2 + $0x58] sm:$0xff] }
 0x13a   : > { %7864 = vst [vmem:[#allocation48_spill] sm:$0xff] %v5984_v62  ;;  %v1031_v23 = vmax.f32 %v5910_v27, %v967_v4  ;;  %v1000_v40 = vmax.f32 %v5752_v29, %v5780_v15  ;;  %v1001_v55 = vmax.f32 %v5756_v39, %v5783_v43  ;;  %v1002_v6 = vmax.f32 %v5855_v0, %v938_v51  ;;  %v821_v29 = vpop.permute.xlu1 %820  ;;  %v826_v0 = vpop.permute.xlu0 %825 }
 0x13b   : > { %v6009_v13 = vmul.f32 0.2, %v5935_v14  ;;  %v968_v11 = vmul.f32 0.2, %v5977_v30  ;;  %1270 = vmax.xlane.f32.xlu0 %v1269_v60  ;;  %1273 = vmax.xlane.f32.xlu1 %v1272_v54  ;;  %v1227_v53 = vmax.f32 %v5924_v49, %v5969_v36  ;;  %v1003_v27 = vmax.f32 %v5859_v16, %v939_v42  ;;  %v6435_v49 = vld [vmem:[#allocation2 + $0x60] sm:$0xff] }
 0x13c   : > { %v969_v5 = vmul.f32 0.2, %v5980_v56  ;;  %v970_v15 = vmul.f32 0.2, %v5987_v57  ;;  %v971_v39 = vmul.f32 0.2, %v5990_v46  ;;  %v1230_v43 = vmax.f32 %v5973_v33, %v5984_v62 }
 0x13d   : > { %v7865_v51 = vunpack.c.l.bf16 %v5613_v44  ;;  %v7867_v4 = vunpack.c.h.bf16 %v5613_v44  ;;  %v7869_v16 = vunpack.c.l.bf16 %v5631_v45  ;;  %v7871_v60 = vunpack.c.h.bf16 %v5631_v45  ;;  %v7877_v44 = vld [vmem:[#allocation11_spill] sm:$0xff] }
 0x13e   : > { %v942_v36 = vmul.f32 0.2, %v5961_v12  ;;  %v7873_v62 = vunpack.c.l.bf16 %v5546_v63  ;;  %v6051_v45 = vadd.f32 %v5487_v8, %v821_v29 }
 0x13f   : > { %v6022_v22 = vadd.f32 %v7865_v51, %v1028_v10  ;;  %v6026_v26 = vadd.f32 %v7867_v4, %v1029_v2  ;;  %v6030_v42 = vadd.f32 %v7869_v16, %v1030_v58  ;;  %v6034_v54 = vadd.f32 %v7871_v60, %v1031_v23  ;;  %1228 = vmax.xlane.f32.xlu0 %v1227_v53  ;;  %v7882_v60 = vld [vmem:[#allocation24_spill] sm:$0xff] }
 0x140   : > { %v6039_v33 = vadd.f32 %v7873_v62, %v1000_v40  ;;  %v7875_v10 = vunpack.c.h.bf16 %v5546_v63  ;;  %v7878_v2 = vunpack.c.l.bf16 %v7877_v44  ;;  %v943_v58 = vmul.f32 0.2, %v5965_v32  ;;  %1231 = vmax.xlane.f32.xlu1 %v1230_v43 }
 0x141   : > { %7866 = vst [vmem:[#allocation49_spill] sm:$0xff] %v6022_v22  ;;  %7868 = vst [vmem:[#allocation50_spill] sm:$0xff] %v6026_v26  ;;  %v6054_v23 = vadd.f32 %v5489_v9, %v821_v29  ;;  %v7880_v62 = vunpack.c.h.bf16 %v7877_v44  ;;  %v6061_v63 = vadd.f32 %v5487_v8, %v826_v0  ;;  %v1033_v16 = vmax.f32 %v5980_v56, %v969_v5 }
 0x142   : > { %7870 = vst [vmem:[#allocation51_spill] sm:$0xff] %v6030_v42  ;;  %7872 = vst [vmem:[#allocation52_spill] sm:$0xff] %v6034_v54  ;;  %v6043_v51 = vadd.f32 %v7875_v10, %v1001_v55  ;;  %v6047_v4 = vadd.f32 %v7878_v2, %v1002_v6  ;;  %v6064_v55 = vadd.f32 %v5489_v9, %v826_v0 }
 0x143   : > { %7874 = vst [vmem:[#allocation53_spill] sm:$0xff] %v6039_v33  ;;  %v6058_v40 = vadd.f32 %v7880_v62, %v1003_v27  ;;  %v1032_v6 = vmax.f32 %v5977_v30, %v968_v11  ;;  %v1275_v29 = vmax.f32 %v6022_v22, %v6026_v26  ;;  %v1278_v53 = vmax.f32 %v6030_v42, %v6034_v54  ;;  %v6419_v42 = vld [vmem:[#allocation2 + $0xd0] sm:$0xff]  ;;  %v6421_v26 = vld [vmem:[#allocation2 + $0xc8] sm:$0xff] }
 0x144   : > { %7876 = vst [vmem:[#allocation54_spill] sm:$0xff] %v6043_v51  ;;  %7879 = vst [vmem:[#allocation11_spill] sm:$0xff] %v6047_v4  ;;  %v1034_v43 = vmax.f32 %v5987_v57, %v970_v15  ;;  %v1035_v27 = vmax.f32 %v5990_v46, %v971_v39  ;;  %v6076_v10 = vadd.f32 %v5487_v8, %v7882_v60  ;;  %v972_v57 = vmul.f32 0.2, %v6051_v45  ;;  %v7883_v15 = vld [vmem:[#allocation16_spill] sm:$0xff] }
 0x145   : > { %7881 = vst [vmem:[#allocation55_spill] sm:$0xff] %v6058_v40  ;;  %v1004_v0 = vmax.f32 %v5838_v17, %v5892_v19  ;;  %v1005_v30 = vmax.f32 %v5851_v52, %v5895_v31  ;;  %v1006_v56 = vmax.f32 %v5961_v12, %v942_v36  ;;  %v6085_v11 = vadd.f32 %v5489_v9, %v7882_v60  ;;  %v831_v19 = vpop.permute.xlu1 %830  ;;  %v836_v12 = vpop.permute.xlu0 %835 }
 0x146   : > { %1276 = vmax.xlane.f32.xlu0 %v1275_v29  ;;  %1279 = vmax.xlane.f32.xlu1 %v1278_v53  ;;  %v1233_v46 = vmax.f32 %v6039_v33, %v6043_v51  ;;  %v1236_v5 = vmax.f32 %v6047_v4, %v6058_v40  ;;  %v973_v17 = vmul.f32 0.2, %v6054_v23  ;;  %v974_v52 = vmul.f32 0.2, %v6061_v63  ;;  %v7888_v29 = vld [vmem:[#allocation17_spill] sm:$0xff]  ;;  %v7893_v33 = vld [vmem:[#allocation14_spill] sm:$0xff] }
 0x147   : > { %v975_v31 = vmul.f32 0.2, %v6064_v55  ;;  %v1007_v36 = vmax.f32 %v5965_v32, %v943_v58  ;;  %v7884_v39 = vunpack.c.l.bf16 %v7883_v15  ;;  %v7886_v2 = vunpack.c.h.bf16 %v7883_v15 }
 0x148   : > { %v7889_v53 = vunpack.c.l.bf16 %v7888_v29  ;;  %v7891_v40 = vunpack.c.h.bf16 %v7888_v29  ;;  %v946_v51 = vmul.f32 0.2, %v6076_v10  ;;  %v7894_v32 = vunpack.c.l.bf16 %v7893_v33 }
 0x149   : > { %v6098_v44 = vadd.f32 %v7884_v39, %v1032_v6  ;;  %v6102_v62 = vadd.f32 %v7886_v2, %v1033_v16  ;;  %v7896_v6 = vunpack.c.h.bf16 %v7893_v33  ;;  %v7898_v16 = vld [vmem:[#allocation15_spill] sm:$0xff]  ;;  %v912_v29 = vadd.f32 %v5487_v8, %v831_v19 }
 0x14a   : > { %v6106_v60 = vadd.f32 %v7889_v53, %v1034_v43  ;;  %v6110_v4 = vadd.f32 %v7891_v40, %v1035_v27  ;;  %v6115_v58 = vadd.f32 %v7894_v32, %v1004_v0  ;;  %v7899_v15 = vunpack.c.l.bf16 %v7898_v16  ;;  %1234 = vmax.xlane.f32.xlu0 %v1233_v46  ;;  %1237 = vmax.xlane.f32.xlu1 %v1236_v5  ;;  %v7903_v5 = vld [vmem:[#allocation23_spill] sm:$0xff] }
 0x14b   : > { %7885 = vst [vmem:[#allocation24_spill] sm:$0xff] %v6098_v44  ;;  %7887 = vst [vmem:[#allocation16_spill] sm:$0xff] %v6102_v62  ;;  %v6119_v39 = vadd.f32 %v7896_v6, %v1005_v30  ;;  %v947_v43 = vmul.f32 0.2, %v6085_v11  ;;  %v913_v40 = vadd.f32 %v5489_v9, %v831_v19  ;;  %v914_v27 = vadd.f32 %v5487_v8, %v836_v12 }
 0x14c   : > { %7890 = vst [vmem:[#allocation17_spill] sm:$0xff] %v6106_v60  ;;  %7892 = vst [vmem:[#allocation56_spill] sm:$0xff] %v6110_v4  ;;  %v6123_v2 = vadd.f32 %v7899_v15, %v1006_v56  ;;  %v915_v0 = vadd.f32 %v5489_v9, %v836_v12  ;;  %v7901_v33 = vunpack.c.h.bf16 %v7898_v16  ;;  %v1036_v56 = vmax.f32 %v6051_v45, %v972_v57  ;;  %v1076_v57 = vld [vmem:[%s5319_s24 + $0xf0] sm:$0xff]  ;;  %v841_v15 = vpop.permute.xlu1 %840 }
 0x14d   : > { %7895 = vst [vmem:[#allocation14_spill] sm:$0xff] %v6115_v58  ;;  %7897 = vst [vmem:[#allocation57_spill] sm:$0xff] %v6119_v39  ;;  %v1037_v53 = vmax.f32 %v6054_v23, %v973_v17  ;;  %v1281_v32 = vmax.f32 %v6098_v44, %v6102_v62  ;;  %v1284_v19 = vmax.f32 %v6106_v60, %v6110_v4  ;;  %v976_v17 = vmul.f32 0.2, %v912_v29  ;;  %v7909_v4 = vld [vmem:[#allocation21_spill] sm:$0xff]  ;;  %v6403_v60 = vld [vmem:[#allocation2 + $0x48] sm:$0xff] }
 0x14e   : > { %7900 = vst [vmem:[#allocation15_spill] sm:$0xff] %v6123_v2  ;;  %v6132_v30 = vadd.f32 %v7901_v33, %v1007_v36  ;;  %v1038_v6 = vmax.f32 %v6061_v63, %v974_v52  ;;  %v1039_v46 = vmax.f32 %v6064_v55, %v975_v31  ;;  %v884_v12 = vadd.f32 %v5487_v8, %v7903_v5  ;;  %v7904_v52 = vld [vmem:[#allocation20_spill] sm:$0xff] }
 0x14f   : > { %v885_v36 = vadd.f32 %v5489_v9, %v7903_v5  ;;  %v1239_v45 = vmax.f32 %v6115_v58, %v6119_v39  ;;  %v1008_v23 = vmax.f32 %v5931_v48, %v6001_v61  ;;  %v977_v16 = vmul.f32 0.2, %v913_v40  ;;  %1282 = vmax.xlane.f32.xlu0 %v1281_v32  ;;  %1285 = vmax.xlane.f32.xlu1 %v1284_v19 }
 0x150   : > { %7902 = vst [vmem:[#allocation58_spill] sm:$0xff] %v6132_v30  ;;  %v978_v33 = vmul.f32 0.2, %v914_v27  ;;  %v1009_v63 = vmax.f32 %v5935_v14, %v6009_v13  ;;  %v979_v55 = vmul.f32 0.2, %v915_v0  ;;  %v7905_v31 = vunpack.c.l.bf16 %v7904_v52 }
 0x151   : > { %v7907_v39 = vunpack.c.h.bf16 %v7904_v52  ;;  %v1010_v48 = vmax.f32 %v6076_v10, %v946_v51  ;;  %v1242_v61 = vmax.f32 %v6123_v2, %v6132_v30  ;;  %v7910_v32 = vunpack.c.l.bf16 %v7909_v4  ;;  %v7914_v30 = vld [vmem:[#allocation18_spill] sm:$0xff] }
 0x152   : > { %v6155_v5 = vadd.f32 %v7905_v31, %v1036_v56  ;;  %v7912_v14 = vunpack.c.h.bf16 %v7909_v4  ;;  %v1011_v56 = vmax.f32 %v6085_v11, %v947_v43  ;;  %v948_v31 = vmul.f32 0.2, %v884_v12  ;;  %v7919_v43 = vld [vmem:[#allocation19_spill] sm:$0xff] }
 0x153   : > { %v6159_v58 = vadd.f32 %v7907_v39, %v1037_v53  ;;  %v6166_v19 = vadd.f32 %v7910_v32, %v1038_v6  ;;  %v916_v39 = vadd.f32 %v5487_v8, %v841_v15  ;;  %v1138_v53 = vunpack.c.l.bf16 %v1076_v57  ;;  %1240 = vmax.xlane.f32.xlu0 %v1239_v45  ;;  %1243 = vmax.xlane.f32.xlu1 %v1242_v61 }
 0x154   : > { %7906 = vst [vmem:[#allocation23_spill] sm:$0xff] %v6155_v5  ;;  %v6170_v13 = vadd.f32 %v7912_v14, %v1039_v46  ;;  %v1139_v52 = vunpack.c.h.bf16 %v1076_v57  ;;  %v949_v51 = vmul.f32 0.2, %v885_v36  ;;  %v917_v10 = vadd.f32 %v5489_v9, %v841_v15  ;;  %v1061_v9 = vld [vmem:[%s5319_s24 + $0x78] sm:$0xff] }
 0x155   : > { %7908 = vst [vmem:[#allocation20_spill] sm:$0xff] %v6159_v58  ;;  %7911 = vst [vmem:[#allocation21_spill] sm:$0xff] %v6166_v19  ;;  %v7915_v6 = vunpack.c.l.bf16 %v7914_v30  ;;  %v7917_v4 = vunpack.c.h.bf16 %v7914_v30  ;;  %v1287_v11 = vmax.f32 %v6155_v5, %v6159_v58  ;;  %v7920_v8 = vunpack.c.l.bf16 %v7919_v43  ;;  %v6401_v5 = vld [vmem:[#allocation2 + $0x50] sm:$0xff] }
 0x156   : > { %7913 = vst [vmem:[#allocation59_spill] sm:$0xff] %v6170_v13  ;;  %v1040_v57 = vmax.f32 %v912_v29, %v976_v17  ;;  %v1041_v2 = vmax.f32 %v913_v40, %v977_v16  ;;  %v1290_v45 = vmax.f32 %v6166_v19, %v6170_v13  ;;  %v1042_v30 = vmax.f32 %v914_v27, %v978_v33  ;;  %v7924_v40 = vld [vmem:[#allocation22_spill] sm:$0xff]  ;;  %v6385_v13 = vld [vmem:[#allocation2 + $0xc0] sm:$0xff] }
 0x157   : > { %v6177_v32 = vadd.f32 %v7915_v6, %v1008_v23  ;;  %v6181_v46 = vadd.f32 %v7917_v4, %v1009_v63  ;;  %v6187_v14 = vadd.f32 %v7920_v8, %v1010_v48  ;;  %v7922_v23 = vunpack.c.h.bf16 %v7919_v43  ;;  %1288 = vmax.xlane.f32.xlu0 %v1287_v11  ;;  %v1077_v8 = vld [vmem:[%s5319_s24 + $0xf8] sm:$0xff] }
 0x158   : > { %v1043_v63 = vmax.f32 %v915_v0, %v979_v55  ;;  %v980_v61 = vmul.f32 0.2, %v916_v39  ;;  %v981_v6 = vmul.f32 0.2, %v917_v10  ;;  %1291 = vmax.xlane.f32.xlu1 %v1290_v45  ;;  %v1108_v4 = vunpack.c.l.bf16 %v1061_v9  ;;  %v6387_v19 = vld [vmem:[#allocation2 + $0xb8] sm:$0xff] }
 0x159   : > { %7916 = vst [vmem:[#allocation18_spill] sm:$0xff] %v6177_v32  ;;  %7918 = vst [vmem:[#allocation60_spill] sm:$0xff] %v6181_v46  ;;  %v6194_v15 = vadd.f32 %v7922_v23, %v1011_v56  ;;  %v1109_v48 = vunpack.c.h.bf16 %v1061_v9  ;;  %v1245_v29 = vmax.f32 %v6177_v32, %v6181_v46  ;;  %v7925_v17 = vunpack.c.l.bf16 %v7924_v40 }
 0x15a   : > { %7921 = vst [vmem:[#allocation19_spill] sm:$0xff] %v6187_v14  ;;  %v7927_v43 = vunpack.c.h.bf16 %v7924_v40  ;;  %v1012_v27 = vmax.f32 %v884_v12, %v948_v31  ;;  %v6208_v33 = vadd.f32 %v1138_v53, %v1042_v30  ;;  %v6210_v55 = vadd.f32 %v1139_v52, %v1043_v63  ;;  %v4578_v63 = vld [vmem:[%s5317_s23] sm:$0xff]  }
 0x15b   : > { %7923 = vst [vmem:[#allocation61_spill] sm:$0xff] %v6194_v15  ;;  %v6200_v16 = vadd.f32 %v7925_v17, %v1040_v57  ;;  %v1248_v0 = vmax.f32 %v6187_v14, %v6194_v15  ;;  %v1013_v11 = vmax.f32 %v885_v36, %v949_v51  ;;  %1246 = vmax.xlane.f32.xlu0 %v1245_v29  ;;  %v1141_v12 = vunpack.c.h.bf16 %v1077_v8  ;;  %v6240_v17 = vld [vmem:[#allocation2 + $0x8] sm:$0xff]  ;;  %v6369_v15 = vld [vmem:[#allocation2 + $0x38] sm:$0xff] }
 0x15c   : > { %v6204_v56 = vadd.f32 %v7927_v43, %v1041_v2  ;;  %7929 = vst [vmem:[#allocation63_spill] sm:$0xff] %v6208_v33  ;;  %7930 = vst [vmem:[#allocation64_spill] sm:$0xff] %v6210_v55  ;;  %v6215_v9 = vadd.f32 %v1108_v4, %v1012_v27  ;;  %v1140_v2 = vunpack.c.l.bf16 %v1077_v8  ;;  %v1296_v31 = vmax.f32 %v6208_v33, %v6210_v55  ;;  %v4581_v4 = vld [vmem:[%s5317_s23 + $0x50] sm:$0xff]   ;;  %v6353_v33 = vld [vmem:[#allocation2 + $0xa8] sm:$0xff] }
 0x15d   : > { %7926 = vst [vmem:[#allocation22_spill] sm:$0xff] %v6200_v16  ;;  %1249 = vmax.xlane.f32.xlu1 %v1248_v0  ;;  %v6219_v53 = vadd.f32 %v1109_v48, %v1013_v11  ;;  %v1044_v52 = vmax.f32 %v916_v39, %v980_v61  ;;  %v1045_v36 = vmax.f32 %v917_v10, %v981_v6  ;;  %v4577_v39 = vld [vmem:[%s5317_s23 + $0x40] sm:$0xff]   ;;  %v4579_v10 = vld [vmem:[%s5317_s23 + $0x48] sm:$0xff]   ;;  %v4582_v48 = vld [vmem:[%s5317_s23 + $0x10] sm:$0xff]  }
 0x15e   : > { %7928 = vst [vmem:[#allocation62_spill] sm:$0xff] %v6204_v56  ;;  %v1293_v57 = vmax.f32 %v6200_v16, %v6204_v56  ;;  %7931 = vst [vmem:[#allocation65_spill] sm:$0xff] %v6215_v9  ;;  %4243 = vmatprep.subr.bf16.mxu0 %v4577_v39  ;;  %4499 = vmatprep.subr.bf16.mxu1 %v4577_v39  ;;  %v4580_v61 = vld [vmem:[%s5317_s23 + $0x8] sm:$0xff]   ;;  %v6233_v6 = vld [vmem:[#allocation2] sm:$0xff] }
 0x15f   : > { %7932 = vst [vmem:[#allocation66_spill] sm:$0xff] %v6219_v53  ;;  %v1251_v51 = vmax.f32 %v6215_v9, %v6219_v53  ;;  %v6223_v45 = vadd.f32 %v1140_v2, %v1044_v52  ;;  %v6225_v23 = vadd.f32 %v1141_v12, %v1045_v36  ;;  %4244 = vmatpush3.bf16.msra.mxu0 %v4578_v63  ;;  %v6250_v11 = vld [vmem:[#allocation2 + $0x10] sm:$0xff]  ;;  %v4583_v2 = vld [vmem:[%s5317_s23 + $0x58] sm:$0xff]   ;;  %v4585_v36 = vld [vmem:[%s5317_s23 + $0x60] sm:$0xff]  }
 0x160   : > { %1294 = vmax.xlane.f32.xlu0 %v1293_v57  ;;  %4507 = vmatpush3.bf16.msra.mxu1 %v4578_v63  ;;  %v4584_v12 = vld [vmem:[%s5317_s23 + $0x18] sm:$0xff]   ;;  %v4588_v39 = vld [vmem:[%s5317_s23 + $0x28] sm:$0xff]   ;;  %v4589_v63 = vld [vmem:[%s5317_s23 + $0x70] sm:$0xff]  }
 0x161   : > { %1297 = vmax.xlane.f32.xlu1 %v1296_v31  ;;  %7933 = vst [vmem:[#allocation67_spill] sm:$0xff] %v6223_v45  ;;  %7934 = vst [vmem:[#allocation68_spill] sm:$0xff] %v6225_v23  ;;  %v1299_v30 = vmax.f32 %v6223_v45, %v6225_v23  ;;  %4245 = vmatprep.subr.bf16.mxu0 %v4579_v10  ;;  %v6317_v52 = vld [vmem:[#allocation2 + $0x98] sm:$0xff]  ;;  %v6331_v8 = vld [vmem:[#allocation2 + $0x30] sm:$0xff] }
 0x162   : > { %4500 = vmatprep.subr.bf16.mxu1 %v4579_v10  ;;  %v4590_v10 = vld [vmem:[%s5317_s23 + $0x30] sm:$0xff]   ;;  %v6333_v23 = vld [vmem:[#allocation2 + $0x28] sm:$0xff]  ;;  %v6367_v16 = vld [vmem:[#allocation2 + $0x40] sm:$0xff] }
 0x163   : > { %4246 = vmatpush3.bf16.msra.mxu0 %v4580_v61  ;;  %v6351_v55 = vld [vmem:[#allocation2 + $0xb0] sm:$0xff] }
 0x164   : > { %1252 = vmax.xlane.f32.xlu0 %v1251_v51  ;;  %4508 = vmatpush3.bf16.msra.mxu1 %v4580_v61  ;;  %v4586_v51 = vld [vmem:[%s5317_s23 + $0x20] sm:$0xff]   ;;  %v4591_v61 = vld [vmem:[%s5317_s23 + $0x78] sm:$0xff]  }
 0x165   : > { %4247 = vmatprep.subr.bf16.mxu0 %v4581_v4  ;;  %4501 = vmatprep.subr.bf16.mxu1 %v4581_v4  ;;  %v4592_v4 = vld [vmem:[%s5317_s23 + $0x38] sm:$0xff]  }
 0x167   : > { %4248 = vmatpush3.bf16.msra.mxu0 %v4582_v48 }
 0x168   : > { %1300 = vmax.xlane.f32.xlu0 %v1299_v30  ;;  %4509 = vmatpush3.bf16.msra.mxu1 %v4582_v48  ;;  %v4587_v30 = vld [vmem:[%s5317_s23 + $0x68] sm:$0xff]   ;;  %v6275_v48 = vld [vmem:[#allocation2 + $0x80] sm:$0xff] }
 0x169   : > { %4249 = vmatprep.subr.bf16.mxu0 %v4583_v2  ;;  %4502 = vmatprep.subr.bf16.mxu1 %v4583_v2  ;;  %v6282_v2 = vld [vmem:[#allocation2 + $0x88] sm:$0xff] }
 0x16b   : > { %4250 = vmatpush3.bf16.msra.mxu0 %v4584_v12 }
 0x16c   : > { %4510 = vmatpush3.bf16.msra.mxu1 %v4584_v12  ;;  %4251 = vmatprep.subr.bf16.mxu0 %v4585_v36  ;;  %v6315_v12 = vld [vmem:[#allocation2 + $0xa0] sm:$0xff] }
 0x16d   : > { %4503 = vmatprep.subr.bf16.mxu1 %v4585_v36 }
 0x16f   : > { %4252 = vmatpush3.bf16.msra.mxu0 %v4586_v51 }
 0x170   : > { %4511 = vmatpush3.bf16.msra.mxu1 %v4586_v51  ;;  %4253 = vmatprep.subr.bf16.mxu0 %v4587_v30 }
 0x171   : > { %4504 = vmatprep.subr.bf16.mxu1 %v4587_v30 }
 0x173   : > { %4254 = vmatpush3.bf16.msra.mxu0 %v4588_v39 }
 0x174   : > { %4255 = vmatprep.subr.bf16.mxu0 %v4589_v63  ;;  %4512 = vmatpush3.bf16.msra.mxu1 %v4588_v39 }
 0x175   : > { %4505 = vmatprep.subr.bf16.mxu1 %v4589_v63  ;;  %v6295_v63 = vld [vmem:[#allocation2 + $0x20] sm:$0xff] }
 0x177   : > { %4256 = vmatpush3.bf16.msra.mxu0 %v4590_v10 }
 0x178   : > { %4257 = vmatprep.subr.bf16.mxu0 %v4591_v61  ;;  %4513 = vmatpush3.bf16.msra.mxu1 %v4590_v10  ;;  %v6297_v10 = vld [vmem:[#allocation2 + $0x18] sm:$0xff] }
 0x179   : > { %4506 = vmatprep.subr.bf16.mxu1 %v4591_v61 }
 0x17b   : > { %4258 = vmatpush3.bf16.msra.mxu0 %v4592_v4 }
 0x17c   : > { %4514 = vmatpush3.bf16.msra.mxu1 %v4592_v4 }
 0x18e   : > { %v1208_v29 = vpop.xlane.xlu0 %1207 }
 0x18f   : > { %v6238_v40 = vmax.f32 %v6233_v6, %v1208_v29 }
 0x191   : > { %2648 = vst.msk [vmem:[#allocation2] sm:$0xff] %vm2006_vm1, %v6238_v40  ;;  %1464 = vperm.xlu1 %4576, %v6238_v40   ;;  %v7936_v38 = vsub.f32 %v6233_v6, %v6238_v40  ;;  %v6509_v6 = vld [vmem:[#allocation2 + $0x78] sm:$0xff] }
 0x192   : > { %v1211_v27 = vpop.xlane.xlu1 %1210 }
 0x193   : > { %v6248_v0 = vmax.f32 %v6240_v17, %v1211_v27  ;;  %v1398_v20 = vmul.f32 1.442695, %v7936_v38 }
 0x195   : > { %2649 = vst.msk [vmem:[#allocation2 + $0x8] sm:$0xff] %vm2006_vm1, %v6248_v0  ;;  %1469 = vperm.xlu0 %4575, %v6248_v0  }
 0x196   : > { %v1214_v57 = vpop.xlane.xlu1 %1213 }
 0x197   : > { %v6260_v31 = vmax.f32 %v6250_v11, %v1214_v57  ;;  %v6280_v57 = vld [vmem:[#allocation2 + $0x90] sm:$0xff] }
 0x199   : > { %2650 = vst.msk [vmem:[#allocation2 + $0x10] sm:$0xff] %vm2006_vm1, %v6260_v31  ;;  %1474 = vperm.xlu0 %4575, %v6260_v31   ;;  %v7937_v40 = vsub.f32 %v6250_v11, %v6260_v31 }
 0x1b1   : > { %v1256_v29 = vpop.xlane.xlu0 %1255 }
 0x1b2   : > { %v6278_v27 = vmax.f32 %v6275_v48, %v1256_v29 }
 0x1b4   : > { %2664 = vst.msk [vmem:[#allocation2 + $0x80] sm:$0xff] %vm2006_vm1, %v6278_v27  ;;  %1544 = vperm.xlu1 %4576, %v6278_v27  }
 0x1b5   : > { %v1262_v36 = vpop.xlane.xlu1 %1261  ;;  %v1259_v51 = vpop.xlane.xlu0 %1258 }
 0x1b6   : > { %v6290_v30 = vmax.f32 %v6280_v57, %v1262_v36  ;;  %v6293_v39 = vmax.f32 %v6282_v2, %v1259_v51 }
 0x1b8   : > { %2666 = vst.msk [vmem:[#allocation2 + $0x90] sm:$0xff] %vm2006_vm1, %v6290_v30  ;;  %2665 = vst.msk [vmem:[#allocation2 + $0x88] sm:$0xff] %vm2006_vm1, %v6293_v39  ;;  %1554 = vperm.xlu0 %4575, %v6290_v30   ;;  %1549 = vperm.xlu1 %4576, %v6293_v39  }
 0x1b9   : > { %v1220_v29 = vpop.xlane.xlu1 %1219 }
 0x1ba   : > { %v6310_v51 = vmax.f32 %v6295_v63, %v1220_v29 }
 0x1bc   : > { %v1217_v36 = vpop.xlane.xlu0 %1216  ;;  %2652 = vst.msk [vmem:[#allocation2 + $0x20] sm:$0xff] %vm2006_vm1, %v6310_v51  ;;  %1484 = vperm.xlu0 %4575, %v6310_v51  }
 0x1bd   : > { %v6313_v61 = vmax.f32 %v6297_v10, %v1217_v36 }
 0x1be   : > { %v1268_v4 = vpop.xlane.xlu1 %1267 }
 0x1bf   : > { %2651 = vst.msk [vmem:[#allocation2 + $0x18] sm:$0xff] %vm2006_vm1, %v6313_v61  ;;  %1479 = vperm.xlu1 %4576, %v6313_v61   ;;  %v6326_v43 = vmax.f32 %v6315_v12, %v1268_v4 }
 0x1c0   : > { %v1265_v29 = vpop.xlane.xlu0 %1264 }
 0x1c1   : > { %v6329_v36 = vmax.f32 %v6317_v52, %v1265_v29  ;;  %2668 = vst.msk [vmem:[#allocation2 + $0xa0] sm:$0xff] %vm2006_vm1, %v6326_v43  ;;  %1564 = vperm.xlu0 %4575, %v6326_v43  }
 0x1c2   : > { %v1226_v4 = vpop.xlane.xlu1 %1225 }
 0x1c3   : > { %2667 = vst.msk [vmem:[#allocation2 + $0x98] sm:$0xff] %vm2006_vm1, %v6329_v36  ;;  %1559 = vperm.xlu1 %4576, %v6329_v36   ;;  %v6346_v9 = vmax.f32 %v6331_v8, %v1226_v4 }
 0x1c4   : > { %v1223_v29 = vpop.xlane.xlu0 %1222 }
 0x1c5   : > { %v6349_v45 = vmax.f32 %v6333_v23, %v1223_v29  ;;  %2654 = vst.msk [vmem:[#allocation2 + $0x30] sm:$0xff] %vm2006_vm1, %v6346_v9  ;;  %1494 = vperm.xlu0 %4575, %v6346_v9  }
 0x1c7   : > { %2653 = vst.msk [vmem:[#allocation2 + $0x28] sm:$0xff] %vm2006_vm1, %v6349_v45  ;;  %1489 = vperm.xlu1 %4576, %v6349_v45  }
 0x1c8   : > { %v1274_v53 = vpop.xlane.xlu1 %1273  ;;  %v1271_v4 = vpop.xlane.xlu0 %1270 }
 0x1c9   : > { %v6362_v56 = vmax.f32 %v6351_v55, %v1274_v53  ;;  %v6365_v29 = vmax.f32 %v6353_v33, %v1271_v4 }
 0x1cb   : > { %2670 = vst.msk [vmem:[#allocation2 + $0xb0] sm:$0xff] %vm2006_vm1, %v6362_v56  ;;  %2669 = vst.msk [vmem:[#allocation2 + $0xa8] sm:$0xff] %vm2006_vm1, %v6365_v29  ;;  %1574 = vperm.xlu0 %4575, %v6362_v56   ;;  %1569 = vperm.xlu1 %4576, %v6365_v29  }
 0x1cc   : > { %v1229_v4 = vpop.xlane.xlu0 %1228 }
 0x1cd   : > { %v1232_v53 = vpop.xlane.xlu1 %1231  ;;  %v6383_v32 = vmax.f32 %v6369_v15, %v1229_v4 }
 0x1ce   : > { %v6380_v46 = vmax.f32 %v6367_v16, %v1232_v53 }
 0x1cf   : > { %2655 = vst.msk [vmem:[#allocation2 + $0x38] sm:$0xff] %vm2006_vm1, %v6383_v32  ;;  %1499 = vperm.xlu1 %4576, %v6383_v32  }
 0x1d0   : > { %2656 = vst.msk [vmem:[#allocation2 + $0x40] sm:$0xff] %vm2006_vm1, %v6380_v46  ;;  %1504 = vperm.xlu0 %4575, %v6380_v46  }
 0x1d3   : > { %v1280_v14 = vpop.xlane.xlu1 %1279  ;;  %v1277_v53 = vpop.xlane.xlu0 %1276 }
 0x1d4   : > { %v6396_v58 = vmax.f32 %v6385_v13, %v1280_v14  ;;  %v6399_v4 = vmax.f32 %v6387_v19, %v1277_v53 }
 0x1d6   : > { %2672 = vst.msk [vmem:[#allocation2 + $0xc0] sm:$0xff] %vm2006_vm1, %v6396_v58  ;;  %2671 = vst.msk [vmem:[#allocation2 + $0xb8] sm:$0xff] %vm2006_vm1, %v6399_v4  ;;  %1584 = vperm.xlu0 %4575, %v6396_v58   ;;  %1579 = vperm.xlu1 %4576, %v6399_v4  }
 0x1d7   : > { %v1238_v14 = vpop.xlane.xlu1 %1237  ;;  %v1235_v53 = vpop.xlane.xlu0 %1234 }
 0x1d8   : > { %v6414_v44 = vmax.f32 %v6401_v5, %v1238_v14  ;;  %v6417_v54 = vmax.f32 %v6403_v60, %v1235_v53 }
 0x1da   : > { %2658 = vst.msk [vmem:[#allocation2 + $0x50] sm:$0xff] %vm2006_vm1, %v6414_v44  ;;  %2657 = vst.msk [vmem:[#allocation2 + $0x48] sm:$0xff] %vm2006_vm1, %v6417_v54  ;;  %1514 = vperm.xlu0 %4575, %v6414_v44   ;;  %1509 = vperm.xlu1 %4576, %v6417_v54  }
 0x1dc   : > { %v1286_v62 = vpop.xlane.xlu1 %1285  ;;  %v1283_v14 = vpop.xlane.xlu0 %1282 }
 0x1dd   : > { %v6430_v22 = vmax.f32 %v6419_v42, %v1286_v62  ;;  %v6433_v53 = vmax.f32 %v6421_v26, %v1283_v14 }
 0x1df   : > { %2674 = vst.msk [vmem:[#allocation2 + $0xd0] sm:$0xff] %vm2006_vm1, %v6430_v22  ;;  %2673 = vst.msk [vmem:[#allocation2 + $0xc8] sm:$0xff] %vm2006_vm1, %v6433_v53  ;;  %1594 = vperm.xlu0 %4575, %v6430_v22   ;;  %1589 = vperm.xlu1 %4576, %v6433_v53  }
 0x1e0   : > { %v1244_v62 = vpop.xlane.xlu1 %1243  ;;  %v1241_v14 = vpop.xlane.xlu0 %1240 }
 0x1e1   : > { %v6448_v47 = vmax.f32 %v6435_v49, %v1244_v62  ;;  %v6451_v18 = vmax.f32 %v6437_v50, %v1241_v14  ;;  %v7935_v62 = vsub.f32 %v6240_v17, %v6248_v0  ;;  %v1370_v14 = vsub.f32 %v6295_v63, %v6310_v51 }
 0x1e3   : > { %2660 = vst.msk [vmem:[#allocation2 + $0x60] sm:$0xff] %vm2006_vm1, %v6448_v47  ;;  %2659 = vst.msk [vmem:[#allocation2 + $0x58] sm:$0xff] %vm2006_vm1, %v6451_v18  ;;  %1524 = vperm.xlu0 %4575, %v6448_v47   ;;  %1519 = vperm.xlu1 %4576, %v6451_v18   ;;  %v1400_v35 = vmul.f32 1.442695, %v7935_v62  ;;  %v6490_v62 = vld [vmem:[#allocation2 + $0xf0] sm:$0xff] }
 0x1e4   : > { %v1289_v41 = vpop.xlane.xlu0 %1288 }
 0x1e5   : > { %v1292_v28 = vpop.xlane.xlu1 %1291  ;;  %v6472_v34 = vmax.f32 %v6455_v37, %v1289_v41  ;;  %4593 = vpow2.f32 %v1400_v35  ;;  %v1372_v41 = vsub.f32 %v6331_v8, %v6346_v9  ;;  %v1374_v9 = vsub.f32 %v6367_v16, %v6380_v46 }
 0x1e6   : > { %v6469_v3 = vmax.f32 %v6453_v25, %v1292_v28  ;;  %v1406_v28 = vmul.f32 1.442695, %v1370_v14  ;;  %v1376_v16 = vsub.f32 %v6401_v5, %v6414_v44  ;;  %v1378_v5 = vsub.f32 %v6435_v49, %v6448_v47 }
 0x1e7   : > { %2675 = vst.msk [vmem:[#allocation2 + $0xd8] sm:$0xff] %vm2006_vm1, %v6472_v34  ;;  %1599 = vperm.xlu1 %4576, %v6472_v34   ;;  %v1410_v35 = vmul.f32 1.442695, %v1372_v41 }
 0x1e8   : > { %2676 = vst.msk [vmem:[#allocation2 + $0xe0] sm:$0xff] %vm2006_vm1, %v6469_v3  ;;  %1604 = vperm.xlu0 %4575, %v6469_v3   ;;  %v1247_v0 = vpop.xlane.xlu0 %1246  ;;  %4595 = vpow2.f32 %v1406_v28  ;;  %v1369_v28 = vsub.f32 %v6297_v10, %v6313_v61  ;;  %v6531_v61 = vld [vmem:[#allocation2 + $0xf8] sm:$0xff]  ;;  %v1418_v44 = vmul.f32 1.442695, %v1376_v16  ;;  %v1422_v49 = vmul.f32 1.442695, %v1378_v5 }
 0x1e9   : > { %v6488_v51 = vmax.f32 %v6476_v1, %v1247_v0  ;;  %4597 = vpow2.f32 %v1398_v20  ;;  %v1402_v0 = vmul.f32 1.442695, %v7937_v40  ;;  %v1414_v20 = vmul.f32 1.442695, %v1374_v9 }
 0x1ea   : > { %v1250_v17 = vpop.xlane.xlu1 %1249  ;;  %4599 = vpow2.f32 %v1410_v35  ;;  %v1404_v41 = vmul.f32 1.442695, %v1369_v28 }
 0x1eb   : > { %v1348_v63 = vmax.f32 %v6474_v7, %v1250_v17  ;;  %2661 = vst.msk [vmem:[#allocation2 + $0x68] sm:$0xff] %vm2006_vm1, %v6488_v51  ;;  %1529 = vperm.xlu1 %4576, %v6488_v51   ;;  %4601 = vpow2.f32 %v1402_v0  ;;  %v1379_v5 = vsub.f32 %v6476_v1, %v6488_v51 }
 0x1ec   : > { %4603 = vpow2.f32 %v1414_v20 }
 0x1ed   : > { %2662 = vst.msk [vmem:[#allocation2 + $0x70] sm:$0xff] %vm2006_vm1, %v1348_v63  ;;  %1534 = vperm.xlu0 %4575, %v1348_v63   ;;  %v1295_v14 = vpop.xlane.xlu0 %1294  ;;  %4605 = vpow2.f32 %v1404_v41  ;;  %v1380_v47 = vsub.f32 %v6474_v7, %v1348_v63  ;;  %v7938_v7 = vsub.f32 %v6275_v48, %v6278_v27 }
 0x1ee   : > { %v1298_v8 = vpop.xlane.xlu1 %1297  ;;  %v6507_v38 = vmax.f32 %v6492_v59, %v1295_v14  ;;  %4607 = vpow2.f32 %v1418_v44  ;;  %v7939_v44 = vsub.f32 %v6280_v57, %v6290_v30  ;;  %v1388_v57 = vsub.f32 %v6351_v55, %v6362_v56 }
 0x1ef   : > { %v6504_v17 = vmax.f32 %v6490_v62, %v1298_v8  ;;  %v6529_v10 = vpop.eup %4593  ;;  %v1371_v8 = vsub.f32 %v6333_v23, %v6349_v45  ;;  %v1373_v23 = vsub.f32 %v6369_v15, %v6383_v32  ;;  %v1375_v15 = vsub.f32 %v6403_v60, %v6417_v54 }
 0x1f0   : > { %2677 = vst.msk [vmem:[#allocation2 + $0xe8] sm:$0xff] %vm2006_vm1, %v6507_v38  ;;  %1609 = vperm.xlu1 %4576, %v6507_v38   ;;  %v1426_v20 = vmul.f32 1.442695, %v1380_v47  ;;  %v1430_v63 = vmul.f32 1.442695, %v7938_v7  ;;  %v1390_v56 = vsub.f32 %v6385_v13, %v6396_v58  ;;  %v7947_v7 = vsub.f32 %v6353_v33, %v6365_v29  ;;  %v7952_v33 = vld [vmem:[#allocation8_spill] sm:$0xff] }
 0x1f1   : > { %2678 = vst.msk [vmem:[#allocation2 + $0xf0] sm:$0xff] %vm2006_vm1, %v6504_v17  ;;  %1614 = vperm.xlu0 %4575, %v6504_v17   ;;  %v1253_v11 = vpop.xlane.xlu0 %1252  ;;  %v1408_v45 = vmul.f32 1.442695, %v1371_v8  ;;  %v1412_v32 = vmul.f32 1.442695, %v1373_v23  ;;  %v1377_v8 = vsub.f32 %v6437_v50, %v6451_v18 }
 0x1f2   : > { %v6527_v31 = vmax.f32 %v6509_v6, %v1253_v11  ;;  %v6544_v14 = vpop.eup %4595  ;;  %v1416_v41 = vmul.f32 1.442695, %v1375_v15  ;;  %v1434_v48 = vmul.f32 1.442695, %v7939_v44  ;;  %v1424_v30 = vmul.f32 1.442695, %v1379_v5 }
 0x1f3   : > { %v6555_v0 = vpop.eup %4597  ;;  %4609 = vpow2.f32 %v1408_v45  ;;  %v1420_v27 = vmul.f32 1.442695, %v1377_v8  ;;  %v1446_v47 = vmul.f32 1.442695, %v1390_v56  ;;  %v7945_v15 = vsub.f32 %v6317_v52, %v6329_v36  ;;  %v7951_v44 = vld [vmem:[#allocation7_spill] sm:$0xff] }
 0x1f4   : > { %2663 = vst.msk [vmem:[#allocation2 + $0x78] sm:$0xff] %vm2006_vm1, %v6527_v31  ;;  %1539 = vperm.xlu1 %4576, %v6527_v31   ;;  %v6557_v28 = vpop.eup %4599  ;;  %4611 = vpow2.f32 %v1422_v49  ;;  %v1381_v1 = vsub.f32 %v6509_v6, %v6527_v31  ;;  %v1442_v49 = vmul.f32 1.442695, %v1388_v57  ;;  %v7943_v6 = vsub.f32 %v6282_v2, %v6293_v39 }
 0x1f5   : > { %2078 = vperm.xlu0 %4575, %v6529_v10   ;;  %v1301_v35 = vpop.xlane.xlu0 %1300  ;;  %v6563_v16 = vpop.eup %4601  ;;  %4613 = vpow2.f32 %v1412_v32  ;;  %v1392_v32 = vsub.f32 %v6419_v42, %v6430_v22  ;;  %v1436_v2 = vmul.f32 1.442695, %v7945_v15 }
 0x1f6   : > { %v6542_v9 = vmax.f32 %v6531_v61, %v1301_v35  ;;  %v6565_v11 = vpop.eup %4603  ;;  %4615 = vpow2.f32 %v1426_v20  ;;  %v7940_v35 = vsub.f32 %v6315_v12, %v6326_v43  ;;  %v1428_v55 = vmul.f32 1.442695, %v1381_v1 }
 0x1f7   : > { %v6574_v54 = vpop.eup %4605  ;;  %4617 = vpow2.f32 %v1430_v63  ;;  %v1432_v31 = vmul.f32 1.442695, %v7943_v6  ;;  %v1450_v39 = vmul.f32 1.442695, %v1392_v32  ;;  %v1394_v20 = vsub.f32 %v6453_v25, %v6469_v3 }
 0x1f8   : > { %2679 = vst.msk [vmem:[#allocation2 + $0xf8] sm:$0xff] %vm2006_vm1, %v6542_v9  ;;  %1619 = vperm.xlu1 %4576, %v6542_v9   ;;  %v6576_v60 = vpop.eup %4607  ;;  %4619 = vpow2.f32 %v1416_v41  ;;  %v1438_v45 = vmul.f32 1.442695, %v7940_v35  ;;  %v1440_v63 = vmul.f32 1.442695, %v7947_v7  ;;  %v7950_v25 = vsub.f32 %v6387_v19, %v6399_v4 }
 0x1f9   : > { %2093 = vperm.xlu0 %4575, %v6544_v14   ;;  %4621 = vpow2.f32 %v1434_v48  ;;  %v1454_v52 = vmul.f32 1.442695, %v1394_v20  ;;  %v1395_v32 = vsub.f32 %v6492_v59, %v6507_v38 }
 0x1fa   : > { %4623 = vpow2.f32 %v1420_v27  ;;  %v1444_v8 = vmul.f32 1.442695, %v7950_v25  ;;  %v7953_v27 = vsub.f32 %v6421_v26, %v6433_v53  ;;  %v1393_v26 = vsub.f32 %v6455_v37, %v6472_v34 }
 0x1fb   : > { %4625 = vpow2.f32 %v1438_v45  ;;  %v1456_v37 = vmul.f32 1.442695, %v1395_v32  ;;  %v7970_v32 = vld [vmem:[#allocation32_spill] sm:$0xff] }
 0x1fc   : > { %2073 = vperm.xlu1 %4576, %v6555_v0   ;;  %4627 = vpow2.f32 %v1424_v30  ;;  %v1448_v5 = vmul.f32 1.442695, %v7953_v27  ;;  %v7956_v30 = vld [vmem:[#allocation9_spill] sm:$0xff] }
 0x1fd   : > { %2103 = vperm.xlu0 %4575, %v6557_v28   ;;  %v6585_v18 = vpop.eup %4609  ;;  %4629 = vpow2.f32 %v1442_v49  ;;  %v7957_v49 = vld [vmem:[#allocation10_spill] sm:$0xff] }
 0x1fe   : > { %v6587_v50 = vpop.eup %4611  ;;  %4631 = vpow2.f32 %v1428_v55 }
 0x1ff   : > { %v6598_v51 = vpop.eup %4613  ;;  %4633 = vpow2.f32 %v1432_v31 }
 0x200   : > { %2083 = vperm.xlu1 %4576, %v6563_v16   ;;  %v6600_v23 = vpop.eup %4615  ;;  %4635 = vpow2.f32 %v1446_v47  ;;  %v1452_v47 = vmul.f32 1.442695, %v1393_v26 }
 0x201   : > { %2113 = vperm.xlu0 %4575, %v6565_v11   ;;  %7941 = vst [vmem:[#allocation69_spill] sm:$0xff] %v6600_v23  ;;  %v6606_v43 = vpop.eup %4617  ;;  %4637 = vpow2.f32 %v1436_v2 }
 0x202   : > { %7942 = vst [vmem:[#allocation70_spill] sm:$0xff] %v6606_v43  ;;  %v6608_v12 = vpop.eup %4619  ;;  %4639 = vpow2.f32 %v1450_v39 }
 0x203   : > { %v6617_v58 = vpop.eup %4621  ;;  %4641 = vpow2.f32 %v1440_v63 }
 0x204   : > { %2088 = vperm.xlu1 %4576, %v6574_v54   ;;  %7944 = vst [vmem:[#allocation71_spill] sm:$0xff] %v6617_v58  ;;  %v6619_v13 = vpop.eup %4623  ;;  %4643 = vpow2.f32 %v1454_v52 }
 0x205   : > { %2123 = vperm.xlu0 %4575, %v6576_v60   ;;  %v6628_v22 = vpop.eup %4625  ;;  %4645 = vpow2.f32 %v1444_v8  ;;  %v7965_v8 = vld [vmem:[#allocation12_spill] sm:$0xff] }
 0x206   : > { %7946 = vst [vmem:[#allocation72_spill] sm:$0xff] %v6628_v22  ;;  %v6630_v42 = vpop.eup %4627  ;;  %4647 = vpow2.f32 %v1448_v5 }
 0x207   : > { %v6637_v36 = vpop.eup %4629 }
 0x208   : > { %2098 = vperm.xlu1 %4576, %v6585_v18   ;;  %7948 = vst [vmem:[#allocation73_spill] sm:$0xff] %v6637_v36  ;;  %v6639_v41 = vpop.eup %4631 }
 0x209   : > { %2133 = vperm.xlu0 %4575, %v6587_v50   ;;  %7949 = vst [vmem:[#allocation74_spill] sm:$0xff] %v6639_v41  ;;  %v6651_v35 = vpop.eup %4633 }
 0x20a   : > { %7954 = vst [vmem:[#allocation7_spill] sm:$0xff] %v6651_v35  ;;  %v6653_v57 = vpop.eup %4635 }
 0x20b   : > { %7955 = vst [vmem:[#allocation8_spill] sm:$0xff] %v6653_v57  ;;  %v6661_v53 = vpop.eup %4637 }
 0x20c   : > { %2108 = vperm.xlu1 %4576, %v6598_v51   ;;  %7958 = vst [vmem:[#allocation9_spill] sm:$0xff] %v6661_v53  ;;  %v6663_v31 = vpop.eup %4639 }
 0x20d   : > { %2143 = vperm.xlu0 %4575, %v6600_v23   ;;  %7959 = vst [vmem:[#allocation10_spill] sm:$0xff] %v6663_v31  ;;  %v6669_v15 = vpop.eup %4641 }
 0x20e   : > { %7960 = vst [vmem:[#allocation75_spill] sm:$0xff] %v6669_v15  ;;  %v6671_v34 = vpop.eup %4643 }
 0x20f   : > { %7961 = vst [vmem:[#allocation76_spill] sm:$0xff] %v6671_v34  ;;  %v6675_v2 = vpop.eup %4645 }
 0x210   : > { %2118 = vperm.xlu1 %4576, %v6608_v12   ;;  %v1465_v3 = vpop.permute.xlu1 %1464  ;;  %7962 = vst [vmem:[#allocation77_spill] sm:$0xff] %v6675_v2  ;;  %v6677_v39 = vpop.eup %4647 }
 0x211   : > { %2153 = vperm.xlu0 %4575, %v6606_v43   ;;  %v1622_v48 = vsub.f32 %v7951_v44, %v1465_v3  ;;  %v1623_v29 = vsub.f32 %v7952_v33, %v1465_v3  ;;  %7963 = vst [vmem:[#allocation78_spill] sm:$0xff] %v6677_v39 }
 0x213   : > { %v1686_v45 = vmul.f32 1.442695, %v1622_v48  ;;  %v1688_v19 = vmul.f32 1.442695, %v1623_v29  ;;  %v7966_v48 = vld [vmem:[#allocation13_spill] sm:$0xff] }
 0x214   : > { %2128 = vperm.xlu1 %4576, %v6619_v13   ;;  %v1470_v4 = vpop.permute.xlu0 %1469 }
 0x215   : > { %2163 = vperm.xlu0 %4575, %v6617_v58   ;;  %v1624_v1 = vsub.f32 %v7956_v30, %v1470_v4  ;;  %v1625_v56 = vsub.f32 %v7957_v49, %v1470_v4  ;;  %4649 = vpow2.f32 %v1686_v45  ;;  %v7968_v4 = vld [vmem:[#allocation30_spill] sm:$0xff] }
 0x216   : > { %4651 = vpow2.f32 %v1688_v19 }
 0x217   : > { %v1690_v55 = vmul.f32 1.442695, %v1624_v1  ;;  %v1692_v6 = vmul.f32 1.442695, %v1625_v56 }
 0x218   : > { %2138 = vperm.xlu1 %4576, %v6630_v42   ;;  %v1475_v52 = vpop.permute.xlu0 %1474 }
 0x219   : > { %2173 = vperm.xlu0 %4575, %v6628_v22   ;;  %4653 = vpow2.f32 %v1690_v55  ;;  %v1626_v44 = vsub.f32 %v7965_v8, %v1475_v52  ;;  %v1627_v33 = vsub.f32 %v7966_v48, %v1475_v52 }
 0x21a   : > { %4655 = vpow2.f32 %v1692_v6  ;;  %v7969_v6 = vld [vmem:[#allocation31_spill] sm:$0xff] }
 0x21b   : > { %4657 = vpow2.f32 %v1452_v47  ;;  %v1694_v27 = vmul.f32 1.442695, %v1626_v44  ;;  %v1696_v5 = vmul.f32 1.442695, %v1627_v33 }
 0x21c   : > { %2148 = vperm.xlu1 %4576, %v6639_v41   ;;  %4659 = vpow2.f32 %v1456_v37 }
 0x21d   : > { %2183 = vperm.xlu0 %4575, %v6637_v36   ;;  %4661 = vpow2.f32 %v1694_v27  ;;  %v7972_v27 = vld [vmem:[#allocation25_spill] sm:$0xff] }
 0x21e   : > { %4663 = vpow2.f32 %v1696_v5 }
 0x21f   : > { %v4650_v20 = vpop.eup %4649 }
 0x220   : > { %2158 = vperm.xlu1 %4576, %v6651_v35   ;;  %v4652_v7 = vpop.eup %4651 }
 0x221   : > { %2193 = vperm.xlu0 %4575, %v6653_v57   ;;  %v8005_v57 = vld [vmem:[#allocation57_spill] sm:$0xff] }
 0x223   : > { %v6680_v59 = vpop.eup %4653 }
 0x224   : > { %2168 = vperm.xlu1 %4576, %v6661_v53   ;;  %v6682_v38 = vpop.eup %4655  ;;  %v2263_v63 = vpack.c.bf16 %v6680_v59, %v4650_v20 }
 0x225   : > { %2203 = vperm.xlu0 %4575, %v6663_v31   ;;  %v2264_v3 = vpack.c.bf16 %v6682_v38, %v4652_v7  ;;  %v6687_v25 = vpop.eup %4657 }
 0x226   : > { %7964 = vst [vmem:[#allocation79_spill] sm:$0xff] %v6687_v25  ;;  %v6692_v29 = vpop.eup %4659 }
 0x227   : > { %2455 = vmatprep.mubr.bf16.mxu0 %v2264_v3  ;;  %7967 = vst [vmem:[#allocation12_spill] sm:$0xff] %v6692_v29 }
 0x228   : > { %2178 = vperm.xlu1 %4576, %v6669_v15   ;;  %2456 = vmatmul.mubr.bf16.vlgmr.msra.gmra.mrb[0].mxu0 %v2263_v63  ;;  %v7971_v63 = vld [vmem:[#allocation33_spill] sm:$0xff] }
 0x229   : > { %2213 = vperm.xlu0 %4575, %v6671_v34  }
 0x22c   : > { %2188 = vperm.xlu1 %4576, %v6675_v2  }
 0x230   : > { %2198 = vperm.xlu1 %4576, %v6677_v39  }
 0x233   : > { %v1545_v45 = vpop.permute.xlu1 %1544 }
 0x234   : > { %2208 = vperm.xlu1 %4576, %v6687_v25   ;;  %v1654_v19 = vsub.f32 %v5791_v21, %v1545_v45  ;;  %v1655_v30 = vsub.f32 %v7968_v4, %v1545_v45  ;;  %v7973_v45 = vld [vmem:[#allocation26_spill] sm:$0xff] }
 0x236   : > { %v1750_v1 = vmul.f32 1.442695, %v1654_v19  ;;  %v1752_v49 = vmul.f32 1.442695, %v1655_v30  ;;  %v6704_v30 = vpop.eup %4661 }
 0x237   : > { %v1550_v56 = vpop.permute.xlu1 %1549  ;;  %v1555_v26 = vpop.permute.xlu0 %1554 }
 0x238   : > { %2218 = vperm.xlu1 %4576, %v6692_v29   ;;  %v1656_v55 = vsub.f32 %v5801_v24, %v1550_v56  ;;  %v1657_v47 = vsub.f32 %v7969_v6, %v1550_v56  ;;  %v1658_v37 = vsub.f32 %v7970_v32, %v1555_v26  ;;  %v1659_v52 = vsub.f32 %v7971_v63, %v1555_v26  ;;  %v7974_v24 = vld [vmem:[#allocation27_spill] sm:$0xff]  ;;  %v7975_v56 = vld [vmem:[#allocation28_spill] sm:$0xff] }
 0x239   : > { %4665 = vpow2.f32 %v1750_v1  ;;  %v1878_v1 = vadd.f32 %v4652_v7, %v4650_v20  ;;  %v7979_v20 = vld [vmem:[#allocation38_spill] sm:$0xff] }
 0x23a   : > { %v1754_v3 = vmul.f32 1.442695, %v1656_v55  ;;  %v1756_v8 = vmul.f32 1.442695, %v1657_v47  ;;  %v1758_v44 = vmul.f32 1.442695, %v1658_v37  ;;  %4667 = vpow2.f32 %v1752_v49  ;;  %v6707_v55 = vpop.eup %4663 }
 0x23b   : > { %v1760_v21 = vmul.f32 1.442695, %v1659_v52  ;;  %v1485_v33 = vpop.permute.xlu0 %1484  ;;  %v7976_v52 = vld [vmem:[#allocation35_spill] sm:$0xff] }
 0x23c   : > { %4669 = vpow2.f32 %v1754_v3  ;;  %v1630_v4 = vsub.f32 %v7974_v24, %v1485_v33  ;;  %v1631_v26 = vsub.f32 %v7975_v56, %v1485_v33 }
 0x23d   : > { %4671 = vpow2.f32 %v1756_v8  ;;  %v7978_v8 = vld [vmem:[#allocation37_spill] sm:$0xff] }
 0x23e   : > { %v1480_v48 = vpop.permute.xlu1 %1479  ;;  %4673 = vpow2.f32 %v1758_v44  ;;  %v1702_v47 = vmul.f32 1.442695, %v1630_v4  ;;  %v1704_v32 = vmul.f32 1.442695, %v1631_v26  ;;  %v1884_v44 = vadd.f32 %v6707_v55, %v6704_v30  ;;  %v7980_v26 = vld [vmem:[#allocation29_spill] sm:$0xff] }
 0x23f   : > { %v1628_v5 = vsub.f32 %v7972_v27, %v1480_v48  ;;  %v1629_v19 = vsub.f32 %v7973_v45, %v1480_v48  ;;  %4675 = vpow2.f32 %v1760_v21  ;;  %v7977_v48 = vld [vmem:[#allocation36_spill] sm:$0xff] }
 0x240   : > { %v1565_v63 = vpop.permute.xlu0 %1564 }
 0x241   : > { %v1698_v49 = vmul.f32 1.442695, %v1628_v5  ;;  %v1700_v6 = vmul.f32 1.442695, %v1629_v19  ;;  %v1662_v45 = vsub.f32 %v7978_v8, %v1565_v63  ;;  %v1663_v7 = vsub.f32 %v7979_v20, %v1565_v63 }
 0x242   : > { %v1560_v37 = vpop.permute.xlu1 %1559 }
 0x243   : > { %4677 = vpow2.f32 %v1698_v49  ;;  %v1660_v3 = vsub.f32 %v7976_v52, %v1560_v37  ;;  %v1661_v27 = vsub.f32 %v7977_v48, %v1560_v37  ;;  %v1766_v5 = vmul.f32 1.442695, %v1662_v45  ;;  %v6715_v56 = vpop.eup %4665  ;;  %v7981_v49 = vld [vmem:[#allocation34_spill] sm:$0xff]  ;;  %v7982_v37 = vld [vmem:[#allocation39_spill] sm:$0xff] }
 0x244   : > { %4679 = vpow2.f32 %v1700_v6  ;;  %v1768_v19 = vmul.f32 1.442695, %v1663_v7  ;;  %v1495_v4 = vpop.permute.xlu0 %1494  ;;  %v6720_v52 = vpop.eup %4667 }
 0x245   : > { %4681 = vpow2.f32 %v1702_v47  ;;  %v1762_v33 = vmul.f32 1.442695, %v1660_v3  ;;  %v1764_v21 = vmul.f32 1.442695, %v1661_v27  ;;  %v1634_v63 = vsub.f32 %v7982_v37, %v1495_v4  ;;  %v7983_v47 = vld [vmem:[#allocation40_spill] sm:$0xff] }
 0x246   : > { %4683 = vpow2.f32 %v1704_v32  ;;  %v1490_v24 = vpop.permute.xlu1 %1489  ;;  %v1635_v3 = vsub.f32 %v7983_v47, %v1495_v4  ;;  %v4670_v48 = vpop.eup %4669  ;;  %v7986_v4 = vld [vmem:[#allocation44_spill] sm:$0xff] }
 0x247   : > { %4685 = vpow2.f32 %v1762_v33  ;;  %v1633_v6 = vsub.f32 %v7981_v49, %v1490_v24  ;;  %v1710_v8 = vmul.f32 1.442695, %v1634_v63  ;;  %v4672_v45 = vpop.eup %4671  ;;  %v2279_v33 = vpack.c.bf16 %v4670_v48, %v6715_v56 }
 0x248   : > { %1879 = vadd.xlane.f32.xlu0 %v1878_v1  ;;  %v1632_v1 = vsub.f32 %v7980_v26, %v1490_v24  ;;  %4687 = vpow2.f32 %v1764_v21  ;;  %v1712_v20 = vmul.f32 1.442695, %v1635_v3  ;;  %v6724_v24 = vpop.eup %4673  ;;  %v7984_v26 = vld [vmem:[#allocation42_spill] sm:$0xff]  ;;  %v7985_v21 = vld [vmem:[#allocation43_spill] sm:$0xff]  ;;  %v6733_v63 = vadd.f32 %v4672_v45, %v4670_v48 }
 0x249   : > { %4689 = vpow2.f32 %v1766_v5  ;;  %v1708_v27 = vmul.f32 1.442695, %v1633_v6  ;;  %v6729_v5 = vpop.eup %4675 }
 0x24a   : > { %v1706_v32 = vmul.f32 1.442695, %v1632_v1  ;;  %4691 = vpow2.f32 %v1768_v19  ;;  %v1570_v7 = vpop.permute.xlu1 %1569  ;;  %v7987_v1 = vld [vmem:[#allocation45_spill] sm:$0xff]  ;;  %v2280_v19 = vpack.c.bf16 %v4672_v45, %v6720_v52  ;;  %v7989_v45 = vld [vmem:[#allocation46_spill] sm:$0xff] }
 0x24b   : > { %v1664_v49 = vsub.f32 %v7984_v26, %v1570_v7  ;;  %v1665_v37 = vsub.f32 %v7985_v21, %v1570_v7 }
 0x24c   : > { %1885 = vadd.xlane.f32.xlu0 %v1884_v44  ;;  %v1575_v44 = vpop.permute.xlu0 %1574  ;;  %4693 = vpow2.f32 %v1706_v32  ;;  %2519 = vmatprep.mubr.bf16.mxu1 %v2280_v19 }
 0x24d   : > { %v1666_v47 = vsub.f32 %v7986_v4, %v1575_v44  ;;  %4695 = vpow2.f32 %v1708_v27  ;;  %v1667_v6 = vsub.f32 %v7987_v1, %v1575_v44  ;;  %v4678_v3 = vpop.eup %4677  ;;  %v1770_v46 = vmul.f32 1.442695, %v1664_v49  ;;  %2520 = vmatmul.mubr.bf16.vlgmr.msra.gmra.mrb[0].mxu1 %v2279_v33  ;;  %v7988_v44 = vld [vmem:[#allocation41_spill] sm:$0xff] }
 0x24e   : > { %4697 = vpow2.f32 %v1710_v8  ;;  %v1772_v40 = vmul.f32 1.442695, %v1665_v37  ;;  %v4680_v29 = vpop.eup %4679  ;;  %v1500_v7 = vpop.permute.xlu1 %1499  ;;  %v2265_v4 = vpack.c.bf16 %v4678_v3, %v6704_v30  ;;  %v7990_v8 = vld [vmem:[#allocation47_spill] sm:$0xff] }
 0x24f   : > { %v1774_v32 = vmul.f32 1.442695, %v1666_v47  ;;  %4699 = vpow2.f32 %v1712_v20  ;;  %v1776_v26 = vmul.f32 1.442695, %v1667_v6  ;;  %v6736_v27 = vpop.eup %4681  ;;  %v1636_v48 = vsub.f32 %v7988_v44, %v1500_v7  ;;  %v7991_v20 = vld [vmem:[#allocation48_spill] sm:$0xff] }
 0x250   : > { %v1505_v21 = vpop.permute.xlu0 %1504  ;;  %4701 = vpow2.f32 %v1770_v46  ;;  %v1637_v1 = vsub.f32 %v7989_v45, %v1500_v7  ;;  %v6741_v37 = vpop.eup %4683  ;;  %v2266_v6 = vpack.c.bf16 %v4680_v29, %v6707_v55  ;;  %v1887_v19 = vadd.f32 %v4680_v29, %v4678_v3  ;;  %v7992_v29 = vld [vmem:[#allocation49_spill] sm:$0xff]  ;;  %v7993_v3 = vld [vmem:[#allocation50_spill] sm:$0xff] }
 0x251   : > { %v1638_v49 = vsub.f32 %v7990_v8, %v1505_v21  ;;  %4703 = vpow2.f32 %v1772_v40  ;;  %v1639_v47 = vsub.f32 %v7991_v20, %v1505_v21  ;;  %v6745_v25 = vpop.eup %4685  ;;  %v1714_v30 = vmul.f32 1.442695, %v1636_v48  ;;  %v7994_v48 = vld [vmem:[#allocation51_spill] sm:$0xff] }
 0x252   : > { %4705 = vpow2.f32 %v1774_v32  ;;  %v1716_v46 = vmul.f32 1.442695, %v1637_v1  ;;  %v6747_v34 = vpop.eup %4687  ;;  %2463 = vmatprep.mubr.bf16.mxu0 %v2266_v6  ;;  %1888 = vadd.xlane.f32.xlu0 %v1887_v19  ;;  %v2281_v40 = vpack.c.bf16 %v6745_v25, %v6724_v24 }
 0x253   : > { %v1718_v33 = vmul.f32 1.442695, %v1638_v49  ;;  %4707 = vpow2.f32 %v1776_v26  ;;  %v1720_v7 = vmul.f32 1.442695, %v1639_v47  ;;  %v6751_v21 = vpop.eup %4689  ;;  %2464 = vmatmul.mubr.bf16.gmra.mrb[4].mxu0 %v2265_v4  ;;  %v7995_v26 = vld [vmem:[#allocation52_spill] sm:$0xff]  ;;  %v2282_v20 = vpack.c.bf16 %v6747_v34, %v6729_v5 }
 0x254   : > { %4709 = vpow2.f32 %v1714_v30  ;;  %v6756_v8 = vpop.eup %4691  ;;  %v1881_v47 = vadd.f32 %v6682_v38, %v6680_v59  ;;  %v7996_v59 = vld [vmem:[#allocation53_spill] sm:$0xff] }
 0x255   : > { %v1580_v44 = vpop.permute.xlu1 %1579  ;;  %v1585_v45 = vpop.permute.xlu0 %1584  ;;  %4711 = vpow2.f32 %v1716_v46  ;;  %2527 = vmatprep.mubr.bf16.mxu1 %v2282_v20 }
 0x256   : > { %v1668_v55 = vsub.f32 %v7992_v29, %v1580_v44  ;;  %v1669_v32 = vsub.f32 %v7993_v3, %v1580_v44  ;;  %v1670_v1 = vsub.f32 %v7994_v48, %v1585_v45  ;;  %v1671_v49 = vsub.f32 %v7995_v26, %v1585_v45  ;;  %v4694_v6 = vpop.eup %4693  ;;  %2528 = vmatmul.mubr.bf16.gmra.mrb[4].mxu1 %v2281_v40 }
 0x257   : > { %4713 = vpow2.f32 %v1718_v33  ;;  %v4696_v29 = vpop.eup %4695  ;;  %v2267_v46 = vpack.c.bf16 %v4694_v6, %v6736_v27  ;;  %v1890_v45 = vadd.f32 %v6741_v37, %v6736_v27  ;;  %v7997_v33 = vld [vmem:[#allocation54_spill] sm:$0xff] }
 0x258   : > { %v1778_v4 = vmul.f32 1.442695, %v1668_v55  ;;  %v1780_v19 = vmul.f32 1.442695, %v1669_v32  ;;  %v1782_v30 = vmul.f32 1.442695, %v1670_v1  ;;  %4715 = vpow2.f32 %v1720_v7  ;;  %v6766_v26 = vpop.eup %4697 }
 0x259   : > { %v1784_v44 = vmul.f32 1.442695, %v1671_v49  ;;  %v1510_v3 = vpop.permute.xlu1 %1509  ;;  %v1515_v48 = vpop.permute.xlu0 %1514  ;;  %v7998_v32 = vld [vmem:[#allocation11_spill] sm:$0xff]  ;;  %v1893_v39 = vadd.f32 %v4696_v29, %v4694_v6  ;;  %v2268_v31 = vpack.c.bf16 %v4696_v29, %v6741_v37  ;;  %v8000_v37 = vld [vmem:[#allocation24_spill] sm:$0xff] }
 0x25a   : > { %4717 = vpow2.f32 %v1778_v4  ;;  %v1640_v38 = vsub.f32 %v7996_v59, %v1510_v3  ;;  %v1641_v55 = vsub.f32 %v7997_v33, %v1510_v3  ;;  %v1642_v1 = vsub.f32 %v7998_v32, %v1515_v48  ;;  %v6771_v7 = vpop.eup %4699  ;;  %v7999_v49 = vld [vmem:[#allocation55_spill] sm:$0xff]  ;;  %v8001_v29 = vld [vmem:[#allocation16_spill] sm:$0xff] }
 0x25b   : > { %4719 = vpow2.f32 %v1780_v19  ;;  %v1643_v20 = vsub.f32 %v7999_v49, %v1515_v48  ;;  %v6775_v27 = vpop.eup %4701  ;;  %1894 = vadd.xlane.f32.xlu0 %v1893_v39  ;;  %2471 = vmatprep.mubr.bf16.mxu0 %v2268_v31  ;;  %v8003_v31 = vld [vmem:[#allocation56_spill] sm:$0xff] }
 0x25c   : > { %1882 = vadd.xlane.f32.xlu1 %v1881_v47  ;;  %4721 = vpow2.f32 %v1782_v30  ;;  %v1722_v4 = vmul.f32 1.442695, %v1640_v38  ;;  %v1724_v40 = vmul.f32 1.442695, %v1641_v55  ;;  %v1726_v2 = vmul.f32 1.442695, %v1642_v1  ;;  %v6777_v59 = vpop.eup %4703  ;;  %2472 = vmatmul.mubr.bf16.gmra.mrb[8].mxu0 %v2267_v46 }
 0x25d   : > { %4723 = vpow2.f32 %v1784_v44  ;;  %v1728_v3 = vmul.f32 1.442695, %v1643_v20  ;;  %v2283_v19 = vpack.c.bf16 %v6775_v27, %v6751_v21  ;;  %v6781_v6 = vpop.eup %4705  ;;  %v8002_v38 = vld [vmem:[#allocation17_spill] sm:$0xff]  ;;  %v2284_v32 = vpack.c.bf16 %v6777_v59, %v6756_v8 }
 0x25e   : > { %v1590_v47 = vpop.permute.xlu1 %1589  ;;  %v1595_v33 = vpop.permute.xlu0 %1594  ;;  %4725 = vpow2.f32 %v1722_v4  ;;  %v1896_v1 = vadd.f32 %v6771_v7, %v6766_v26 }
 0x25f   : > { %v1672_v30 = vsub.f32 %v8000_v37, %v1590_v47  ;;  %v1673_v48 = vsub.f32 %v8001_v29, %v1590_v47  ;;  %v1674_v55 = vsub.f32 %v8002_v38, %v1595_v33  ;;  %v6786_v44 = vpop.eup %4707  ;;  %4727 = vpow2.f32 %v1724_v40  ;;  %2535 = vmatprep.mubr.bf16.mxu1 %v2284_v32  ;;  %v8004_v38 = vld [vmem:[#allocation14_spill] sm:$0xff] }
 0x260   : > { %1891 = vadd.xlane.f32.xlu1 %v1890_v45  ;;  %v1675_v39 = vsub.f32 %v8003_v31, %v1595_v33  ;;  %v4710_v49 = vpop.eup %4709  ;;  %4729 = vpow2.f32 %v1726_v2  ;;  %2536 = vmatmul.mubr.bf16.gmra.mrb[8].mxu1 %v2283_v19  ;;  %v8006_v2 = vld [vmem:[#allocation15_spill] sm:$0xff] }
 0x261   : > { %v1786_v46 = vmul.f32 1.442695, %v1672_v30  ;;  %v1788_v20 = vmul.f32 1.442695, %v1673_v48  ;;  %v1790_v4 = vmul.f32 1.442695, %v1674_v55  ;;  %v4712_v47 = vpop.eup %4711  ;;  %4731 = vpow2.f32 %v1728_v3 }
 0x262   : > { %v1792_v37 = vmul.f32 1.442695, %v1675_v39  ;;  %v1520_v45 = vpop.permute.xlu1 %1519  ;;  %v1525_v29 = vpop.permute.xlu0 %1524  ;;  %v2269_v40 = vpack.c.bf16 %v4710_v49, %v6766_v26  ;;  %v8007_v3 = vld [vmem:[#allocation58_spill] sm:$0xff]  ;;  %v1899_v39 = vadd.f32 %v4712_v47, %v4710_v49  ;;  %v2270_v32 = vpack.c.bf16 %v4712_v47, %v6771_v7  ;;  %v8009_v47 = vld [vmem:[#allocation20_spill] sm:$0xff] }
 0x263   : > { %v6794_v33 = vpop.eup %4713  ;;  %4733 = vpow2.f32 %v1786_v46  ;;  %v1644_v31 = vsub.f32 %v8004_v38, %v1520_v45  ;;  %v1645_v15 = vsub.f32 %v8005_v57, %v1520_v45  ;;  %v1646_v30 = vsub.f32 %v8006_v2, %v1525_v29  ;;  %v8010_v38 = vld [vmem:[#allocation21_spill] sm:$0xff]  ;;  %v8011_v2 = vld [vmem:[#allocation59_spill] sm:$0xff] }
 0x264   : > { %1897 = vadd.xlane.f32.xlu1 %v1896_v1  ;;  %v4716_v48 = vpop.eup %4715  ;;  %4735 = vpow2.f32 %v1788_v20  ;;  %v1647_v55 = vsub.f32 %v8007_v3, %v1525_v29  ;;  %1900 = vadd.xlane.f32.xlu0 %v1899_v39 }
 0x265   : > { %v6801_v36 = vpop.eup %4717  ;;  %4737 = vpow2.f32 %v1790_v4  ;;  %v1730_v26 = vmul.f32 1.442695, %v1644_v31  ;;  %v1732_v46 = vmul.f32 1.442695, %v1645_v15  ;;  %v1734_v19 = vmul.f32 1.442695, %v1646_v30  ;;  %2479 = vmatprep.mubr.bf16.mxu0 %v2270_v32 }
 0x266   : > { %v6803_v53 = vpop.eup %4719  ;;  %4739 = vpow2.f32 %v1792_v37  ;;  %v1736_v57 = vmul.f32 1.442695, %v1647_v55  ;;  %v1600_v1 = vpop.permute.xlu1 %1599  ;;  %v1902_v20 = vadd.f32 %v4716_v48, %v6794_v33  ;;  %v2285_v49 = vpack.c.bf16 %v6801_v36, %v6781_v6  ;;  %2480 = vmatmul.mubr.bf16.gmra.mrb[12].mxu0 %v2269_v40  ;;  %v8008_v4 = vld [vmem:[#allocation23_spill] sm:$0xff] }
 0x267   : > { %v1605_v45 = vpop.permute.xlu0 %1604  ;;  %v6808_v7 = vpop.eup %4721  ;;  %4741 = vpow2.f32 %v1730_v26  ;;  %v1676_v15 = vsub.f32 %v8008_v4, %v1600_v1  ;;  %v1677_v29 = vsub.f32 %v8009_v47, %v1600_v1  ;;  %v2286_v3 = vpack.c.bf16 %v6803_v53, %v6786_v44 }
 0x268   : > { %v1678_v37 = vsub.f32 %v8010_v38, %v1605_v45  ;;  %v6813_v31 = vpop.eup %4723  ;;  %4743 = vpow2.f32 %v1732_v46  ;;  %v1679_v30 = vsub.f32 %v8011_v2, %v1605_v45  ;;  %1903 = vadd.xlane.f32.xlu1 %v1902_v20  ;;  %v8012_v45 = vld [vmem:[#allocation18_spill] sm:$0xff]  ;;  %v8013_v2 = vld [vmem:[#allocation60_spill] sm:$0xff] }
 0x269   : > { %v4726_v55 = vpop.eup %4725  ;;  %4745 = vpow2.f32 %v1734_v19  ;;  %v1794_v39 = vmul.f32 1.442695, %v1676_v15  ;;  %v1796_v32 = vmul.f32 1.442695, %v1677_v29  ;;  %2543 = vmatprep.mubr.bf16.mxu1 %v2286_v3  ;;  %v8014_v19 = vld [vmem:[#allocation19_spill] sm:$0xff] }
 0x26a   : > { %v1798_v40 = vmul.f32 1.442695, %v1678_v37  ;;  %v4728_v26 = vpop.eup %4727  ;;  %4747 = vpow2.f32 %v1736_v57  ;;  %v1800_v4 = vmul.f32 1.442695, %v1679_v30  ;;  %v1530_v1 = vpop.permute.xlu1 %1529  ;;  %v2271_v38 = vpack.c.bf16 %v4726_v55, %v6794_v33  ;;  %2544 = vmatmul.mubr.bf16.gmra.mrb[12].mxu1 %v2285_v49  ;;  %v8015_v37 = vld [vmem:[#allocation61_spill] sm:$0xff] }
 0x26b   : > { %v6819_v46 = vpop.eup %4729  ;;  %4749 = vpow2.f32 %v1794_v39  ;;  %v1648_v20 = vsub.f32 %v8012_v45, %v1530_v1  ;;  %v1649_v22 = vsub.f32 %v8013_v2, %v1530_v1  ;;  %v1905_v30 = vadd.f32 %v4728_v26, %v4726_v55 }
 0x26c   : > { %v1535_v47 = vpop.permute.xlu0 %1534  ;;  %v4732_v29 = vpop.eup %4731  ;;  %4751 = vpow2.f32 %v1796_v32  ;;  %v2272_v3 = vpack.c.bf16 %v4728_v26, %v4716_v48  ;;  %v8016_v48 = vld [vmem:[#allocation22_spill] sm:$0xff] }
 0x26d   : > { %v1650_v15 = vsub.f32 %v8014_v19, %v1535_v47  ;;  %v1651_v57 = vsub.f32 %v8015_v37, %v1535_v47  ;;  %v6825_v35 = vpop.eup %4733  ;;  %4753 = vpow2.f32 %v1798_v40  ;;  %v1738_v33 = vmul.f32 1.442695, %v1648_v20  ;;  %1906 = vadd.xlane.f32.xlu0 %v1905_v30  ;;  %v8017_v40 = vld [vmem:[#allocation62_spill] sm:$0xff]  ;;  %v8018_v37 = vld [vmem:[#allocation63_spill] sm:$0xff]  ;;  %v8019_v30 = vld [vmem:[#allocation64_spill] sm:$0xff] }
 0x26e   : > { %v1740_v58 = vmul.f32 1.442695, %v1649_v22  ;;  %v6827_v39 = vpop.eup %4735  ;;  %4755 = vpow2.f32 %v1800_v4  ;;  %2487 = vmatprep.mubr.bf16.mxu0 %v2272_v3  ;;  %v1908_v1 = vadd.f32 %v4732_v29, %v6819_v46  ;;  %v2287_v22 = vpack.c.bf16 %v6825_v35, %v6808_v7 }
 0x26f   : > { %v1742_v41 = vmul.f32 1.442695, %v1650_v15  ;;  %v1744_v49 = vmul.f32 1.442695, %v1651_v57  ;;  %v1610_v45 = vpop.permute.xlu1 %1609  ;;  %v6830_v2 = vpop.eup %4737  ;;  %4757 = vpow2.f32 %v1738_v33  ;;  %2488 = vmatmul.mubr.bf16.gmra.mrb[16].mxu0 %v2271_v38  ;;  %v2288_v4 = vpack.c.bf16 %v6827_v39, %v6813_v31 }
 0x270   : > { %v1615_v32 = vpop.permute.xlu0 %1614  ;;  %v1680_v55 = vsub.f32 %v8016_v48, %v1610_v45  ;;  %v1681_v26 = vsub.f32 %v8017_v40, %v1610_v45  ;;  %v6836_v47 = vpop.eup %4739  ;;  %4759 = vpow2.f32 %v1740_v58  ;;  %1909 = vadd.xlane.f32.xlu1 %v1908_v1  ;;  %v8020_v58 = vld [vmem:[#allocation65_spill] sm:$0xff]  ;;  %v8021_v48 = vld [vmem:[#allocation66_spill] sm:$0xff] }
 0x271   : > { %v4742_v20 = vpop.eup %4741  ;;  %4761 = vpow2.f32 %v1742_v41  ;;  %v1682_v38 = vsub.f32 %v8018_v37, %v1615_v32  ;;  %v1683_v3 = vsub.f32 %v8019_v30, %v1615_v32  ;;  %2551 = vmatprep.mubr.bf16.mxu1 %v2288_v4 }
 0x272   : > { %v1802_v19 = vmul.f32 1.442695, %v1680_v55  ;;  %v1804_v15 = vmul.f32 1.442695, %v1681_v26  ;;  %v4744_v57 = vpop.eup %4743  ;;  %4763 = vpow2.f32 %v1744_v49  ;;  %2552 = vmatmul.mubr.bf16.gmra.mrb[16].mxu1 %v2287_v22  ;;  %v2273_v43 = vpack.c.bf16 %v4742_v20, %v6819_v46  ;;  %v8022_v46 = vld [vmem:[#allocation67_spill] sm:$0xff] }
 0x273   : > { %v1540_v33 = vpop.permute.xlu1 %1539  ;;  %v4746_v45 = vpop.eup %4745  ;;  %v1911_v55 = vadd.f32 %v4744_v57, %v4742_v20  ;;  %v2274_v26 = vpack.c.bf16 %v4744_v57, %v4732_v29  ;;  %v1806_v49 = vmul.f32 1.442695, %v1682_v38  ;;  %v8023_v29 = vld [vmem:[#allocation68_spill] sm:$0xff] }
 0x274   : > { %4765 = vpow2.f32 %v1802_v19  ;;  %v1652_v1 = vsub.f32 %v8020_v58, %v1540_v33  ;;  %v1653_v40 = vsub.f32 %v8021_v48, %v1540_v33  ;;  %v4748_v41 = vpop.eup %4747  ;;  %v1808_v19 = vmul.f32 1.442695, %v1683_v3 }
 0x275   : > { %4767 = vpow2.f32 %v1804_v15  ;;  %v6845_v37 = vpop.eup %4749  ;;  %v1914_v4 = vadd.f32 %v4748_v41, %v4746_v45  ;;  %1912 = vadd.xlane.f32.xlu0 %v1911_v55  ;;  %2495 = vmatprep.mubr.bf16.mxu0 %v2274_v26 }
 0x276   : > { %v1746_v23 = vmul.f32 1.442695, %v1652_v1  ;;  %v1748_v32 = vmul.f32 1.442695, %v1653_v40  ;;  %v6847_v30 = vpop.eup %4751  ;;  %v2289_v38 = vpack.c.bf16 %v6845_v37, %v6830_v2 }
 0x277   : > { %v1620_v22 = vpop.permute.xlu1 %1619  ;;  %v6849_v58 = vpop.eup %4753  ;;  %1915 = vadd.xlane.f32.xlu1 %v1914_v4  ;;  %2496 = vmatmul.mubr.bf16.gmra.mrb[20].mxu0 %v2273_v43  ;;  %v2290_v3 = vpack.c.bf16 %v6847_v30, %v6836_v47 }
 0x278   : > { %4769 = vpow2.f32 %v1746_v23  ;;  %v1684_v20 = vsub.f32 %v8022_v46, %v1620_v22  ;;  %v1685_v15 = vsub.f32 %v8023_v29, %v1620_v22  ;;  %v6855_v57 = vpop.eup %4755  ;;  %v6864_v29 = vpop.permute.xlu0 %2078 }
 0x279   : > { %4771 = vpow2.f32 %v1748_v32  ;;  %v4758_v33 = vpop.eup %4757  ;;  %2559 = vmatprep.mubr.bf16.mxu1 %v2290_v3 }
 0x27a   : > { %4773 = vpow2.f32 %v1806_v49  ;;  %v1810_v1 = vmul.f32 1.442695, %v1684_v20  ;;  %v1812_v48 = vmul.f32 1.442695, %v1685_v15  ;;  %v4760_v23 = vpop.eup %4759  ;;  %2560 = vmatmul.mubr.bf16.gmra.mrb[20].mxu1 %v2289_v38  ;;  %v2275_v55 = vpack.c.bf16 %v4758_v33, %v4746_v45 }
 0x27b   : > { %4775 = vpow2.f32 %v1808_v19  ;;  %v4762_v43 = vpop.eup %4761  ;;  %v1917_v40 = vadd.f32 %v4760_v23, %v4758_v33  ;;  %v2276_v4 = vpack.c.bf16 %v4760_v23, %v4748_v41  ;;  %v1926_v45 = vadd.f32 %v6720_v52, %v6715_v56 }
 0x27c   : > { %4777 = vpow2.f32 %v1810_v1  ;;  %v4764_v26 = vpop.eup %4763  ;;  %v1932_v23 = vadd.f32 %v6729_v5, %v6724_v24  ;;  %v1935_v24 = vadd.f32 %v6747_v34, %v6745_v25  ;;  %v1947_v34 = vadd.f32 %v6803_v53, %v6801_v36 }
 0x27d   : > { %4779 = vpow2.f32 %v1812_v48  ;;  %1918 = vadd.xlane.f32.xlu0 %v1917_v40  ;;  %v1920_v32 = vadd.f32 %v4764_v26, %v4762_v43  ;;  %2503 = vmatprep.mubr.bf16.mxu0 %v2276_v4  ;;  %v1944_v4 = vadd.f32 %v6786_v44, %v6781_v6  ;;  %v1956_v25 = vadd.f32 %v6836_v47, %v6830_v2 }
 0x27e   : > { %v6859_v22 = vpop.eup %4765  ;;  %v1962_v44 = vadd.f32 %v6855_v57, %v6849_v58  ;;  %v1959_v36 = vadd.f32 %v6847_v30, %v6845_v37 }
 0x27f   : > { %v4768_v46 = vpop.eup %4767  ;;  %1921 = vadd.xlane.f32.xlu1 %v1920_v32  ;;  %2504 = vmatmul.mubr.bf16.gmra.mrb[24].mxu0 %v2275_v55  ;;  %v2291_v19 = vpack.c.bf16 %v6859_v22, %v6849_v58  ;;  %v6870_v55 = vpop.permute.xlu0 %2093 }
 0x280   : > { %v2292_v49 = vpack.c.bf16 %v4768_v46, %v6855_v57  ;;  %v1965_v2 = vadd.f32 %v4768_v46, %v6859_v22 }
 0x282   : > { %v4770_v20 = vpop.eup %4769  ;;  %2567 = vmatprep.mubr.bf16.mxu1 %v2292_v49  ;;  %v8025_v49 = vsub.f32 %v6490_v62, %v6504_v17 }
 0x283   : > { %v4772_v41 = vpop.eup %4771  ;;  %1927 = vadd.xlane.f32.xlu1 %v1926_v45  ;;  %2568 = vmatmul.mubr.bf16.gmra.mrb[24].mxu1 %v2291_v19  ;;  %v2277_v3 = vpack.c.bf16 %v4770_v20, %v4762_v43  ;;  %v1938_v43 = vadd.f32 %v6756_v8, %v6751_v21  ;;  %v6879_v5 = vpop.permute.xlu0 %2103  ;;  %v1950_v21 = vadd.f32 %v6813_v31, %v6808_v7 }
 0x284   : > { %v4774_v15 = vpop.eup %4773  ;;  %v1923_v38 = vadd.f32 %v4772_v41, %v4770_v20  ;;  %v2278_v1 = vpack.c.bf16 %v4772_v41, %v4764_v26  ;;  %v6875_v26 = vpop.permute.xlu1 %2073  ;;  %v1458_v22 = vmul.f32 1.442695, %v8025_v49 }
 0x285   : > { %v4776_v33 = vpop.eup %4775 }
 0x286   : > { %v4778_v48 = vpop.eup %4777  ;;  %1924 = vadd.xlane.f32.xlu0 %v1923_v38  ;;  %2511 = vmatprep.mubr.bf16.mxu0 %v2278_v1  ;;  %v1968_v7 = vadd.f32 %v4776_v33, %v4774_v15 }
 0x287   : > { %v4780_v40 = vpop.eup %4779  ;;  %1933 = vadd.xlane.f32.xlu1 %v1932_v23  ;;  %2512 = vmatmul.mubr.bf16.gmra.mrb[28].mxu0 %v2277_v3  ;;  %v2293_v52 = vpack.c.bf16 %v4778_v48, %v4774_v15  ;;  %v6889_v8 = vpop.permute.xlu0 %2113 }
 0x288   : > { %v2294_v56 = vpack.c.bf16 %v4780_v40, %v4776_v33  ;;  %v6885_v32 = vpop.permute.xlu1 %2083  ;;  %v1971_v58 = vadd.f32 %v4780_v40, %v4778_v48  ;;  %v1814_v48 = vld [vmem:[#allocation3] sm:$0xff] }
 0x289   : > { %v1846_v40 = vmul.f32 %v6555_v0, %v1814_v48 }
 0x28a   : > { %1930 = vadd.xlane.f32.xlu0 %v6733_v63  ;;  %2575 = vmatprep.mubr.bf16.mxu1 %v2294_v56  ;;  %v1941_v63 = vadd.f32 %v6777_v59, %v6775_v27  ;;  %v1953_v27 = vadd.f32 %v6827_v39, %v6825_v35  ;;  %v8024_v35 = vsub.f32 %v6531_v61, %v6542_v9 }
 0x28b   : > { %1939 = vadd.xlane.f32.xlu1 %v1938_v43  ;;  %2576 = vmatmul.mubr.bf16.gmra.mrb[28].mxu1 %v2293_v52  ;;  %v6899_v59 = vpop.permute.xlu0 %2123  ;;  %v1816_v52 = vld [vmem:[#allocation3 + $0x10] sm:$0xff] }
 0x28c   : > { %v6895_v6 = vpop.permute.xlu1 %2088  ;;  %v1460_v39 = vmul.f32 1.442695, %v8024_v35 }
 0x28e   : > { %1936 = vadd.xlane.f32.xlu0 %v1935_v24  ;;  %4781 = vpow2.f32 %v1460_v39  ;;  %v1848_v24 = vmul.f32 %v6563_v16, %v1816_v52  ;;  %v1818_v39 = vld [vmem:[#allocation3 + $0x20] sm:$0xff] }
 0x28f   : > { %1945 = vadd.xlane.f32.xlu1 %v1944_v4  ;;  %v6907_v31 = vpop.permute.xlu0 %2133  ;;  %4783 = vpow2.f32 %v1458_v22 }
 0x290   : > { %v6905_v53 = vpop.permute.xlu1 %2098 }
 0x292   : > { %1942 = vadd.xlane.f32.xlu0 %v1941_v63 }
 0x293   : > { %1951 = vadd.xlane.f32.xlu1 %v1950_v21  ;;  %v6915_v57 = vpop.permute.xlu0 %2143 }
 0x294   : > { %v6913_v47 = vpop.permute.xlu1 %2108 }
 0x296   : > { %1948 = vadd.xlane.f32.xlu0 %v1947_v34 }
 0x297   : > { %1957 = vadd.xlane.f32.xlu1 %v1956_v25  ;;  %v6919_v30 = vpop.permute.xlu0 %2153  ;;  %v1817_v25 = vld [vmem:[#allocation3 + $0x18] sm:$0xff] }
 0x298   : > { %v6917_v37 = vpop.permute.xlu1 %2118  ;;  %v6926_v61 = vpop.eup %4781 }
 0x299   : > { %v6935_v45 = vpop.eup %4783 }
 0x29a   : > { %1954 = vadd.xlane.f32.xlu0 %v1953_v27  ;;  %v1849_v27 = vmul.f32 %v6574_v54, %v1817_v25  ;;  %v1850_v54 = vmul.f32 %v6544_v14, %v1818_v39 }
 0x29b   : > { %1963 = vadd.xlane.f32.xlu1 %v1962_v44  ;;  %v6929_v9 = vpop.permute.xlu0 %2163 }
 0x29c   : > { %v6924_v46 = vpop.permute.xlu1 %2128 }
 0x29e   : > { %1960 = vadd.xlane.f32.xlu0 %v1959_v36 }
 0x29f   : > { %1969 = vadd.xlane.f32.xlu1 %v1968_v7  ;;  %v6933_v20 = vpop.permute.xlu0 %2173  ;;  %v1815_v7 = vld [vmem:[#allocation3 + $0x8] sm:$0xff] }
 0x2a0   : > { %v6931_v19 = vpop.permute.xlu1 %2138  ;;  %v1847_v16 = vmul.f32 %v6529_v10, %v1815_v7  ;;  %v1823_v7 = vld [vmem:[#allocation3 + $0x48] sm:$0xff] }
 0x2a2   : > { %1966 = vadd.xlane.f32.xlu0 %v1965_v2  ;;  %v1819_v2 = vld [vmem:[#allocation3 + $0x28] sm:$0xff] }
 0x2a3   : > { %v6940_v62 = vpop.permute.xlu0 %2183  ;;  %v1851_v49 = vmul.f32 %v6585_v18, %v1819_v2 }
 0x2a4   : > { %v6937_v41 = vpop.permute.xlu1 %2148 }
 0x2a6   : > { %1972 = vadd.xlane.f32.xlu0 %v1971_v58 }
 0x2a7   : > { %v6944_v15 = vpop.permute.xlu0 %2193 }
 0x2a8   : > { %v6942_v17 = vpop.permute.xlu1 %2158 }
 0x2ab   : > { %v6948_v3 = vpop.permute.xlu0 %2203 }
 0x2ac   : > { %v6946_v38 = vpop.permute.xlu1 %2168 }
 0x2af   : > { %v6952_v1 = vpop.permute.xlu0 %2213 }
 0x2b0   : > { %2228 = vperm.xlu1 %4576, %v6926_v61   ;;  %v6950_v33 = vpop.permute.xlu1 %2178 }
 0x2b4   : > { %v6954_v23 = vpop.permute.xlu1 %2188 }
 0x2b8   : > { %v6959_v63 = vpop.permute.xlu1 %2198 }
 0x2bc   : > { %2223 = vperm.xlu0 %4575, %v6935_v45   ;;  %v6962_v34 = vpop.permute.xlu1 %2208 }
 0x2c0   : > { %v6965_v0 = vpop.permute.xlu1 %2218 }
 0x2d5   : > { %v1880_v56 = vpop.xlane.xlu0 %1879 }
 0x2d6   : > { %v1974_v43 = vadd.f32 %v1880_v56, %v1846_v40  ;;  %v1820_v56 = vld [vmem:[#allocation3 + $0x30] sm:$0xff] }
 0x2d7   : > { %v1852_v10 = vmul.f32 %v6557_v28, %v1820_v56  ;;  %v1824_v28 = vld [vmem:[#allocation3 + $0x50] sm:$0xff] }
 0x2d8   : > { %2007 = vst.msk [vmem:[#allocation3] sm:$0xff] %vm2006_vm1, %v1974_v43  ;;  %v1821_v43 = vld [vmem:[#allocation3 + $0x38] sm:$0xff] }
 0x2d9   : > { %v1886_v4 = vpop.xlane.xlu0 %1885  ;;  %v1853_v18 = vmul.f32 %v6598_v51, %v1821_v43 }
 0x2da   : > { %v1976_v21 = vadd.f32 %v1886_v4, %v1848_v24 }
 0x2dc   : > { %2009 = vst.msk [vmem:[#allocation3 + $0x10] sm:$0xff] %vm2006_vm1, %v1976_v21  ;;  %v1822_v21 = vld [vmem:[#allocation3 + $0x40] sm:$0xff] }
 0x2df   : > { %v1889_v44 = vpop.xlane.xlu0 %1888 }
 0x2e0   : > { %v1977_v36 = vadd.f32 %v1889_v44, %v1849_v27  ;;  %v1854_v27 = vmul.f32 %v6565_v11, %v1822_v21  ;;  %v1826_v11 = vld [vmem:[#allocation3 + $0x60] sm:$0xff] }
 0x2e2   : > { %2010 = vst.msk [vmem:[#allocation3 + $0x18] sm:$0xff] %vm2006_vm1, %v1977_v36 }
 0x2e8   : > { %v1895_v22 = vpop.xlane.xlu0 %1894 }
 0x2e9   : > { %v1883_v35 = vpop.xlane.xlu1 %1882  ;;  %v1979_v48 = vadd.f32 %v1895_v22, %v1851_v49  ;;  %v1825_v49 = vld [vmem:[#allocation3 + $0x58] sm:$0xff] }
 0x2ea   : > { %v1975_v58 = vadd.f32 %v1883_v35, %v1847_v16  ;;  %v1855_v16 = vmul.f32 %v6608_v12, %v1823_v7  ;;  %v1856_v35 = vmul.f32 %v6576_v60, %v1824_v28  ;;  %v1857_v22 = vmul.f32 %v6619_v13, %v1825_v49  ;;  %v2040_v60 = vld [vmem:[#allocation4 + $0x8] sm:$0xff]  ;;  %v8026_v28 = vld [vmem:[#allocation69_spill] sm:$0xff] }
 0x2eb   : > { %2012 = vst.msk [vmem:[#allocation3 + $0x28] sm:$0xff] %vm2006_vm1, %v1979_v48 }
 0x2ec   : > { %2008 = vst.msk [vmem:[#allocation3 + $0x8] sm:$0xff] %vm2006_vm1, %v1975_v58 }
 0x2ed   : > { %v1892_v40 = vpop.xlane.xlu1 %1891 }
 0x2ee   : > { %v1978_v52 = vadd.f32 %v1892_v40, %v1850_v54  ;;  %v1858_v54 = vmul.f32 %v6587_v50, %v1826_v11  ;;  %v2039_v40 = vld [vmem:[#allocation4] sm:$0xff]  ;;  %v2232_v50 = vmul.f32 %v6864_v29, %v2040_v60  ;;  %v8027_v29 = vld [vmem:[#allocation70_spill] sm:$0xff]  ;;  %v1832_v11 = vld [vmem:[#allocation3 + $0x90] sm:$0xff] }
 0x2ef   : > { %v1834_v60 = vld [vmem:[#allocation3 + $0xa0] sm:$0xff] }
 0x2f0   : > { %2011 = vst.msk [vmem:[#allocation3 + $0x20] sm:$0xff] %vm2006_vm1, %v1978_v52 }
 0x2f1   : > { %v1898_v24 = vpop.xlane.xlu1 %1897  ;;  %v1901_v25 = vpop.xlane.xlu0 %1900 }
 0x2f2   : > { %v1980_v4 = vadd.f32 %v1898_v24, %v1852_v10  ;;  %v1981_v14 = vadd.f32 %v1901_v25, %v1853_v18  ;;  %v1827_v24 = vld [vmem:[#allocation3 + $0x68] sm:$0xff]  ;;  %v1828_v25 = vld [vmem:[#allocation3 + $0x70] sm:$0xff] }
 0x2f4   : > { %2013 = vst.msk [vmem:[#allocation3 + $0x30] sm:$0xff] %vm2006_vm1, %v1980_v4  ;;  %2014 = vst.msk [vmem:[#allocation3 + $0x38] sm:$0xff] %vm2006_vm1, %v1981_v14  ;;  %v2231_v4 = vmul.f32 %v6875_v26, %v2039_v40  ;;  %v1830_v26 = vld [vmem:[#allocation3 + $0x80] sm:$0xff]  ;;  %v1831_v40 = vld [vmem:[#allocation3 + $0x88] sm:$0xff] }
 0x2f5   : > { %v1904_v44 = vpop.xlane.xlu1 %1903 }
 0x2f6   : > { %v1982_v36 = vadd.f32 %v1904_v44, %v1854_v27  ;;  %v1859_v44 = vmul.f32 %v6630_v42, %v1827_v24  ;;  %v8030_v24 = vld [vmem:[#allocation7_spill] sm:$0xff] }
 0x2f8   : > { %2015 = vst.msk [vmem:[#allocation3 + $0x40] sm:$0xff] %vm2006_vm1, %v1982_v36 }
 0x2fa   : > { %v1907_v2 = vpop.xlane.xlu0 %1906 }
 0x2fb   : > { %v1983_v51 = vadd.f32 %v1907_v2, %v1855_v16  ;;  %v4259_v10 = vpop.f32.mrb[0].mxu0  ;;  %v1860_v16 = vmul.f32 %v8026_v28, %v1828_v25 }
 0x2fc   : > { %v4260_v43 = vpop.f32.mrb[1].mxu0 }
 0x2fd   : > { %v1910_v39 = vpop.xlane.xlu1 %1909  ;;  %2016 = vst.msk [vmem:[#allocation3 + $0x48] sm:$0xff] %vm2006_vm1, %v1983_v51  ;;  %v4261_v21 = vadd.f32 %v4260_v43, %v4259_v10  ;;  %v4262_v18 = vpop.f32.mrb[2].mxu0 }
 0x2fe   : > { %v1984_v58 = vadd.f32 %v1910_v39, %v1856_v35  ;;  %v4263_v13 = vpop.f32.mrb[3].mxu0  ;;  %v1829_v39 = vld [vmem:[#allocation3 + $0x78] sm:$0xff] }
 0x2ff   : > { %v2584_v14 = vadd.f32 %v4261_v21, %v2231_v4  ;;  %v4264_v27 = vadd.f32 %v4263_v13, %v4262_v18  ;;  %v1863_v4 = vmul.f32 %v8030_v24, %v1831_v40  ;;  %v1833_v18 = vld [vmem:[#allocation3 + $0x98] sm:$0xff]  ;;  %v8031_v13 = vld [vmem:[#allocation72_spill] sm:$0xff] }
 0x300   : > { %2017 = vst.msk [vmem:[#allocation3 + $0x50] sm:$0xff] %vm2006_vm1, %v1984_v58  ;;  %v1862_v58 = vmul.f32 %v8027_v29, %v1830_v26  ;;  %v1866_v25 = vmul.f32 %v8031_v13, %v1834_v60  ;;  %v8037_v24 = vld [vmem:[#allocation10_spill] sm:$0xff]  ;;  %v1842_v13 = vld [vmem:[#allocation3 + $0xe0] sm:$0xff] }
 0x301   : > { %2616 = vst [vmem:[#allocation4] sm:$0xff] %v2584_v14  ;;  %v2585_v7 = vadd.f32 %v4264_v27, %v2232_v50  ;;  %v1836_v27 = vld [vmem:[#allocation3 + $0xb0] sm:$0xff] }
 0x302   : > { %v1913_v48 = vpop.xlane.xlu0 %1912 }
 0x303   : > { %v1985_v12 = vadd.f32 %v1913_v48, %v1857_v22  ;;  %2617 = vst [vmem:[#allocation4 + $0x8] sm:$0xff] %v2585_v7  ;;  %v8028_v22 = vld [vmem:[#allocation74_spill] sm:$0xff] }
 0x304   : > { %v1916_v56 = vpop.xlane.xlu1 %1915 }
 0x305   : > { %v1986_v52 = vadd.f32 %v1916_v56, %v1858_v54  ;;  %2018 = vst.msk [vmem:[#allocation3 + $0x58] sm:$0xff] %vm2006_vm1, %v1985_v12  ;;  %v1861_v54 = vmul.f32 %v8028_v22, %v1829_v39  ;;  %v8029_v56 = vld [vmem:[#allocation71_spill] sm:$0xff]  ;;  %v8035_v22 = vld [vmem:[#allocation8_spill] sm:$0xff] }
 0x306   : > { %v1864_v12 = vmul.f32 %v8029_v56, %v1832_v11  ;;  %v1838_v39 = vld [vmem:[#allocation3 + $0xc0] sm:$0xff]  ;;  %v1840_v56 = vld [vmem:[#allocation3 + $0xd0] sm:$0xff] }
 0x307   : > { %2019 = vst.msk [vmem:[#allocation3 + $0x60] sm:$0xff] %vm2006_vm1, %v1986_v52 }
 0x30a   : > { %v1919_v36 = vpop.xlane.xlu0 %1918 }
 0x30b   : > { %v1987_v2 = vadd.f32 %v1919_v36, %v1859_v44  ;;  %v8032_v36 = vld [vmem:[#allocation9_spill] sm:$0xff] }
 0x30c   : > { %v1922_v35 = vpop.xlane.xlu1 %1921  ;;  %v1865_v7 = vmul.f32 %v8032_v36, %v1833_v18 }
 0x30d   : > { %v1988_v51 = vadd.f32 %v1922_v35, %v1860_v16  ;;  %2020 = vst.msk [vmem:[#allocation3 + $0x68] sm:$0xff] %vm2006_vm1, %v1987_v2  ;;  %v1835_v16 = vld [vmem:[#allocation3 + $0xa8] sm:$0xff]  ;;  %v8033_v2 = vld [vmem:[#allocation73_spill] sm:$0xff] }
 0x30e   : > { %v1868_v35 = vmul.f32 %v8033_v2, %v1836_v27  ;;  %v8039_v2 = vld [vmem:[#allocation76_spill] sm:$0xff] }
 0x30f   : > { %2021 = vst.msk [vmem:[#allocation3 + $0x70] sm:$0xff] %vm2006_vm1, %v1988_v51 }
 0x310   : > { %v1928_v49 = vpop.xlane.xlu1 %1927 }
 0x311   : > { %v1990_v42 = vadd.f32 %v1928_v49, %v1862_v58  ;;  %v8034_v58 = vld [vmem:[#allocation75_spill] sm:$0xff] }
 0x312   : > { %v1867_v49 = vmul.f32 %v8034_v58, %v1835_v16 }
 0x313   : > { %v1925_v48 = vpop.xlane.xlu0 %1924  ;;  %2023 = vst.msk [vmem:[#allocation3 + $0x80] sm:$0xff] %vm2006_vm1, %v1990_v42  ;;  %v1837_v42 = vld [vmem:[#allocation3 + $0xb8] sm:$0xff] }
 0x314   : > { %v1989_v52 = vadd.f32 %v1925_v48, %v1861_v54  ;;  %v1934_v10 = vpop.xlane.xlu1 %1933  ;;  %v1870_v54 = vmul.f32 %v8035_v22, %v1838_v39 }
 0x315   : > { %v1992_v43 = vadd.f32 %v1934_v10, %v1864_v12 }
 0x316   : > { %2022 = vst.msk [vmem:[#allocation3 + $0x78] sm:$0xff] %vm2006_vm1, %v1989_v52  ;;  %v8036_v52 = vld [vmem:[#allocation77_spill] sm:$0xff] }
 0x317   : > { %v1931_v21 = vpop.xlane.xlu0 %1930  ;;  %2025 = vst.msk [vmem:[#allocation3 + $0x90] sm:$0xff] %vm2006_vm1, %v1992_v43  ;;  %v1869_v10 = vmul.f32 %v8036_v52, %v1837_v42  ;;  %v1839_v43 = vld [vmem:[#allocation3 + $0xc8] sm:$0xff] }
 0x318   : > { %v1991_v50 = vadd.f32 %v1931_v21, %v1863_v4  ;;  %v1940_v14 = vpop.xlane.xlu1 %1939  ;;  %v1872_v4 = vmul.f32 %v8037_v24, %v1840_v56 }
 0x319   : > { %v1994_v44 = vadd.f32 %v1940_v14, %v1866_v25  ;;  %v2055_v25 = vld [vmem:[#allocation4 + $0x80] sm:$0xff]  ;;  %v8038_v14 = vld [vmem:[#allocation78_spill] sm:$0xff] }
 0x31a   : > { %2024 = vst.msk [vmem:[#allocation3 + $0x88] sm:$0xff] %vm2006_vm1, %v1991_v50  ;;  %v1871_v27 = vmul.f32 %v8038_v14, %v1839_v43  ;;  %v2042_v43 = vld [vmem:[#allocation4 + $0x18] sm:$0xff] }
 0x31b   : > { %v1937_v28 = vpop.xlane.xlu0 %1936  ;;  %2027 = vst.msk [vmem:[#allocation3 + $0xa0] sm:$0xff] %vm2006_vm1, %v1994_v44 }
 0x31c   : > { %v1993_v26 = vadd.f32 %v1937_v28, %v1865_v7  ;;  %v1946_v51 = vpop.xlane.xlu1 %1945  ;;  %v1841_v7 = vld [vmem:[#allocation3 + $0xd8] sm:$0xff]  ;;  %v2056_v28 = vld [vmem:[#allocation4 + $0x88] sm:$0xff] }
 0x31d   : > { %v1996_v29 = vadd.f32 %v1946_v51, %v1868_v35  ;;  %v1874_v35 = vmul.f32 %v8039_v2, %v1842_v13  ;;  %v2247_v51 = vmul.f32 %v6919_v30, %v2055_v25 }
 0x31e   : > { %2026 = vst.msk [vmem:[#allocation3 + $0x98] sm:$0xff] %vm2006_vm1, %v1993_v26 }
 0x31f   : > { %v1943_v11 = vpop.xlane.xlu0 %1942  ;;  %2029 = vst.msk [vmem:[#allocation3 + $0xb0] sm:$0xff] %vm2006_vm1, %v1996_v29 }
 0x320   : > { %v1995_v48 = vadd.f32 %v1943_v11, %v1867_v49  ;;  %v1952_v40 = vpop.xlane.xlu1 %1951  ;;  %v4307_v44 = vpop.f32.mrb[0].mxu1  ;;  %v1844_v49 = vld [vmem:[#allocation3 + $0xf0] sm:$0xff] }
 0x321   : > { %v1998_v12 = vadd.f32 %v1952_v40, %v1870_v54  ;;  %v4308_v16 = vpop.f32.mrb[1].mxu1  ;;  %v2041_v11 = vld [vmem:[#allocation4 + $0x10] sm:$0xff]  ;;  %v8040_v54 = vld [vmem:[#allocation79_spill] sm:$0xff]  ;;  %v2248_v40 = vmul.f32 %v6942_v17, %v2056_v28  ;;  %v1876_v24 = vmul.f32 %v6935_v45, %v1844_v49 }
 0x322   : > { %2028 = vst.msk [vmem:[#allocation3 + $0xa8] sm:$0xff] %vm2006_vm1, %v1995_v48  ;;  %v4309_v39 = vadd.f32 %v4308_v16, %v4307_v44  ;;  %v4310_v58 = vpop.f32.mrb[2].mxu1  ;;  %v1873_v48 = vmul.f32 %v8040_v54, %v1841_v7  ;;  %v2057_v17 = vld [vmem:[#allocation4 + $0x90] sm:$0xff]  ;;  %v8041_v44 = vld [vmem:[#allocation12_spill] sm:$0xff]  ;;  %v2234_v7 = vmul.f32 %v6895_v6, %v2042_v43 }
 0x323   : > { %v1949_v60 = vpop.xlane.xlu0 %1948  ;;  %2031 = vst.msk [vmem:[#allocation3 + $0xc0] sm:$0xff] %vm2006_vm1, %v1998_v12  ;;  %v4311_v22 = vpop.f32.mrb[3].mxu1 }
 0x324   : > { %v1997_v21 = vadd.f32 %v1949_v60, %v1869_v10  ;;  %v1958_v18 = vpop.xlane.xlu1 %1957  ;;  %v2600_v56 = vadd.f32 %v4309_v39, %v2247_v51  ;;  %v4312_v12 = vadd.f32 %v4311_v22, %v4310_v58  ;;  %v1843_v60 = vld [vmem:[#allocation3 + $0xe8] sm:$0xff]  ;;  %v2249_v39 = vmul.f32 %v6929_v9, %v2057_v17 }
 0x325   : > { %v2000_v50 = vadd.f32 %v1958_v18, %v1872_v4 }
 0x326   : > { %2030 = vst.msk [vmem:[#allocation3 + $0xb8] sm:$0xff] %vm2006_vm1, %v1997_v21  ;;  %v4265_v52 = vpop.f32.mrb[4].mxu0  ;;  %v2233_v21 = vmul.f32 %v6885_v32, %v2041_v11  ;;  %2632 = vst [vmem:[#allocation4 + $0x80] sm:$0xff] %v2600_v56  ;;  %v2601_v18 = vadd.f32 %v4312_v12, %v2248_v40  ;;  %v1845_v32 = vld [vmem:[#allocation3 + $0xf8] sm:$0xff]  ;;  %v2043_v11 = vld [vmem:[#allocation4 + $0x20] sm:$0xff] }
 0x327   : > { %v1955_v36 = vpop.xlane.xlu0 %1954  ;;  %2033 = vst.msk [vmem:[#allocation3 + $0xd0] sm:$0xff] %vm2006_vm1, %v2000_v50  ;;  %v4266_v30 = vpop.f32.mrb[5].mxu0  ;;  %v2044_v12 = vld [vmem:[#allocation4 + $0x28] sm:$0xff] }
 0x328   : > { %v1999_v26 = vadd.f32 %v1955_v36, %v1871_v27  ;;  %v1964_v29 = vpop.xlane.xlu1 %1963  ;;  %v4267_v13 = vadd.f32 %v4266_v30, %v4265_v52  ;;  %v4268_v50 = vpop.f32.mrb[6].mxu0  ;;  %v1875_v36 = vmul.f32 %v8041_v44, %v1843_v60  ;;  %2633 = vst [vmem:[#allocation4 + $0x88] sm:$0xff] %v2601_v18 }
 0x329   : > { %v2002_v42 = vadd.f32 %v1964_v29, %v1874_v35  ;;  %v4269_v27 = vpop.f32.mrb[7].mxu0  ;;  %v4313_v16 = vpop.f32.mrb[4].mxu1  ;;  %v2058_v35 = vld [vmem:[#allocation4 + $0x98] sm:$0xff] }
 0x32a   : > { %2032 = vst.msk [vmem:[#allocation3 + $0xc8] sm:$0xff] %vm2006_vm1, %v1999_v26  ;;  %v2586_v28 = vadd.f32 %v4267_v13, %v2233_v21  ;;  %v4270_v45 = vadd.f32 %v4269_v27, %v4268_v50  ;;  %v4314_v26 = vpop.f32.mrb[5].mxu1  ;;  %v2250_v22 = vmul.f32 %v6946_v38, %v2058_v35  ;;  %v2236_v38 = vmul.f32 %v6905_v53, %v2044_v12  ;;  %v2060_v13 = vld [vmem:[#allocation4 + $0xa8] sm:$0xff]  ;;  %v2045_v27 = vld [vmem:[#allocation4 + $0x30] sm:$0xff] }
 0x32b   : > { %v1961_v10 = vpop.xlane.xlu0 %1960  ;;  %2035 = vst.msk [vmem:[#allocation3 + $0xe0] sm:$0xff] %vm2006_vm1, %v2002_v42  ;;  %v4315_v58 = vadd.f32 %v4314_v26, %v4313_v16  ;;  %v4316_v49 = vpop.f32.mrb[6].mxu1  ;;  %v1877_v42 = vmul.f32 %v6926_v61, %v1845_v32  ;;  %v2061_v26 = vld [vmem:[#allocation4 + $0xb0] sm:$0xff] }
 0x32c   : > { %v2001_v4 = vadd.f32 %v1961_v10, %v1873_v48  ;;  %v1970_v25 = vpop.xlane.xlu1 %1969  ;;  %2618 = vst [vmem:[#allocation4 + $0x10] sm:$0xff] %v2586_v28  ;;  %v2587_v29 = vadd.f32 %v4270_v45, %v2234_v7  ;;  %v4317_v6 = vpop.f32.mrb[7].mxu1  ;;  %v2235_v10 = vmul.f32 %v6870_v55, %v2043_v11  ;;  %v2046_v45 = vld [vmem:[#allocation4 + $0x38] sm:$0xff] }
 0x32d   : > { %v2004_v14 = vadd.f32 %v1970_v25, %v1876_v24  ;;  %v2602_v54 = vadd.f32 %v4315_v58, %v2249_v39  ;;  %v4318_v48 = vadd.f32 %v4317_v6, %v4316_v49  ;;  %v2059_v24 = vld [vmem:[#allocation4 + $0xa0] sm:$0xff]  ;;  %v2238_v39 = vmul.f32 %v6913_v47, %v2046_v45  ;;  %v2062_v49 = vld [vmem:[#allocation4 + $0xb8] sm:$0xff] }
 0x32e   : > { %2034 = vst.msk [vmem:[#allocation3 + $0xd8] sm:$0xff] %vm2006_vm1, %v2001_v4  ;;  %2619 = vst [vmem:[#allocation4 + $0x18] sm:$0xff] %v2587_v29  ;;  %v2251_v50 = vmul.f32 %v6933_v20, %v2059_v24  ;;  %v2253_v6 = vmul.f32 %v6940_v62, %v2061_v26  ;;  %v2066_v26 = vld [vmem:[#allocation4 + $0xd8] sm:$0xff] }
 0x32f   : > { %v1967_v2 = vpop.xlane.xlu0 %1966  ;;  %2037 = vst.msk [vmem:[#allocation3 + $0xf0] sm:$0xff] %vm2006_vm1, %v2004_v14  ;;  %v4271_v40 = vpop.f32.mrb[8].mxu0  ;;  %2634 = vst [vmem:[#allocation4 + $0x90] sm:$0xff] %v2602_v54  ;;  %v2603_v60 = vadd.f32 %v4318_v48, %v2250_v22  ;;  %v2047_v54 = vld [vmem:[#allocation4 + $0x40] sm:$0xff] }
 0x330   : > { %v2003_v51 = vadd.f32 %v1967_v2, %v1875_v36  ;;  %v4272_v52 = vpop.f32.mrb[9].mxu0  ;;  %v2252_v36 = vmul.f32 %v6950_v33, %v2060_v13  ;;  %v2237_v2 = vmul.f32 %v6879_v5, %v2045_v27 }
 0x331   : > { %v4273_v43 = vadd.f32 %v4272_v52, %v4271_v40  ;;  %v4274_v30 = vpop.f32.mrb[10].mxu0  ;;  %2635 = vst [vmem:[#allocation4 + $0x98] sm:$0xff] %v2603_v60  ;;  %v2254_v40 = vmul.f32 %v6954_v23, %v2062_v49  ;;  %v2048_v52 = vld [vmem:[#allocation4 + $0x48] sm:$0xff] }
 0x332   : > { %2036 = vst.msk [vmem:[#allocation3 + $0xe8] sm:$0xff] %vm2006_vm1, %v2003_v51  ;;  %v4275_v61 = vpop.f32.mrb[11].mxu0 }
 0x333   : > { %v1973_v56 = vpop.xlane.xlu0 %1972  ;;  %v2588_v4 = vadd.f32 %v4273_v43, %v2235_v10  ;;  %v4276_v21 = vadd.f32 %v4275_v61, %v4274_v30  ;;  %v4319_v18 = vpop.f32.mrb[8].mxu1  ;;  %v2239_v10 = vmul.f32 %v6889_v8, %v2047_v54  ;;  %v2063_v30 = vld [vmem:[#allocation4 + $0xc0] sm:$0xff]  ;;  %v2240_v61 = vmul.f32 %v6917_v37, %v2048_v52 }
 0x334   : > { %v2005_v9 = vadd.f32 %v1973_v56, %v1877_v42  ;;  %v4320_v25 = vpop.f32.mrb[9].mxu1  ;;  %v2255_v13 = vmul.f32 %v6944_v15, %v2063_v30 }
 0x335   : > { %2620 = vst [vmem:[#allocation4 + $0x20] sm:$0xff] %v2588_v4  ;;  %v2589_v55 = vadd.f32 %v4276_v21, %v2236_v38  ;;  %v4321_v17 = vadd.f32 %v4320_v25, %v4319_v18  ;;  %v4322_v14 = vpop.f32.mrb[10].mxu1  ;;  %v2064_v21 = vld [vmem:[#allocation4 + $0xc8] sm:$0xff] }
 0x336   : > { %2038 = vst.msk [vmem:[#allocation3 + $0xf8] sm:$0xff] %vm2006_vm1, %v2005_v9  ;;  %v4323_v44 = vpop.f32.mrb[11].mxu1 }
 0x337   : > { %2621 = vst [vmem:[#allocation4 + $0x28] sm:$0xff] %v2589_v55  ;;  %v2604_v7 = vadd.f32 %v4321_v17, %v2251_v50  ;;  %v4324_v28 = vadd.f32 %v4323_v44, %v4322_v14  ;;  %v2049_v55 = vld [vmem:[#allocation4 + $0x50] sm:$0xff]  ;;  %v2256_v14 = vmul.f32 %v6959_v63, %v2064_v21  ;;  %v2054_v21 = vld [vmem:[#allocation4 + $0x78] sm:$0xff] }
 0x339   : > { %v4277_v53 = vpop.f32.mrb[12].mxu0  ;;  %2636 = vst [vmem:[#allocation4 + $0xa0] sm:$0xff] %v2604_v7  ;;  %v2605_v32 = vadd.f32 %v4324_v28, %v2252_v36  ;;  %v2050_v36 = vld [vmem:[#allocation4 + $0x58] sm:$0xff]  ;;  %v2241_v28 = vmul.f32 %v6899_v59, %v2049_v55 }
 0x33a   : > { %v4278_v16 = vpop.f32.mrb[13].mxu0 }
 0x33b   : > { %v4279_v35 = vadd.f32 %v4278_v16, %v4277_v53  ;;  %v4280_v20 = vpop.f32.mrb[14].mxu0  ;;  %2637 = vst [vmem:[#allocation4 + $0xa8] sm:$0xff] %v2605_v32  ;;  %v2065_v16 = vld [vmem:[#allocation4 + $0xd0] sm:$0xff]  ;;  %v2242_v32 = vmul.f32 %v6924_v46, %v2050_v36  ;;  %v2224_v55 = vpop.permute.xlu0 %2223 }
 0x33c   : > { %v4281_v51 = vpop.f32.mrb[15].mxu0  ;;  %v2229_v36 = vpop.permute.xlu1 %2228 }
 0x33d   : > { %v2590_v29 = vadd.f32 %v4279_v35, %v2237_v2  ;;  %v4282_v58 = vadd.f32 %v4281_v51, %v4280_v20  ;;  %v4325_v33 = vpop.f32.mrb[12].mxu1 }
 0x33e   : > { %v4326_v11 = vpop.f32.mrb[13].mxu1 }
 0x33f   : > { %2622 = vst [vmem:[#allocation4 + $0x30] sm:$0xff] %v2590_v29  ;;  %v2591_v42 = vadd.f32 %v4282_v58, %v2238_v39  ;;  %v4327_v22 = vadd.f32 %v4326_v11, %v4325_v33  ;;  %v4328_v5 = vpop.f32.mrb[14].mxu1  ;;  %v2257_v39 = vmul.f32 %v6948_v3, %v2065_v16  ;;  %v2051_v33 = vld [vmem:[#allocation4 + $0x60] sm:$0xff]  ;;  %v2258_v11 = vmul.f32 %v6962_v34, %v2066_v26 }
 0x340   : > { %v4329_v48 = vpop.f32.mrb[15].mxu1  ;;  %v2243_v54 = vmul.f32 %v6907_v31, %v2051_v33  ;;  %v5118_v26 = vmov (!%p4189_p0), 0  }
 0x341   : > { %2623 = vst [vmem:[#allocation4 + $0x38] sm:$0xff] %v2591_v42  ;;  %v2606_v56 = vadd.f32 %v4327_v22, %v2253_v6  ;;  %v4330_v12 = vadd.f32 %v4329_v48, %v4328_v5  ;;  %v2052_v22 = vld [vmem:[#allocation4 + $0x68] sm:$0xff]  ;;  %4786 = vset.pattern.permute.xlu1 (!%p4189_p0), %v5118_v26  ;;  %4785 = vset.pattern.permute.xlu0 (!%p4189_p0), %v5118_v26  ;;  %v2706_v26 = vld [vmem:[#allocation3 + $0xb0] sm:$0xff] (!%p4189_p0) }
 0x342   : > { %v4283_v47 = vpop.f32.mrb[16].mxu0 }
 0x343   : > { %v4284_v9 = vpop.f32.mrb[17].mxu0  ;;  %2638 = vst [vmem:[#allocation4 + $0xb0] sm:$0xff] %v2606_v56  ;;  %v2607_v60 = vadd.f32 %v4330_v12, %v2254_v40  ;;  %v2067_v56 = vld [vmem:[#allocation4 + $0xe0] sm:$0xff] }
 0x344   : > { %v4285_v43 = vadd.f32 %v4284_v9, %v4283_v47  ;;  %v4286_v62 = vpop.f32.mrb[18].mxu0  ;;  %v2244_v47 = vmul.f32 %v6931_v19, %v2052_v22 }
 0x345   : > { %v4287_v24 = vpop.f32.mrb[19].mxu0  ;;  %2639 = vst [vmem:[#allocation4 + $0xb8] sm:$0xff] %v2607_v60  ;;  %v4331_v23 = vpop.f32.mrb[16].mxu1 }
 0x346   : > { %v2592_v38 = vadd.f32 %v4285_v43, %v2239_v10  ;;  %v4288_v4 = vadd.f32 %v4287_v24, %v4286_v62  ;;  %v4332_v18 = vpop.f32.mrb[17].mxu1  ;;  %v2068_v10 = vld [vmem:[#allocation4 + $0xe8] sm:$0xff]  ;;  %v2259_v43 = vmul.f32 %v6952_v1, %v2067_v56  ;;  %v2053_v24 = vld [vmem:[#allocation4 + $0x70] sm:$0xff] }
 0x347   : > { %v4333_v50 = vadd.f32 %v4332_v18, %v4331_v23  ;;  %v4334_v8 = vpop.f32.mrb[18].mxu1 }
 0x348   : > { %2624 = vst [vmem:[#allocation4 + $0x40] sm:$0xff] %v2592_v38  ;;  %v2593_v25 = vadd.f32 %v4288_v4, %v2240_v61  ;;  %v4335_v17 = vpop.f32.mrb[19].mxu1  ;;  %v2260_v38 = vmul.f32 %v6965_v0, %v2068_v10 }
 0x349   : > { %v2608_v27 = vadd.f32 %v4333_v50, %v2255_v13  ;;  %v4336_v44 = vadd.f32 %v4335_v17, %v4334_v8  ;;  %v2245_v13 = vmul.f32 %v6915_v57, %v2053_v24  ;;  %v2069_v8 = vld [vmem:[#allocation4 + $0xf0] sm:$0xff] }
 0x34a   : > { %2625 = vst [vmem:[#allocation4 + $0x48] sm:$0xff] %v2593_v25  ;;  %v4289_v37 = vpop.f32.mrb[20].mxu0 }
 0x34b   : > { %v4290_v7 = vpop.f32.mrb[21].mxu0  ;;  %2640 = vst [vmem:[#allocation4 + $0xc0] sm:$0xff] %v2608_v27  ;;  %v2609_v53 = vadd.f32 %v4336_v44, %v2256_v14  ;;  %v2246_v14 = vmul.f32 %v6937_v41, %v2054_v21  ;;  %v2686_v41 = vld [vmem:[#allocation3 + $0x10] sm:$0xff] (!%p4189_p0)  ;;  %v4788_v21 = vld [vmem:[%s7687_s4 + $0x8] sm:$0xff] (!%p4189_p0)  }
 0x34c   : > { %v4291_v45 = vadd.f32 %v4290_v7, %v4289_v37  ;;  %v4292_v15 = vpop.f32.mrb[22].mxu0  ;;  %v2070_v37 = vld [vmem:[#allocation4 + $0xf8] sm:$0xff] }
 0x34d   : > { %v4293_v2 = vpop.f32.mrb[23].mxu0  ;;  %2641 = vst [vmem:[#allocation4 + $0xc8] sm:$0xff] %v2609_v53  ;;  %v4337_v63 = vpop.f32.mrb[20].mxu1  ;;  %v2262_v16 = vmul.f32 %v2229_v36, %v2070_v37  ;;  %v2702_v37 = vld [vmem:[#allocation3 + $0x90] sm:$0xff] (!%p4189_p0)  ;;  %v2705_v36 = vld [vmem:[#allocation3 + $0xa8] sm:$0xff] (!%p4189_p0) }
 0x34e   : > { %v2594_v35 = vadd.f32 %v4291_v45, %v2241_v28  ;;  %v4294_v20 = vadd.f32 %v4293_v2, %v4292_v15  ;;  %v4338_v51 = vpop.f32.mrb[21].mxu1  ;;  %v2261_v28 = vmul.f32 %v2224_v55, %v2069_v8  ;;  %v4789_v8 = vld [vmem:[%s7687_s4 + $0x10] sm:$0xff] (!%p4189_p0)  }
 0x34f   : > { %v4339_v58 = vadd.f32 %v4338_v51, %v4337_v63  ;;  %v4340_v59 = vpop.f32.mrb[22].mxu1  ;;  %v2687_v63 = vld [vmem:[#allocation3 + $0x18] sm:$0xff] (!%p4189_p0)  ;;  %v2718_v51 = vmax.f32 (!%p4189_p0), %v2686_v41, 1e-30 }
 0x350   : > { %2626 = vst [vmem:[#allocation4 + $0x50] sm:$0xff] %v2594_v35  ;;  %v2595_v29 = vadd.f32 %v4294_v20, %v2242_v32  ;;  %v4341_v49 = vpop.f32.mrb[23].mxu1  ;;  %v2684_v20 = vld [vmem:[#allocation3] sm:$0xff] (!%p4189_p0)  ;;  %v2707_v41 = vld [vmem:[#allocation3 + $0xb8] sm:$0xff] (!%p4189_p0) }
 0x351   : > { %v2610_v6 = vadd.f32 %v4339_v58, %v2257_v39  ;;  %v4342_v42 = vadd.f32 %v4341_v49, %v4340_v59  ;;  %v2716_v39 = vmax.f32 (!%p4189_p0), %v2684_v20, 1e-30  ;;  %v2685_v58 = vld [vmem:[#allocation3 + $0x8] sm:$0xff] (!%p4189_p0)  ;;  %4803 = vrcp.f32 (!%p4189_p0), %v2718_v51  ;;  %v2688_v49 = vld [vmem:[#allocation3 + $0x20] sm:$0xff] (!%p4189_p0) }
 0x352   : > { %2627 = vst [vmem:[#allocation4 + $0x58] sm:$0xff] %v2595_v29  ;;  %v4295_v46 = vpop.f32.mrb[24].mxu0  ;;  %v2719_v29 = vmax.f32 (!%p4189_p0), %v2687_v63, 1e-30  ;;  %v2689_v59 = vld [vmem:[#allocation3 + $0x28] sm:$0xff] (!%p4189_p0) }
 0x353   : > { %v4296_v5 = vpop.f32.mrb[25].mxu0  ;;  %2642 = vst [vmem:[#allocation4 + $0xd0] sm:$0xff] %v2610_v6  ;;  %v2611_v48 = vadd.f32 %v4342_v42, %v2258_v11  ;;  %v2717_v33 = vmax.f32 (!%p4189_p0), %v2685_v58, 1e-30  ;;  %4805 = vrcp.f32 (!%p4189_p0), %v2716_v39  ;;  %v2721_v11 = vmax.f32 (!%p4189_p0), %v2689_v59, 1e-30 }
 0x354   : > { %v4297_v40 = vadd.f32 %v4296_v5, %v4295_v46  ;;  %v4298_v3 = vpop.f32.mrb[26].mxu0  ;;  %4807 = vrcp.f32 (!%p4189_p0), %v2719_v29  ;;  %v2720_v6 = vmax.f32 (!%p4189_p0), %v2688_v49, 1e-30  ;;  %v2691_v42 = vld [vmem:[#allocation3 + $0x38] sm:$0xff] (!%p4189_p0)  ;;  %v2690_v46 = vld [vmem:[#allocation3 + $0x30] sm:$0xff] (!%p4189_p0)  ;;  %v4792_v20 = vld [vmem:[%s7687_s4 + $0x28] sm:$0xff] (!%p4189_p0)  }
 0x355   : > { %v4299_v12 = vpop.f32.mrb[27].mxu0  ;;  %2643 = vst [vmem:[#allocation4 + $0xd8] sm:$0xff] %v2611_v48  ;;  %4809 = vrcp.f32 (!%p4189_p0), %v2717_v33  ;;  %v2723_v22 = vmax.f32 (!%p4189_p0), %v2691_v42, 1e-30  ;;  %v2722_v5 = vmax.f32 (!%p4189_p0), %v2690_v46, 1e-30 }
 0x356   : > { %v2596_v52 = vadd.f32 %v4297_v40, %v2243_v54  ;;  %v4300_v9 = vadd.f32 %v4299_v12, %v4298_v3  ;;  %v4343_v34 = vpop.f32.mrb[24].mxu1  ;;  %4811 = vrcp.f32 (!%p4189_p0), %v2721_v11  ;;  %v2693_v54 = vld [vmem:[#allocation3 + $0x48] sm:$0xff] (!%p4189_p0)  ;;  %v2692_v48 = vld [vmem:[#allocation3 + $0x40] sm:$0xff] (!%p4189_p0)  ;;  %v2739_v39 = vmax.f32 (!%p4189_p0), %v2707_v41, 1e-30  ;;  %v4793_v59 = vld [vmem:[%s7687_s4 + $0x30] sm:$0xff] (!%p4189_p0)  }
 0x357   : > { %v4344_v60 = vpop.f32.mrb[25].mxu1  ;;  %4813 = vrcp.f32 (!%p4189_p0), %v2720_v6  ;;  %v2725_v3 = vmax.f32 (!%p4189_p0), %v2693_v54, 1e-30  ;;  %v2724_v12 = vmax.f32 (!%p4189_p0), %v2692_v48, 1e-30  ;;  %v2709_v58 = vld [vmem:[#allocation3 + $0xc8] sm:$0xff] (!%p4189_p0) }
 0x358   : > { %2628 = vst [vmem:[#allocation4 + $0x60] sm:$0xff] %v2596_v52  ;;  %v2597_v62 = vadd.f32 %v4300_v9, %v2244_v47  ;;  %v4345_v30 = vadd.f32 %v4344_v60, %v4343_v34  ;;  %v4346_v31 = vpop.f32.mrb[26].mxu1  ;;  %4815 = vrcp.f32 (!%p4189_p0), %v2723_v22  ;;  %v2695_v47 = vld [vmem:[#allocation3 + $0x58] sm:$0xff] (!%p4189_p0)  ;;  %v2694_v9 = vld [vmem:[#allocation3 + $0x50] sm:$0xff] (!%p4189_p0)  ;;  %v2738_v29 = vmax.f32 (!%p4189_p0), %v2706_v26, 1e-30 }
 0x359   : > { %v4347_v61 = vpop.f32.mrb[27].mxu1  ;;  %4817 = vrcp.f32 (!%p4189_p0), %v2722_v5  ;;  %v2727_v10 = vmax.f32 (!%p4189_p0), %v2695_v47, 1e-30  ;;  %v2726_v60 = vmax.f32 (!%p4189_p0), %v2694_v9, 1e-30  ;;  %v2708_v49 = vld [vmem:[#allocation3 + $0xc0] sm:$0xff] (!%p4189_p0) }
 0x35a   : > { %2629 = vst [vmem:[#allocation4 + $0x68] sm:$0xff] %v2597_v62  ;;  %v2612_v4 = vadd.f32 %v4345_v30, %v2259_v43  ;;  %v4348_v23 = vadd.f32 %v4347_v61, %v4346_v31  ;;  %v4301_v19 = vpop.f32.mrb[28].mxu0  ;;  %4819 = vrcp.f32 (!%p4189_p0), %v2725_v3  ;;  %v2697_v43 = vld [vmem:[#allocation3 + $0x68] sm:$0xff] (!%p4189_p0)  ;;  %v2696_v30 = vld [vmem:[#allocation3 + $0x60] sm:$0xff] (!%p4189_p0)  ;;  %v2699_v61 = vld [vmem:[#allocation3 + $0x78] sm:$0xff] (!%p4189_p0) }
 0x35b   : > { %v4302_v18 = vpop.f32.mrb[29].mxu0  ;;  %v4804_v40 = vpop.eup (!%p4189_p0), %4803  ;;  %4821 = vrcp.f32 (!%p4189_p0), %v2724_v12  ;;  %v2729_v24 = vmax.f32 (!%p4189_p0), %v2697_v43, 1e-30  ;;  %v2741_v6 = vmax.f32 (!%p4189_p0), %v2709_v58, 1e-30  ;;  %v2711_v46 = vld [vmem:[#allocation3 + $0xd8] sm:$0xff] (!%p4189_p0) }
 0x35c   : > { %2644 = vst [vmem:[#allocation4 + $0xe0] sm:$0xff] %v2612_v4  ;;  %v2613_v25 = vadd.f32 %v4348_v23, %v2260_v38  ;;  %v4303_v50 = vadd.f32 %v4302_v18, %v4301_v19  ;;  %v4304_v1 = vpop.f32.mrb[30].mxu0  ;;  %2824 = vperm.xlu1 (!%p4189_p0), %4786, %v4804_v40   ;;  %4823 = vrcp.f32 (!%p4189_p0), %v2727_v10  ;;  %v2728_v38 = vmax.f32 (!%p4189_p0), %v2696_v30, 1e-30  ;;  %v2698_v4 = vld [vmem:[#allocation3 + $0x70] sm:$0xff] (!%p4189_p0)  ;;  %v4787_v23 = vld [vmem:[%s7687_s4] sm:$0xff] (!%p4189_p0)  }
 0x35d   : > { %v4305_v17 = vpop.f32.mrb[31].mxu0  ;;  %v4806_v56 = vpop.eup (!%p4189_p0), %4805  ;;  %4825 = vrcp.f32 (!%p4189_p0), %v2726_v60  ;;  %4403 = vmatprep.subr.bf16.mxu0 (!%p4189_p0), %v4787_v23  ;;  %v2740_v42 = vmax.f32 (!%p4189_p0), %v2708_v49, 1e-30  ;;  %v4794_v22 = vld [vmem:[%s7687_s4 + $0x38] sm:$0xff] (!%p4189_p0)   ;;  %v2710_v54 = vld [vmem:[#allocation3 + $0xd0] sm:$0xff] (!%p4189_p0)  ;;  %v2712_v47 = vld [vmem:[#allocation3 + $0xe0] sm:$0xff] (!%p4189_p0) }
 0x35e   : > { %2645 = vst [vmem:[#allocation4 + $0xe8] sm:$0xff] %v2613_v25  ;;  %v2598_v27 = vadd.f32 %v4303_v50, %v2245_v13  ;;  %v4306_v0 = vadd.f32 %v4305_v17, %v4304_v1  ;;  %v4349_v44 = vpop.f32.mrb[28].mxu1  ;;  %v4808_v52 = vpop.eup (!%p4189_p0), %4807  ;;  %2814 = vperm.xlu0 (!%p4189_p0), %4785, %v4806_v56   ;;  %v2731_v13 = vmax.f32 (!%p4189_p0), %v2699_v61, 1e-30  ;;  %v2701_v25 = vld [vmem:[#allocation3 + $0x88] sm:$0xff] (!%p4189_p0)  ;;  %4827 = vrcp.f32 (!%p4189_p0), %v2729_v24  ;;  %v2700_v1 = vld [vmem:[#allocation3 + $0x80] sm:$0xff] (!%p4189_p0)  ;;  %4404 = vmatpush3.bf16.msra.mxu0 (!%p4189_p0), %v4787_v23 }
 0x35f   : > { %v4350_v7 = vpop.f32.mrb[29].mxu1  ;;  %v4810_v34 = vpop.eup (!%p4189_p0), %4809  ;;  %v2730_v50 = vmax.f32 (!%p4189_p0), %v2698_v4, 1e-30  ;;  %4829 = vrcp.f32 (!%p4189_p0), %v2728_v38  ;;  %4405 = vmatprep.subr.bf16.mxu0 (!%p4189_p0), %v4788_v21  ;;  %v2733_v17 = vmax.f32 (!%p4189_p0), %v2701_v25, 1e-30  ;;  %v2713_v56 = vld [vmem:[#allocation3 + $0xe8] sm:$0xff] (!%p4189_p0) }
 0x360   : > { %2630 = vst [vmem:[#allocation4 + $0x70] sm:$0xff] %v2598_v27  ;;  %v2599_v53 = vadd.f32 %v4306_v0, %v2246_v14  ;;  %v4351_v57 = vadd.f32 %v4350_v7, %v4349_v44  ;;  %v4352_v45 = vpop.f32.mrb[30].mxu1  ;;  %2683 = sbr.rel (%p4189_p0) target bundleno = 1837 (0x72d), region = 98  ;;  %2829 = vperm.xlu1 (!%p4189_p0), %4786, %v4808_v52   ;;  %v4812_v62 = vpop.eup (!%p4189_p0), %4811  ;;  %v2703_v14 = vld [vmem:[#allocation3 + $0x98] sm:$0xff] (!%p4189_p0)  ;;  %v2732_v0 = vmax.f32 (!%p4189_p0), %v2700_v1, 1e-30  ;;  %4831 = vrcp.f32 (!%p4189_p0), %v2731_v13 }
 0x361   : > { %v4353_v15 = vpop.f32.mrb[31].mxu1  ;;  %v4814_v31 = vpop.eup (!%p4189_p0), %4813  ;;  %4833 = vrcp.f32 (!%p4189_p0), %v2730_v50  ;;  %v2735_v44 = vmax.f32 (!%p4189_p0), %v2703_v14, 1e-30  ;;  %v4790_v7 = vld [vmem:[%s7687_s4 + $0x18] sm:$0xff] (!%p4189_p0)   ;;  %v2743_v40 = vmax.f32 (!%p4189_p0), %v2711_v46, 1e-30 }
 0x362   : > { %2631 = vst [vmem:[#allocation4 + $0x78] sm:$0xff] %v2599_v53  ;;  %v2614_v2 = vadd.f32 %v4351_v57, %v2261_v28  ;;  %v4354_v32 = vadd.f32 %v4353_v15, %v4352_v45  ;;  %2819 = vperm.xlu0 (!%p4189_p0), %4785, %v4810_v34   ;;  %v4816_v19 = vpop.eup (!%p4189_p0), %4815  ;;  %4406 = vmatpush3.bf16.msra.mxu0 (!%p4189_p0), %v4788_v21  ;;  %4835 = vrcp.f32 (!%p4189_p0), %v2733_v17  ;;  %v2734_v57 = vmax.f32 (!%p4189_p0), %v2702_v37, 1e-30  ;;  %v2704_v15 = vld [vmem:[#allocation3 + $0xa0] sm:$0xff] (!%p4189_p0)  ;;  %v2715_v10 = vld [vmem:[#allocation3 + $0xf8] sm:$0xff] (!%p4189_p0)  ;;  %v2714_v43 = vld [vmem:[#allocation3 + $0xf0] sm:$0xff] (!%p4189_p0) }
 0x363   : > { %v4818_v18 = vpop.eup (!%p4189_p0), %4817  ;;  %4407 = vmatprep.subr.bf16.mxu0 (!%p4189_p0), %v4789_v8  ;;  %4837 = vrcp.f32 (!%p4189_p0), %v2732_v0  ;;  %v2737_v45 = vmax.f32 (!%p4189_p0), %v2705_v36, 1e-30  ;;  %v2742_v3 = vmax.f32 (!%p4189_p0), %v2710_v54, 1e-30  ;;  %v2745_v9 = vmax.f32 (!%p4189_p0), %v2713_v56, 1e-30 }
 0x364   : > { %2646 = vst [vmem:[#allocation4 + $0xf0] sm:$0xff] %v2614_v2  ;;  %v2615_v35 = vadd.f32 %v4354_v32, %v2262_v16  ;;  %2839 = vperm.xlu1 (!%p4189_p0), %4786, %v4812_v62   ;;  %v4820_v55 = vpop.eup (!%p4189_p0), %4819  ;;  %v4791_v16 = vld [vmem:[%s7687_s4 + $0x20] sm:$0xff] (!%p4189_p0)   ;;  %4839 = vrcp.f32 (!%p4189_p0), %v2735_v44  ;;  %v2744_v34 = vmax.f32 (!%p4189_p0), %v2712_v47, 1e-30  ;;  %v2747_v30 = vmax.f32 (!%p4189_p0), %v2715_v10, 1e-30 }
 0x365   : > { %v4822_v27 = vpop.eup (!%p4189_p0), %4821  ;;  %4841 = vrcp.f32 (!%p4189_p0), %v2734_v57  ;;  %v4795_v13 = vld [vmem:[%s7689_s6] sm:$0xff] (!%p4189_p0)   ;;  %v4796_v25 = vld [vmem:[%s7689_s6 + $0x8] sm:$0xff] (!%p4189_p0)   ;;  %v4797_v50 = vld [vmem:[%s7689_s6 + $0x10] sm:$0xff] (!%p4189_p0)  }
 0x366   : > { %2647 = vst [vmem:[#allocation4 + $0xf8] sm:$0xff] %v2615_v35  ;;  %2834 = vperm.xlu0 (!%p4189_p0), %4785, %v4814_v31   ;;  %v4824_v28 = vpop.eup (!%p4189_p0), %4823  ;;  %4408 = vmatpush3.bf16.msra.mxu0 (!%p4189_p0), %v4789_v8  ;;  %v2736_v35 = vmax.f32 (!%p4189_p0), %v2704_v15, 1e-30  ;;  %4843 = vrcp.f32 (!%p4189_p0), %v2737_v45  ;;  %v2746_v31 = vmax.f32 (!%p4189_p0), %v2714_v43, 1e-30  ;;  %v4798_v1 = vld [vmem:[%s7689_s6 + $0x18] sm:$0xff] (!%p4189_p0)  }
 0x367   : > { %v4826_v53 = vpop.eup %4825  ;;  %4409 = vmatprep.subr.bf16.mxu0 %v4790_v7  ;;  %4451 = vmatprep.subr.bf16.mxu1 %v4795_v13  ;;  %v4799_v8 = vld [vmem:[%s7689_s6 + $0x20] sm:$0xff]   ;;  %v2750_v17 = vld [vmem:[#allocation4 + $0x10] sm:$0xff]  ;;  %v2751_v36 = vld [vmem:[#allocation4 + $0x18] sm:$0xff] }
 0x368   : > { %2849 = vperm.xlu1 %4786, %v4816_v19   ;;  %v4828_v2 = vpop.eup %4827  ;;  %4845 = vrcp.f32 %v2736_v35  ;;  %4452 = vmatpush3.bf16.msra.mxu1 %v4795_v13  ;;  %v2748_v14 = vld [vmem:[#allocation4] sm:$0xff]  ;;  %v2753_v35 = vld [vmem:[#allocation4 + $0x28] sm:$0xff] }
 0x369   : > { %v4830_v32 = vpop.eup %4829  ;;  %4847 = vrcp.f32 %v2739_v39  ;;  %4453 = vmatprep.subr.bf16.mxu1 %v4796_v25  ;;  %v2756_v56 = vld [vmem:[#allocation4 + $0x40] sm:$0xff] }
 0x36a   : > { %2844 = vperm.xlu0 %4785, %v4818_v18   ;;  %4410 = vmatpush3.bf16.msra.mxu0 %v4790_v7  ;;  %v4832_v63 = vpop.eup %4831  ;;  %4849 = vrcp.f32 %v2738_v29 }
 0x36b   : > { %4411 = vmatprep.subr.bf16.mxu0 %v4791_v16  ;;  %v4834_v51 = vpop.eup %4833  ;;  %4851 = vrcp.f32 %v2741_v6 }
 0x36c   : > { %2859 = vperm.xlu1 %4786, %v4820_v55   ;;  %v4836_v33 = vpop.eup %4835  ;;  %4853 = vrcp.f32 %v2740_v42  ;;  %4454 = vmatpush3.bf16.msra.mxu1 %v4796_v25  ;;  %v4800_v55 = vld [vmem:[%s7689_s6 + $0x28] sm:$0xff]  }
 0x36d   : > { %v4838_v11 = vpop.eup %4837  ;;  %4855 = vrcp.f32 %v2743_v40  ;;  %4455 = vmatprep.subr.bf16.mxu1 %v4797_v50  ;;  %v2757_v40 = vld [vmem:[#allocation4 + $0x48] sm:$0xff] }
 0x36e   : > { %2854 = vperm.xlu0 %4785, %v4822_v27   ;;  %4412 = vmatpush3.bf16.msra.mxu0 %v4791_v16  ;;  %v4840_v5 = vpop.eup %4839  ;;  %4857 = vrcp.f32 %v2742_v3 }
 0x36f   : > { %4413 = vmatprep.subr.bf16.mxu0 %v4792_v20  ;;  %v4842_v48 = vpop.eup %4841  ;;  %4859 = vrcp.f32 %v2745_v9 }
 0x370   : > { %2869 = vperm.xlu1 %4786, %v4824_v28   ;;  %v4844_v12 = vpop.eup %4843  ;;  %4861 = vrcp.f32 %v2744_v34  ;;  %4456 = vmatpush3.bf16.msra.mxu1 %v4797_v50  ;;  %v2749_v28 = vld [vmem:[#allocation4 + $0x8] sm:$0xff] }
 0x371   : > { %4863 = vrcp.f32 %v2747_v30  ;;  %4457 = vmatprep.subr.bf16.mxu1 %v4798_v1 }
 0x372   : > { %2864 = vperm.xlu0 %4785, %v4826_v53   ;;  %4414 = vmatpush3.bf16.msra.mxu0 %v4792_v20  ;;  %v4846_v52 = vpop.eup %4845  ;;  %4865 = vrcp.f32 %v2746_v31  ;;  %v2752_v20 = vld [vmem:[#allocation4 + $0x20] sm:$0xff]  ;;  %v2759_v31 = vld [vmem:[#allocation4 + $0x58] sm:$0xff] }
 0x373   : > { %4415 = vmatprep.subr.bf16.mxu0 %v4793_v59  ;;  %v4848_v60 = vpop.eup %4847 }
 0x374   : > { %2879 = vperm.xlu1 %4786, %v4828_v2   ;;  %v4850_v62 = vpop.eup %4849  ;;  %4458 = vmatpush3.bf16.msra.mxu1 %v4798_v1 }
 0x375   : > { %v4852_v24 = vpop.eup %4851  ;;  %4459 = vmatprep.subr.bf16.mxu1 %v4799_v8 }
 0x376   : > { %2874 = vperm.xlu0 %4785, %v4830_v32   ;;  %4416 = vmatpush3.bf16.msra.mxu0 %v4793_v59  ;;  %v4854_v61 = vpop.eup %4853 }
 0x377   : > { %4417 = vmatprep.subr.bf16.mxu0 %v4794_v22  ;;  %v4856_v38 = vpop.eup %4855 }
 0x378   : > { %2889 = vperm.xlu1 %4786, %v4832_v63   ;;  %v4858_v4 = vpop.eup %4857  ;;  %4460 = vmatpush3.bf16.msra.mxu1 %v4799_v8 }
 0x379   : > { %v4860_v23 = vpop.eup %4859  ;;  %4461 = vmatprep.subr.bf16.mxu1 %v4800_v55 }
 0x37a   : > { %2884 = vperm.xlu0 %4785, %v4834_v51   ;;  %4418 = vmatpush3.bf16.msra.mxu0 %v4794_v22  ;;  %v4862_v19 = vpop.eup %4861 }
 0x37b   : > { %v4864_v21 = vpop.eup %4863 }
 0x37c   : > { %2899 = vperm.xlu1 %4786, %v4836_v33   ;;  %v4866_v18 = vpop.eup %4865  ;;  %4462 = vmatpush3.bf16.msra.mxu1 %v4800_v55  ;;  %v2755_v33 = vld [vmem:[#allocation4 + $0x38] sm:$0xff]  ;;  %v2761_v55 = vld [vmem:[#allocation4 + $0x68] sm:$0xff] }
 0x37e   : > { %2894 = vperm.xlu0 %4785, %v4838_v11   ;;  %v2754_v11 = vld [vmem:[#allocation4 + $0x30] sm:$0xff] }
 0x380   : > { %2909 = vperm.xlu1 %4786, %v4840_v5  }
 0x382   : > { %2904 = vperm.xlu0 %4785, %v4842_v48  }
 0x384   : > { %2919 = vperm.xlu1 %4786, %v4844_v12  }
 0x386   : > { %2914 = vperm.xlu0 %4785, %v4846_v52  }
 0x388   : > { %2929 = vperm.xlu1 %4786, %v4848_v60  }
 0x38a   : > { %2924 = vperm.xlu0 %4785, %v4850_v62  }
 0x38c   : > { %2939 = vperm.xlu1 %4786, %v4852_v24  }
 0x38e   : > { %2934 = vperm.xlu0 %4785, %v4854_v61   ;;  %v2758_v61 = vld [vmem:[#allocation4 + $0x50] sm:$0xff] }
 0x390   : > { %2949 = vperm.xlu1 %4786, %v4856_v38  }
 0x392   : > { %2944 = vperm.xlu0 %4785, %v4858_v4  }
 0x394   : > { %2959 = vperm.xlu1 %4786, %v4860_v23  }
 0x396   : > { %2954 = vperm.xlu0 %4785, %v4862_v19  }
 0x398   : > { %2969 = vperm.xlu1 %4786, %v4864_v21  }
 0x39a   : > { %2964 = vperm.xlu0 %4785, %v4866_v18  }
 0x3db   : > { %v2825_v27 = vpop.permute.xlu1 %2824 }
 0x3dc   : > { %v7099_v0 = vmul.f32 %v2825_v27, %v2750_v17  ;;  %v2760_v27 = vld [vmem:[#allocation4 + $0x60] sm:$0xff] }
 0x3dd   : > { %v2815_v44 = vpop.permute.xlu0 %2814 }
 0x3de   : > { %v7101_v37 = vmul.f32 %v2815_v44, %v2748_v14  ;;  %v3038_v7 = vmin.f32 %v7099_v0, 0.0  ;;  %vm3006_vm2 = vcmp.gt.f32.partialorder %v7099_v0, 0.0 }
 0x3df   : > { %v2830_v57 = vpop.permute.xlu1 %2829 }
 0x3e0   : > { %v3036_v53 = vmin.f32 %v7101_v37, 0.0  ;;  %v3072_v45 = vmul.f32 1.442695, %v3038_v7  ;;  %v7105_v15 = vmul.f32 %v2830_v57, %v2751_v36  ;;  %vm3004_vm3 = vcmp.gt.f32.partialorder %v7101_v37, 0.0 }
 0x3e1   : > { %v2820_v16 = vpop.permute.xlu0 %2819 }
 0x3e2   : > { %v3068_v2 = vmul.f32 1.442695, %v3036_v53  ;;  %v7107_v32 = vmul.f32 %v2820_v16, %v2749_v28  ;;  %4867 = vpow2.f32 %v3072_v45  ;;  %v3039_v41 = vmin.f32 %v7105_v15, 0.0 }
 0x3e3   : > { %v2840_v26 = vpop.permute.xlu1 %2839  ;;  %vm3007_vm4 = vcmp.gt.f32.partialorder %v7105_v15, 0.0 }
 0x3e4   : > { %4869 = vpow2.f32 %v3068_v2  ;;  %v3037_v63 = vmin.f32 %v7107_v32, 0.0  ;;  %v3074_v51 = vmul.f32 1.442695, %v3039_v41  ;;  %v7111_v39 = vmul.f32 %v2840_v26, %v2753_v35 }
 0x3e5   : > { %v2835_v29 = vpop.permute.xlu0 %2834  ;;  %vm3005_vm5 = vcmp.gt.f32.partialorder %v7107_v32, 0.0 }
 0x3e6   : > { %v3070_v58 = vmul.f32 1.442695, %v3037_v63  ;;  %v7113_v59 = vmul.f32 %v2835_v29, %v2752_v20  ;;  %4871 = vpow2.f32 %v3074_v51  ;;  %v3041_v49 = vmin.f32 %v7111_v39, 0.0  ;;  %v2763_v63 = vld [vmem:[#allocation4 + $0x78] sm:$0xff] }
 0x3e7   : > { %v2850_v42 = vpop.permute.xlu1 %2849  ;;  %vm3009_vm6 = vcmp.gt.f32.partialorder %v7111_v39, 0.0 }
 0x3e8   : > { %4873 = vpow2.f32 %v3070_v58  ;;  %v3040_v6 = vmin.f32 %v7113_v59, 0.0  ;;  %v3078_v46 = vmul.f32 1.442695, %v3041_v49  ;;  %v7117_v22 = vmul.f32 %v2850_v42, %v2755_v33  ;;  %v2762_v58 = vld [vmem:[#allocation4 + $0x70] sm:$0xff] }
 0x3e9   : > { %v2845_v5 = vpop.permute.xlu0 %2844  ;;  %vm3008_vm7 = vcmp.gt.f32.partialorder %v7113_v59, 0.0 }
 0x3ea   : > { %v3076_v54 = vmul.f32 1.442695, %v3040_v6  ;;  %v7119_v48 = vmul.f32 %v2845_v5, %v2754_v11  ;;  %4875 = vpow2.f32 %v3078_v46  ;;  %v3043_v3 = vmin.f32 %v7117_v22, 0.0 }
 0x3eb   : > { %v2860_v47 = vpop.permute.xlu1 %2859  ;;  %vm3011_vm8 = vcmp.gt.f32.partialorder %v7117_v22, 0.0 }
 0x3ec   : > { %4877 = vpow2.f32 %v3076_v54  ;;  %v3042_v12 = vmin.f32 %v7119_v48, 0.0  ;;  %v4868_v52 = vpop.eup %4867  ;;  %v3082_v9 = vmul.f32 1.442695, %v3043_v3  ;;  %v7123_v34 = vmul.f32 %v2860_v47, %v2757_v40 }
 0x3ed   : > { %v2855_v10 = vpop.permute.xlu0 %2854  ;;  %v4192_v43 = vadd.f32 -1.0, %v4868_v52  ;;  %vm3010_vm9 = vcmp.gt.f32.partialorder %v7119_v48, 0.0 }
 0x3ee   : > { %v4870_v60 = vpop.eup %4869  ;;  %v3080_v62 = vmul.f32 1.442695, %v3042_v12  ;;  %v7125_v30 = vmul.f32 %v2855_v10, %v2756_v56  ;;  %4879 = vpow2.f32 %v3082_v9  ;;  %v3045_v24 = vmin.f32 %v7123_v34, 0.0 }
 0x3ef   : > { %v2870_v4 = vpop.permute.xlu1 %2869  ;;  %v4190_v13 = vadd.f32 -1.0, %v4870_v60  ;;  %v7139_v50 = vsel %vm3006_vm2, %v7099_v0, %v4192_v43  ;;  %vm3013_vm10 = vcmp.gt.f32.partialorder %v7123_v34, 0.0  ;;  %v2765_v43 = vld [vmem:[#allocation4 + $0x88] sm:$0xff] }
 0x3f0   : > { %4881 = vpow2.f32 %v3080_v62  ;;  %v3044_v38 = vmin.f32 %v7125_v30, 0.0  ;;  %v4872_v23 = vpop.eup %4871  ;;  %v3086_v19 = vmul.f32 1.442695, %v3045_v24  ;;  %v7134_v21 = vmul.f32 %v2870_v4, %v2759_v31  ;;  %v2764_v31 = vld [vmem:[#allocation4 + $0x80] sm:$0xff] }
 0x3f1   : > { %v2865_v18 = vpop.permute.xlu0 %2864  ;;  %v4193_v17 = vadd.f32 -1.0, %v4872_v23  ;;  %v3198_v28 = vmax.f32 %v7139_v50, 0.0  ;;  %v3164_v16 = vsel %vm3004_vm3, %v7101_v37, %v4190_v13  ;;  %vm3012_vm11 = vcmp.gt.f32.partialorder %v7125_v30, 0.0 }
 0x3f2   : > { %v4874_v25 = vpop.eup %4873  ;;  %v3084_v1 = vmul.f32 1.442695, %v3044_v38  ;;  %v7142_v8 = vmul.f32 %v2865_v18, %v2758_v61  ;;  %4883 = vpow2.f32 %v3086_v19  ;;  %v3047_v14 = vmin.f32 %v7134_v21, 0.0 }
 0x3f3   : > { %v4191_v44 = vadd.f32 -1.0, %v4874_v25  ;;  %v2880_v36 = vpop.permute.xlu1 %2879  ;;  %v3167_v51 = vsel %vm3007_vm4, %v7105_v15, %v4193_v17  ;;  %vm3015_vm12 = vcmp.gt.f32.partialorder %v7134_v21, 0.0 }
 0x3f4   : > { %4885 = vpow2.f32 %v3084_v1  ;;  %v3046_v0 = vmin.f32 %v7142_v8, 0.0  ;;  %v4876_v7 = vpop.eup %4875  ;;  %v3090_v53 = vmul.f32 1.442695, %v3047_v14  ;;  %v7149_v57 = vmul.f32 %v2880_v36, %v2761_v55 }
 0x3f5   : > { %v2875_v45 = vpop.permute.xlu0 %2874  ;;  %v4195_v35 = vadd.f32 -1.0, %v4876_v7  ;;  %v3165_v26 = vsel %vm3005_vm5, %v7107_v32, %v4191_v44  ;;  %v3196_v32 = vmax.f32 %v3164_v16, 0.0  ;;  %v3199_v3 = vmax.f32 %v3167_v51, 0.0 }
 0x3f6   : > { %v4878_v2 = vpop.eup %4877  ;;  %v3088_v41 = vmul.f32 1.442695, %v3046_v0  ;;  %v7154_v20 = vmul.f32 %v2875_v45, %v2760_v27  ;;  %4887 = vpow2.f32 %v3090_v53  ;;  %v3049_v37 = vmin.f32 %v7149_v57, 0.0  ;;  %v2767_v27 = vld [vmem:[#allocation4 + $0x98] sm:$0xff]  ;;  %v2766_v0 = vld [vmem:[#allocation4 + $0x90] sm:$0xff] }
 0x3f7   : > { %v4194_v29 = vadd.f32 -1.0, %v4878_v2  ;;  %v3169_v33 = vsel %vm3009_vm6, %v7111_v39, %v4195_v35  ;;  %v2890_v11 = vpop.permute.xlu1 %2889  ;;  %v3197_v54 = vmax.f32 %v3165_v26, 0.0  ;;  %v3229_v25 = vpack.c.bf16 %v3199_v3, %v3198_v28 }
 0x3f8   : > { %4889 = vpow2.f32 %v3088_v41  ;;  %v3048_v49 = vmin.f32 %v7154_v20, 0.0  ;;  %v4880_v6 = vpop.eup %4879  ;;  %v3094_v42 = vmul.f32 1.442695, %v3049_v37  ;;  %v7171_v46 = vmul.f32 %v2890_v11, %v2763_v63 }
 0x3f9   : > { %v3168_v15 = vsel %vm3008_vm7, %v7113_v59, %v4194_v29  ;;  %v2885_v5 = vpop.permute.xlu0 %2884  ;;  %v4197_v56 = vadd.f32 -1.0, %v4880_v6  ;;  %v3201_v47 = vmax.f32 %v3169_v33, 0.0  ;;  %v3228_v4 = vpack.c.bf16 %v3197_v54, %v3196_v32  ;;  %v2768_v6 = vld [vmem:[#allocation4 + $0xa0] sm:$0xff] }
 0x3fa   : > { %v4882_v40 = vpop.eup %4881  ;;  %v3092_v12 = vmul.f32 1.442695, %v3048_v49  ;;  %v7173_v39 = vmul.f32 %v2885_v5, %v2762_v58  ;;  %4891 = vpow2.f32 %v3094_v42  ;;  %v3051_v9 = vmin.f32 %v7171_v46, 0.0  ;;  %v2769_v58 = vld [vmem:[#allocation4 + $0xa8] sm:$0xff] }
 0x3fb   : > { %v4196_v52 = vadd.f32 -1.0, %v4882_v40  ;;  %v3200_v10 = vmax.f32 %v3168_v15, 0.0  ;;  %v3171_v59 = vsel %vm3011_vm8, %v7117_v22, %v4197_v56  ;;  %v2900_v62 = vpop.permute.xlu1 %2899  ;;  %4419 = vmatprep.mubr.bf16.mxu0 %v3228_v4  ;;  %vm3014_vm13 = vcmp.gt.f32.partialorder %v7142_v8, 0.0  ;;  %v2773_v4 = vld [vmem:[#allocation4 + $0xc8] sm:$0xff] }
 0x3fc   : > { %4893 = vpow2.f32 %v3092_v12  ;;  %v3050_v60 = vmin.f32 %v7173_v39, 0.0  ;;  %v4884_v24 = vpop.eup %4883  ;;  %v3098_v38 = vmul.f32 1.442695, %v3051_v9  ;;  %v3203_v18 = vmax.f32 %v3171_v59, 0.0  ;;  %4420 = vmatmul.mubr.bf16.vlgmr.msra.gmra.mrb[0].mxu0 %v3229_v25 }
 0x3fd   : > { %v3170_v61 = vsel %vm3010_vm9, %v7119_v48, %v4196_v52  ;;  %v2895_v23 = vpop.permute.xlu0 %2894  ;;  %v4199_v13 = vadd.f32 -1.0, %v4884_v24  ;;  %v7184_v1 = vmul.f32 %v2900_v62, %v2765_v43  ;;  %v3230_v14 = vpack.c.bf16 %v3201_v47, %v3200_v10  ;;  %v2770_v43 = vld [vmem:[#allocation4 + $0xb0] sm:$0xff] }
 0x3fe   : > { %v4886_v19 = vpop.eup %4885  ;;  %v3096_v22 = vmul.f32 1.442695, %v3050_v60  ;;  %4895 = vpow2.f32 %v3098_v38  ;;  %v7186_v55 = vmul.f32 %v2895_v23, %v2764_v31  ;;  %v3202_v17 = vmax.f32 %v3170_v61, 0.0  ;;  %v2771_v60 = vld [vmem:[#allocation4 + $0xb8] sm:$0xff] }
 0x3ff   : > { %v4198_v50 = vadd.f32 -1.0, %v4886_v19  ;;  %v3173_v48 = vsel %vm3013_vm10, %v7123_v34, %v4199_v13  ;;  %v2910_v44 = vpop.permute.xlu1 %2909  ;;  %v3053_v53 = vmin.f32 %v7184_v1, 0.0  ;;  %4423 = vmatprep.mubr.bf16.mxu0 %v3230_v14  ;;  %vm3017_vm14 = vcmp.gt.f32.partialorder %v7149_v57, 0.0 }
 0x400   : > { %4897 = vpow2.f32 %v3096_v22  ;;  %v4888_v36 = vpop.eup %4887  ;;  %v3205_v7 = vmax.f32 %v3173_v48, 0.0  ;;  %v3052_v35 = vmin.f32 %v7186_v55, 0.0  ;;  %v7197_v26 = vmul.f32 %v2910_v44, %v2767_v27  ;;  %v2772_v44 = vld [vmem:[#allocation4 + $0xc0] sm:$0xff] }
 0x401   : > { %v3172_v28 = vsel %vm3012_vm11, %v7125_v30, %v4198_v50  ;;  %v2905_v45 = vpop.permute.xlu0 %2904  ;;  %v4201_v34 = vadd.f32 -1.0, %v4888_v36  ;;  %v3102_v63 = vmul.f32 1.442695, %v3053_v53  ;;  %v3231_v37 = vpack.c.bf16 %v3203_v18, %v3202_v17  ;;  %v2775_v36 = vld [vmem:[#allocation4 + $0xd8] sm:$0xff] }
 0x402   : > { %v4890_v16 = vpop.eup %4889  ;;  %v3204_v2 = vmax.f32 %v3172_v28, 0.0  ;;  %v7199_v51 = vmul.f32 %v2905_v45, %v2766_v0  ;;  %v3100_v30 = vmul.f32 1.442695, %v3052_v35  ;;  %vm3016_vm15 = vcmp.gt.f32.partialorder %v7154_v20, 0.0 }
 0x403   : > { %v4200_v41 = vadd.f32 -1.0, %v4890_v16  ;;  %v3175_v29 = vsel %vm3015_vm12, %v7134_v21, %v4201_v34  ;;  %v2920_v33 = vpop.permute.xlu1 %2919  ;;  %4899 = vpow2.f32 %v3102_v63  ;;  %v3055_v21 = vmin.f32 %v7197_v26, 0.0 }
 0x404   : > { %v4892_v49 = vpop.eup %4891  ;;  %v3207_v11 = vmax.f32 %v3175_v29, 0.0  ;;  %v3232_v42 = vpack.c.bf16 %v3205_v7, %v3204_v2  ;;  %4901 = vpow2.f32 %v3100_v30  ;;  %v3054_v56 = vmin.f32 %v7199_v51, 0.0  ;;  %4424 = vmatmul.mubr.bf16.gmra.mrb[4].mxu0 %v3231_v37 }
 0x405   : > { %v3174_v32 = vsel %vm3014_vm13, %v7142_v8, %v4200_v41  ;;  %v2915_v15 = vpop.permute.xlu0 %2914  ;;  %v4203_v40 = vadd.f32 -1.0, %v4892_v49  ;;  %v7207_v12 = vmul.f32 %v2920_v33, %v2769_v58  ;;  %v3106_v8 = vmul.f32 1.442695, %v3055_v21 }
 0x406   : > { %v4894_v5 = vpop.eup %4893  ;;  %v3206_v54 = vmax.f32 %v3174_v32, 0.0  ;;  %v7211_v52 = vmul.f32 %v2915_v15, %v2768_v6  ;;  %vm3019_vm0 = vcmp.gt.f32.partialorder %v7171_v46, 0.0  ;;  %vm3018_vm1 = vcmp.gt.f32.partialorder %v7173_v39, 0.0  ;;  %4427 = vmatprep.mubr.bf16.mxu0 %v3232_v42  ;;  %v2777_v15 = vld [vmem:[#allocation4 + $0xe8] sm:$0xff]  ;;  %v2776_v42 = vld [vmem:[#allocation4 + $0xe0] sm:$0xff] }
 0x407   : > { %v4202_v3 = vadd.f32 -1.0, %v4894_v5  ;;  %v3177_v47 = vsel %vm3017_vm14, %v7149_v57, %v4203_v40  ;;  %v2930_v9 = vpop.permute.xlu1 %2929  ;;  %v3104_v59 = vmul.f32 1.442695, %v3054_v56  ;;  %4903 = vpow2.f32 %v3106_v8 }
 0x408   : > { %v4896_v10 = vpop.eup %4895  ;;  %v3233_v31 = vpack.c.bf16 %v3207_v11, %v3206_v54  ;;  %v3057_v38 = vmin.f32 %v7207_v12, 0.0  ;;  %v3209_v23 = vmax.f32 %v3177_v47, 0.0  ;;  %v3056_v18 = vmin.f32 %v7211_v52, 0.0  ;;  %v2774_v11 = vld [vmem:[#allocation4 + $0xd0] sm:$0xff] }
 0x409   : > { %v2925_v62 = vpop.permute.xlu0 %2924  ;;  %v3176_v57 = vsel %vm3016_vm15, %v7154_v20, %v4202_v3  ;;  %v4205_v61 = vadd.f32 -1.0, %v4896_v10  ;;  %4905 = vpow2.f32 %v3104_v59  ;;  %v7221_v25 = vmul.f32 %v2930_v9, %v2771_v60 }
 0x40a   : > { %v4898_v24 = vpop.eup %4897  ;;  %v3110_v22 = vmul.f32 1.442695, %v3057_v38  ;;  %v7223_v50 = vmul.f32 %v2925_v62, %v2770_v43  ;;  %v3208_v17 = vmax.f32 %v3176_v57, 0.0  ;;  %v3108_v14 = vmul.f32 1.442695, %v3056_v18 }
 0x40b   : > { %v4204_v19 = vadd.f32 -1.0, %v4898_v24  ;;  %v3179_v13 = vsel %vm3019_vm0, %v7171_v46, %v4205_v61  ;;  %v2940_v20 = vpop.permute.xlu1 %2939  ;;  %vm3021_vm2 = vcmp.gt.f32.partialorder %v7184_v1, 0.0  ;;  %v3059_v46 = vmin.f32 %v7221_v25, 0.0  ;;  %v2779_v61 = vld [vmem:[#allocation4 + $0xf8] sm:$0xff] }
 0x40c   : > { %v7228_v27 = vmul.f32 %v2940_v20, %v2773_v4  ;;  %4907 = vpow2.f32 %v3110_v22  ;;  %v3211_v28 = vmax.f32 %v3179_v13, 0.0  ;;  %v3058_v45 = vmin.f32 %v7223_v50, 0.0  ;;  %4428 = vmatmul.mubr.bf16.gmra.mrb[8].mxu0 %v3233_v31  ;;  %v2778_v13 = vld [vmem:[#allocation4 + $0xf0] sm:$0xff] }
 0x40d   : > { %v3178_v48 = vsel %vm3018_vm1, %v7173_v39, %v4204_v19  ;;  %v2935_v0 = vpop.permute.xlu0 %2934  ;;  %v4900_v7 = vpop.eup %4899  ;;  %4909 = vpow2.f32 %v3108_v14  ;;  %v3114_v39 = vmul.f32 1.442695, %v3059_v46  ;;  %v3234_v30 = vpack.c.bf16 %v3209_v23, %v3208_v17 }
 0x40e   : > { %v3210_v53 = vmax.f32 %v3178_v48, 0.0  ;;  %v4902_v16 = vpop.eup %4901  ;;  %v4207_v2 = vadd.f32 -1.0, %v4900_v7  ;;  %v3061_v34 = vmin.f32 %v7228_v27, 0.0  ;;  %v7234_v35 = vmul.f32 %v2935_v0, %v2772_v44 }
 0x40f   : > { %v2950_v41 = vpop.permute.xlu1 %2949  ;;  %v4206_v63 = vadd.f32 -1.0, %v4902_v16  ;;  %v3112_v29 = vmul.f32 1.442695, %v3058_v45  ;;  %vm3020_vm3 = vcmp.gt.f32.partialorder %v7186_v55, 0.0  ;;  %4911 = vpow2.f32 %v3114_v39  ;;  %4431 = vmatprep.mubr.bf16.mxu0 %v3234_v30 }
 0x410   : > { %v7236_v37 = vmul.f32 %v2950_v41, %v2775_v36  ;;  %v3181_v33 = vsel %vm3021_vm2, %v7184_v1, %v4207_v2  ;;  %v3118_v49 = vmul.f32 1.442695, %v3061_v34  ;;  %vm3023_vm4 = vcmp.gt.f32.partialorder %v7197_v26, 0.0 }
 0x411   : > { %v2945_v58 = vpop.permute.xlu0 %2944  ;;  %v3180_v32 = vsel %vm3020_vm3, %v7186_v55, %v4206_v63  ;;  %4913 = vpow2.f32 %v3112_v29  ;;  %v3060_v6 = vmin.f32 %v7234_v35, 0.0  ;;  %v4904_v5 = vpop.eup %4903  ;;  %v3213_v54 = vmax.f32 %v3181_v33, 0.0 }
 0x412   : > { %v3212_v40 = vmax.f32 %v3180_v32, 0.0  ;;  %4915 = vpow2.f32 %v3118_v49  ;;  %v3063_v1 = vmin.f32 %v7236_v37, 0.0  ;;  %v4209_v56 = vadd.f32 -1.0, %v4904_v5 }
 0x413   : > { %v2960_v21 = vpop.permute.xlu1 %2959  ;;  %v4906_v3 = vpop.eup %4905  ;;  %v3116_v47 = vmul.f32 1.442695, %v3060_v6  ;;  %v7246_v8 = vmul.f32 %v2945_v58, %v2774_v11  ;;  %v3235_v55 = vpack.c.bf16 %v3211_v28, %v3210_v53  ;;  %vm3022_vm5 = vcmp.gt.f32.partialorder %v7199_v51, 0.0 }
 0x414   : > { %v4208_v10 = vadd.f32 -1.0, %v4906_v3  ;;  %v3122_v59 = vmul.f32 1.442695, %v3063_v1  ;;  %v7248_v60 = vmul.f32 %v2960_v21, %v2777_v15  ;;  %v3183_v62 = vsel %vm3023_vm4, %v7197_v26, %v4209_v56 }
 0x415   : > { %v2955_v9 = vpop.permute.xlu0 %2954  ;;  %4917 = vpow2.f32 %v3116_v47  ;;  %v3062_v31 = vmin.f32 %v7246_v8, 0.0  ;;  %vm3025_vm6 = vcmp.gt.f32.partialorder %v7207_v12, 0.0  ;;  %vm3024_vm7 = vcmp.gt.f32.partialorder %v7211_v52, 0.0  ;;  %4432 = vmatmul.mubr.bf16.gmra.mrb[12].mxu0 %v3235_v55 }
 0x416   : > { %v7250_v43 = vmul.f32 %v2955_v9, %v2776_v42  ;;  %v4908_v24 = vpop.eup %4907  ;;  %v3182_v57 = vsel %vm3022_vm5, %v7199_v51, %v4208_v10  ;;  %4919 = vpow2.f32 %v3122_v59  ;;  %v3215_v23 = vmax.f32 %v3183_v62, 0.0 }
 0x417   : > { %v2970_v38 = vpop.permute.xlu1 %2969  ;;  %v4910_v4 = vpop.eup %4909  ;;  %v4211_v19 = vadd.f32 -1.0, %v4908_v24  ;;  %v3120_v26 = vmul.f32 1.442695, %v3062_v31  ;;  %v3065_v18 = vmin.f32 %v7248_v60, 0.0  ;;  %v3214_v20 = vmax.f32 %v3182_v57, 0.0 }
 0x418   : > { %v4210_v17 = vadd.f32 -1.0, %v4910_v4  ;;  %v3064_v51 = vmin.f32 %v7250_v43, 0.0  ;;  %v3236_v48 = vpack.c.bf16 %v3213_v54, %v3212_v40  ;;  %v7265_v0 = vmul.f32 %v2970_v38, %v2779_v61 }
 0x419   : > { %v2965_v22 = vpop.permute.xlu0 %2964  ;;  %v3185_v14 = vsel %vm3025_vm6, %v7207_v12, %v4211_v19  ;;  %4921 = vpow2.f32 %v3120_v26  ;;  %v3126_v44 = vmul.f32 1.442695, %v3065_v18  ;;  %v4912_v46 = vpop.eup %4911  ;;  %vm3027_vm8 = vcmp.gt.f32.partialorder %v7221_v25, 0.0 }
 0x41a   : > { %v3217_v36 = vmax.f32 %v3185_v14, 0.0  ;;  %v3184_v7 = vsel %vm3024_vm7, %v7211_v52, %v4210_v17  ;;  %v3124_v28 = vmul.f32 1.442695, %v3064_v51  ;;  %4435 = vmatprep.mubr.bf16.mxu0 %v3236_v48  ;;  %v7270_v53 = vmul.f32 %v2965_v22, %v2778_v13  ;;  %v4801_v22 = vld [vmem:[%s7689_s6 + $0x30] sm:$0xff]   ;;  %v7303_v51 = vld [vmem:[%s7688_s5] ss:$0 sm:$0xff] }
 0x41b   : > { %v4914_v45 = vpop.eup %4913  ;;  %v3216_v16 = vmax.f32 %v3184_v7, 0.0  ;;  %v4213_v2 = vadd.f32 -1.0, %v4912_v46  ;;  %4923 = vpow2.f32 %v3126_v44  ;;  %vm3026_vm9 = vcmp.gt.f32.partialorder %v7223_v50, 0.0  ;;  %4463 = vmatprep.subr.bf16.mxu1 %v4801_v22 }
 0x41c   : > { %v4916_v12 = vpop.eup %4915  ;;  %v4212_v39 = vadd.f32 -1.0, %v4914_v45  ;;  %4925 = vpow2.f32 %v3124_v28  ;;  %v3067_v34 = vmin.f32 %v7265_v0, 0.0  ;;  %v3066_v63 = vmin.f32 %v7270_v53, 0.0  ;;  %4464 = vmatpush3.bf16.msra.mxu1 %v4801_v22 }
 0x41d   : > { %v3187_v41 = vsel %vm3027_vm8, %v7221_v25, %v4213_v2  ;;  %v4215_v52 = vadd.f32 -1.0, %v4916_v12  ;;  %v3237_v29 = vpack.c.bf16 %v3215_v23, %v3214_v20  ;;  %vm3029_vm10 = vcmp.gt.f32.partialorder %v7228_v27, 0.0  ;;  %v4802_v20 = vld [vmem:[%s7689_s6 + $0x38] sm:$0xff]  }
 0x41e   : > { %v3186_v30 = vsel %vm3026_vm9, %v7223_v50, %v4212_v39  ;;  %v3130_v58 = vmul.f32 1.442695, %v3067_v34  ;;  %v3238_v33 = vpack.c.bf16 %v3217_v36, %v3216_v16  ;;  %v3219_v11 = vmax.f32 %v3187_v41, 0.0  ;;  %4465 = vmatprep.subr.bf16.mxu1 %v4802_v20 }
 0x41f   : > { %v4918_v49 = vpop.eup %4917  ;;  %v3218_v32 = vmax.f32 %v3186_v30, 0.0  ;;  %v3189_v6 = vsel %vm3029_vm10, %v7228_v27, %v4215_v52  ;;  %v3128_v15 = vmul.f32 1.442695, %v3066_v63  ;;  %4436 = vmatmul.mubr.bf16.gmra.mrb[16].mxu0 %v3237_v29  ;;  %vm3028_vm11 = vcmp.gt.f32.partialorder %v7234_v35, 0.0 }
 0x420   : > { %v4920_v42 = vpop.eup %4919  ;;  %v4214_v5 = vadd.f32 -1.0, %v4918_v49  ;;  %4927 = vpow2.f32 %v3130_v58  ;;  %4439 = vmatprep.mubr.bf16.mxu0 %v3238_v33  ;;  %v3221_v25 = vmax.f32 %v3189_v6, 0.0  ;;  %vm3031_vm12 = vcmp.gt.f32.partialorder %v7236_v37, 0.0  ;;  %4466 = vmatpush3.bf16.msra.mxu1 %v4802_v20 }
 0x421   : > { %v4217_v54 = vadd.f32 -1.0, %v4920_v42  ;;  %4929 = vpow2.f32 %v3128_v15  ;;  %v3239_v21 = vpack.c.bf16 %v3219_v11, %v3218_v32  ;;  %vm3030_vm13 = vcmp.gt.f32.partialorder %v7246_v8, 0.0 }
 0x422   : > { %v3188_v50 = vsel %vm3028_vm11, %v7234_v35, %v4214_v5  ;;  %vm3033_vm14 = vcmp.gt.f32.partialorder %v7248_v60, 0.0  ;;  %vm3032_vm15 = vcmp.gt.f32.partialorder %v7250_v43, 0.0  ;;  %vm3035_vm0 = vcmp.gt.f32.partialorder %v7265_v0, 0.0 }
 0x423   : > { %v4922_v40 = vpop.eup %4921  ;;  %v3220_v1 = vmax.f32 %v3188_v50, 0.0  ;;  %v3191_v27 = vsel %vm3031_vm12, %v7236_v37, %v4217_v54  ;;  %vm3034_vm1 = vcmp.gt.f32.partialorder %v7270_v53, 0.0 }
 0x424   : > { %v4216_v3 = vadd.f32 -1.0, %v4922_v40  ;;  %v3223_v59 = vmax.f32 %v3191_v27, 0.0 }
 0x425   : > { %v4924_v56 = vpop.eup %4923  ;;  %v3240_v47 = vpack.c.bf16 %v3221_v25, %v3220_v1 }
 0x426   : > { %v4926_v55 = vpop.eup %4925  ;;  %v3190_v9 = vsel %vm3030_vm13, %v7246_v8, %v4216_v3  ;;  %v4219_v10 = vadd.f32 -1.0, %v4924_v56 }
 0x427   : > { %v3222_v62 = vmax.f32 %v3190_v9, 0.0  ;;  %v4218_v35 = vadd.f32 -1.0, %v4926_v55  ;;  %4440 = vmatmul.mubr.bf16.gmra.mrb[20].mxu0 %v3239_v21 }
 0x428   : > { %v3193_v31 = vsel %vm3033_vm14, %v7248_v60, %v4219_v10  ;;  %4443 = vmatprep.mubr.bf16.mxu0 %v3240_v47 }
 0x429   : > { %v3225_v37 = vmax.f32 %v3193_v31, 0.0  ;;  %v3192_v24 = vsel %vm3032_vm15, %v7250_v43, %v4218_v35  ;;  %v3241_v8 = vpack.c.bf16 %v3223_v59, %v3222_v62 }
 0x42a   : > { %v4928_v57 = vpop.eup %4927  ;;  %v3224_v61 = vmax.f32 %v3192_v24, 0.0 }
 0x42b   : > { %v4930_v38 = vpop.eup %4929  ;;  %v4221_v4 = vadd.f32 -1.0, %v4928_v57 }
 0x42c   : > { %v4220_v23 = vadd.f32 -1.0, %v4930_v38  ;;  %v3242_v19 = vpack.c.bf16 %v3225_v37, %v3224_v61 }
 0x42d   : > { %v3195_v26 = vsel %vm3035_vm0, %v7265_v0, %v4221_v4 }
 0x42e   : > { %v3194_v60 = vsel %vm3034_vm1, %v7270_v53, %v4220_v23  ;;  %v3227_v18 = vmax.f32 %v3195_v26, 0.0 }
 0x42f   : > { %v3226_v13 = vmax.f32 %v3194_v60, 0.0  ;;  %4444 = vmatmul.mubr.bf16.gmra.mrb[24].mxu0 %v3241_v8 }
 0x430   : > { %4447 = vmatprep.mubr.bf16.mxu0 %v3242_v19 }
 0x431   : > { %v3243_v43 = vpack.c.bf16 %v3227_v18, %v3226_v13 }
 0x437   : > { %4448 = vmatmul.mubr.bf16.gmra.mrb[28].mxu0 %v3243_v43 }
 0x4cf   : > { %v4421_v17 = vpop.f32.mrb[0].mxu0 }
 0x4d0   : > { %v3349_v48 = vpop.f32.mrb[1].mxu0  ;;  %v3358_v44 = vadd.f32 %v4421_v17, %v7303_v51 }
 0x4d1   : > { %v4422_v14 = vpop.f32.mrb[2].mxu0  ;;  %v3350_v36 = vadd.f32 %v7303_v51, %v3349_v48 }
 0x4d2   : > { %v3361_v0 = vadd.f32 %v4422_v14, %v7303_v51  ;;  %v3352_v46 = vpop.f32.mrb[3].mxu0 }
 0x4d3   : > { %v3353_v7 = vadd.f32 %v7303_v51, %v3352_v46 }
 0x4d4   : > { %v3477_v28 = vpack.c.bf16 %v3361_v0, %v3358_v44 }
 0x4d5   : > { %v3476_v53 = vpack.c.bf16 %v3353_v7, %v3350_v36 }
 0x4d7   : > { %v4425_v45 = vpop.f32.mrb[4].mxu0  ;;  %4467 = vmatprep.mubr.bf16.mxu1 %v3476_v53 }
 0x4d8   : > { %v3365_v16 = vpop.f32.mrb[5].mxu0  ;;  %4468 = vmatmul.mubr.bf16.vlgmr.msra.gmra.mrb[0].mxu1 %v3477_v28  ;;  %v3374_v12 = vadd.f32 %v4425_v45, %v7303_v51 }
 0x4d9   : > { %v4426_v2 = vpop.f32.mrb[6].mxu0  ;;  %v3366_v41 = vadd.f32 %v7303_v51, %v3365_v16 }
 0x4da   : > { %v3377_v39 = vadd.f32 %v4426_v2, %v7303_v51  ;;  %v3368_v34 = vpop.f32.mrb[7].mxu0 }
 0x4db   : > { %v3369_v52 = vadd.f32 %v7303_v51, %v3368_v34 }
 0x4dc   : > { %v3479_v63 = vpack.c.bf16 %v3377_v39, %v3374_v12 }
 0x4dd   : > { %v3478_v29 = vpack.c.bf16 %v3369_v52, %v3366_v41  ;;  %v7340_v52 = vld [vmem:[%s7690_s7] ss:$0 sm:$0xff] }
 0x4df   : > { %v4429_v30 = vpop.f32.mrb[8].mxu0  ;;  %4471 = vmatprep.mubr.bf16.mxu1 %v3478_v29 }
 0x4e0   : > { %v3381_v58 = vpop.f32.mrb[9].mxu0  ;;  %4472 = vmatmul.mubr.bf16.gmra.mrb[4].mxu1 %v3479_v63  ;;  %v3390_v49 = vadd.f32 %v4429_v30, %v7303_v51 }
 0x4e1   : > { %v4430_v33 = vpop.f32.mrb[10].mxu0  ;;  %v3382_v6 = vadd.f32 %v7303_v51, %v3381_v58 }
 0x4e2   : > { %v3393_v11 = vadd.f32 %v4430_v33, %v7303_v51  ;;  %v3384_v32 = vpop.f32.mrb[11].mxu0 }
 0x4e3   : > { %v3385_v15 = vadd.f32 %v7303_v51, %v3384_v32 }
 0x4e4   : > { %v3481_v42 = vpack.c.bf16 %v3393_v11, %v3390_v49 }
 0x4e5   : > { %v3480_v5 = vpack.c.bf16 %v3385_v15, %v3382_v6 }
 0x4e7   : > { %4475 = vmatprep.mubr.bf16.mxu1 %v3480_v5 }
 0x4e8   : > { %v4433_v25 = vpop.f32.mrb[12].mxu0  ;;  %4476 = vmatmul.mubr.bf16.gmra.mrb[8].mxu1 %v3481_v42 }
 0x4e9   : > { %v3397_v54 = vpop.f32.mrb[13].mxu0  ;;  %v3406_v40 = vadd.f32 %v4433_v25, %v7303_v51 }
 0x4ea   : > { %v4434_v50 = vpop.f32.mrb[14].mxu0  ;;  %v3398_v27 = vadd.f32 %v7303_v51, %v3397_v54 }
 0x4eb   : > { %v3409_v1 = vadd.f32 %v4434_v50, %v7303_v51  ;;  %v3400_v21 = vpop.f32.mrb[15].mxu0 }
 0x4ec   : > { %v3401_v3 = vadd.f32 %v7303_v51, %v3400_v21 }
 0x4ed   : > { %v3483_v56 = vpack.c.bf16 %v3409_v1, %v3406_v40 }
 0x4ee   : > { %v3482_v47 = vpack.c.bf16 %v3401_v3, %v3398_v27 }
 0x4f0   : > { %4479 = vmatprep.mubr.bf16.mxu1 %v3482_v47 }
 0x4f1   : > { %4480 = vmatmul.mubr.bf16.gmra.mrb[12].mxu1 %v3483_v56 }
 0x4f2   : > { %v4437_v55 = vpop.f32.mrb[16].mxu0 }
 0x4f3   : > { %v3413_v9 = vpop.f32.mrb[17].mxu0  ;;  %v3422_v59 = vadd.f32 %v4437_v55, %v7303_v51 }
 0x4f4   : > { %v4438_v10 = vpop.f32.mrb[18].mxu0  ;;  %v3414_v31 = vadd.f32 %v7303_v51, %v3413_v9 }
 0x4f5   : > { %v3425_v62 = vadd.f32 %v4438_v10, %v7303_v51  ;;  %v3416_v35 = vpop.f32.mrb[19].mxu0 }
 0x4f6   : > { %v3417_v37 = vadd.f32 %v7303_v51, %v3416_v35 }
 0x4f7   : > { %v3485_v24 = vpack.c.bf16 %v3425_v62, %v3422_v59 }
 0x4f8   : > { %v3484_v57 = vpack.c.bf16 %v3417_v37, %v3414_v31 }
 0x4fa   : > { %v4441_v61 = vpop.f32.mrb[20].mxu0  ;;  %4483 = vmatprep.mubr.bf16.mxu1 %v3484_v57 }
 0x4fb   : > { %v3429_v38 = vpop.f32.mrb[21].mxu0  ;;  %4484 = vmatmul.mubr.bf16.gmra.mrb[16].mxu1 %v3485_v24  ;;  %v3438_v8 = vadd.f32 %v4441_v61, %v7303_v51 }
 0x4fc   : > { %v4442_v4 = vpop.f32.mrb[22].mxu0  ;;  %v3430_v26 = vadd.f32 %v7303_v51, %v3429_v38 }
 0x4fd   : > { %v3441_v23 = vadd.f32 %v4442_v4, %v7303_v51  ;;  %v3432_v19 = vpop.f32.mrb[23].mxu0 }
 0x4fe   : > { %v3433_v60 = vadd.f32 %v7303_v51, %v3432_v19 }
 0x4ff   : > { %v3487_v18 = vpack.c.bf16 %v3441_v23, %v3438_v8 }
 0x500   : > { %v3486_v13 = vpack.c.bf16 %v3433_v60, %v3430_v26 }
 0x502   : > { %v4445_v43 = vpop.f32.mrb[24].mxu0  ;;  %4487 = vmatprep.mubr.bf16.mxu1 %v3486_v13 }
 0x503   : > { %v3445_v22 = vpop.f32.mrb[25].mxu0  ;;  %4488 = vmatmul.mubr.bf16.gmra.mrb[20].mxu1 %v3487_v18  ;;  %v3454_v17 = vadd.f32 %v4445_v43, %v7303_v51 }
 0x504   : > { %v4446_v20 = vpop.f32.mrb[26].mxu0  ;;  %v3446_v44 = vadd.f32 %v7303_v51, %v3445_v22 }
 0x505   : > { %v3457_v48 = vadd.f32 %v4446_v20, %v7303_v51  ;;  %v3448_v14 = vpop.f32.mrb[27].mxu0 }
 0x506   : > { %v3449_v0 = vadd.f32 %v7303_v51, %v3448_v14 }
 0x507   : > { %v3489_v46 = vpack.c.bf16 %v3457_v48, %v3454_v17 }
 0x508   : > { %v3488_v36 = vpack.c.bf16 %v3449_v0, %v3446_v44 }
 0x50a   : > { %v4449_v7 = vpop.f32.mrb[28].mxu0  ;;  %4491 = vmatprep.mubr.bf16.mxu1 %v3488_v36 }
 0x50b   : > { %v3461_v28 = vpop.f32.mrb[29].mxu0  ;;  %4492 = vmatmul.mubr.bf16.gmra.mrb[24].mxu1 %v3489_v46  ;;  %v3470_v45 = vadd.f32 %v4449_v7, %v7303_v51 }
 0x50c   : > { %v4450_v53 = vpop.f32.mrb[30].mxu0  ;;  %v3462_v12 = vadd.f32 %v7303_v51, %v3461_v28 }
 0x50d   : > { %v3473_v16 = vadd.f32 %v4450_v53, %v7303_v51  ;;  %v3464_v2 = vpop.f32.mrb[31].mxu0 }
 0x50e   : > { %v3465_v39 = vadd.f32 %v7303_v51, %v3464_v2 }
 0x50f   : > { %v3491_v34 = vpack.c.bf16 %v3473_v16, %v3470_v45 }
 0x510   : > { %v3490_v41 = vpack.c.bf16 %v3465_v39, %v3462_v12 }
 0x512   : > { %4495 = vmatprep.mubr.bf16.mxu1 %v3490_v41 }
 0x513   : > { %4496 = vmatmul.mubr.bf16.gmra.mrb[28].mxu1 %v3491_v34 }
 0x5ab   : > { %v4469_v63 = vpop.f32.mrb[0].mxu1 }
 0x5ac   : > { %v7343_v29 = vadd.f32 %v4469_v63, %v7340_v52  ;;  %v3597_v30 = vpop.f32.mrb[1].mxu1 }
 0x5ad   : > { %v4470_v58 = vpop.f32.mrb[2].mxu1  ;;  %v7350_v49 = vadd.f32 %v7340_v52, %v3597_v30 }
 0x5ae   : > { %3728 = vmax.xlane.f32.xlu0 %v7343_v29  ;;  %v3600_v33 = vpop.f32.mrb[3].mxu1  ;;  %v7355_v32 = vadd.f32 %v4470_v58, %v7340_v52 }
 0x5af   : > { %v7347_v51 = vadd.f32 %v7340_v52, %v3600_v33 }
 0x5b1   : > { %3726 = vmax.xlane.f32.xlu1 %v7347_v51 }
 0x5b2   : > { %3724 = vmax.xlane.f32.xlu0 %v7350_v49 }
 0x5b3   : > { %v4473_v11 = vpop.f32.mrb[4].mxu1 }
 0x5b4   : > { %v7358_v6 = vadd.f32 %v4473_v11, %v7340_v52  ;;  %v3613_v15 = vpop.f32.mrb[5].mxu1 }
 0x5b5   : > { %v4474_v42 = vpop.f32.mrb[6].mxu1  ;;  %v7363_v25 = vadd.f32 %v7340_v52, %v3613_v15 }
 0x5b6   : > { %3730 = vmax.xlane.f32.xlu0 %v7355_v32  ;;  %3736 = vmax.xlane.f32.xlu1 %v7358_v6  ;;  %v3616_v5 = vpop.f32.mrb[7].mxu1  ;;  %v7366_v54 = vadd.f32 %v4474_v42, %v7340_v52 }
 0x5b7   : > { %v7371_v40 = vadd.f32 %v7340_v52, %v3616_v5 }
 0x5ba   : > { %3738 = vmax.xlane.f32.xlu0 %v7366_v54  ;;  %3732 = vmax.xlane.f32.xlu1 %v7363_v25 }
 0x5bb   : > { %v4477_v50 = vpop.f32.mrb[8].mxu1 }
 0x5bc   : > { %v7374_v1 = vadd.f32 %v4477_v50, %v7340_v52  ;;  %v3629_v21 = vpop.f32.mrb[9].mxu1 }
 0x5bd   : > { %v4478_v27 = vpop.f32.mrb[10].mxu1  ;;  %v7379_v56 = vadd.f32 %v7340_v52, %v3629_v21 }
 0x5be   : > { %3734 = vmax.xlane.f32.xlu0 %v7371_v40  ;;  %3744 = vmax.xlane.f32.xlu1 %v7374_v1  ;;  %v3632_v3 = vpop.f32.mrb[11].mxu1  ;;  %v7382_v47 = vadd.f32 %v4478_v27, %v7340_v52 }
 0x5bf   : > { %v7387_v9 = vadd.f32 %v7340_v52, %v3632_v3 }
 0x5c2   : > { %3746 = vmax.xlane.f32.xlu0 %v7382_v47  ;;  %3740 = vmax.xlane.f32.xlu1 %v7379_v56 }
 0x5c4   : > { %v4481_v55 = vpop.f32.mrb[12].mxu1 }
 0x5c5   : > { %v7390_v10 = vadd.f32 %v4481_v55, %v7340_v52  ;;  %v3645_v59 = vpop.f32.mrb[13].mxu1 }
 0x5c6   : > { %v4482_v62 = vpop.f32.mrb[14].mxu1  ;;  %3742 = vmax.xlane.f32.xlu0 %v7387_v9  ;;  %v7395_v31 = vadd.f32 %v7340_v52, %v3645_v59 }
 0x5c7   : > { %3752 = vmax.xlane.f32.xlu1 %v7390_v10  ;;  %v3648_v35 = vpop.f32.mrb[15].mxu1  ;;  %v7398_v37 = vadd.f32 %v4482_v62, %v7340_v52 }
 0x5c8   : > { %v7403_v24 = vadd.f32 %v7340_v52, %v3648_v35 }
 0x5ca   : > { %3754 = vmax.xlane.f32.xlu0 %v7398_v37 }
 0x5cb   : > { %3748 = vmax.xlane.f32.xlu1 %v7395_v31 }
 0x5ce   : > { %v4485_v57 = vpop.f32.mrb[16].mxu1  ;;  %3750 = vmax.xlane.f32.xlu0 %v7403_v24 }
 0x5cf   : > { %v7406_v61 = vadd.f32 %v4485_v57, %v7340_v52  ;;  %v3661_v38 = vpop.f32.mrb[17].mxu1 }
 0x5d0   : > { %v4486_v4 = vpop.f32.mrb[18].mxu1  ;;  %v7414_v19 = vadd.f32 %v7340_v52, %v3661_v38 }
 0x5d1   : > { %3760 = vmax.xlane.f32.xlu1 %v7406_v61  ;;  %v3664_v8 = vpop.f32.mrb[19].mxu1  ;;  %v7411_v23 = vadd.f32 %v4486_v4, %v7340_v52 }
 0x5d2   : > { %v7419_v26 = vadd.f32 %v7340_v52, %v3664_v8 }
 0x5d3   : > { %3762 = vmax.xlane.f32.xlu0 %v7411_v23 }
 0x5d5   : > { %3756 = vmax.xlane.f32.xlu1 %v7414_v19 }
 0x5d6   : > { %v4489_v60 = vpop.f32.mrb[20].mxu1 }
 0x5d7   : > { %v7422_v18 = vadd.f32 %v4489_v60, %v7340_v52  ;;  %v3677_v13 = vpop.f32.mrb[21].mxu1  ;;  %3758 = vmax.xlane.f32.xlu0 %v7419_v26 }
 0x5d8   : > { %v4490_v43 = vpop.f32.mrb[22].mxu1  ;;  %v7430_v17 = vadd.f32 %v7340_v52, %v3677_v13 }
 0x5d9   : > { %3768 = vmax.xlane.f32.xlu1 %v7422_v18  ;;  %v3680_v22 = vpop.f32.mrb[23].mxu1  ;;  %v7427_v20 = vadd.f32 %v4490_v43, %v7340_v52 }
 0x5da   : > { %v7435_v48 = vadd.f32 %v7340_v52, %v3680_v22 }
 0x5db   : > { %3770 = vmax.xlane.f32.xlu0 %v7427_v20 }
 0x5dd   : > { %3764 = vmax.xlane.f32.xlu1 %v7430_v17 }
 0x5de   : > { %v4493_v14 = vpop.f32.mrb[24].mxu1 }
 0x5df   : > { %v7438_v44 = vadd.f32 %v4493_v14, %v7340_v52  ;;  %v3693_v0 = vpop.f32.mrb[25].mxu1  ;;  %3766 = vmax.xlane.f32.xlu0 %v7435_v48 }
 0x5e0   : > { %v4494_v46 = vpop.f32.mrb[26].mxu1  ;;  %v7446_v28 = vadd.f32 %v7340_v52, %v3693_v0 }
 0x5e1   : > { %3776 = vmax.xlane.f32.xlu1 %v7438_v44  ;;  %v3696_v36 = vpop.f32.mrb[27].mxu1  ;;  %v7443_v7 = vadd.f32 %v4494_v46, %v7340_v52 }
 0x5e2   : > { %v7451_v53 = vadd.f32 %v7340_v52, %v3696_v36 }
 0x5e3   : > { %3778 = vmax.xlane.f32.xlu0 %v7443_v7 }
 0x5e5   : > { %3772 = vmax.xlane.f32.xlu1 %v7446_v28 }
 0x5e6   : > { %v4497_v45 = vpop.f32.mrb[28].mxu1 }
 0x5e7   : > { %v3709_v16 = vpop.f32.mrb[29].mxu1  ;;  %3774 = vmax.xlane.f32.xlu0 %v7451_v53  ;;  %v7465_v63 = vadd.f32 %v4497_v45, %v7340_v52 }
 0x5e8   : > { %v7454_v2 = vadd.f32 %v7340_v52, %v3709_v16  ;;  %v4498_v12 = vpop.f32.mrb[30].mxu1 }
 0x5e9   : > { %v7458_v39 = vadd.f32 %v4498_v12, %v7340_v52  ;;  %v3712_v34 = vpop.f32.mrb[31].mxu1 }
 0x5ea   : > { %v7461_v41 = vadd.f32 %v7340_v52, %v3712_v34  ;;  %3780 = vmax.xlane.f32.xlu1 %v7454_v2 }
 0x5ec   : > { %3782 = vmax.xlane.f32.xlu0 %v7461_v41 }
 0x5ee   : > { %3784 = vmax.xlane.f32.xlu1 %v7465_v63 }
 0x5f0   : > { %3786 = vmax.xlane.f32.xlu0 %v7458_v39 }
 0x63b   : > { %v3729_v30 = vpop.xlane.xlu0 %3728 }
 0x63c   : > { %v3790_v58 = vsub.f32 %v7343_v29, %v3729_v30 }
 0x63e   : > { %v3824_v33 = vmul.f32 1.442695, %v3790_v58  ;;  %v3727_v11 = vpop.xlane.xlu1 %3726 }
 0x63f   : > { %v3725_v15 = vpop.xlane.xlu0 %3724  ;;  %v3789_v3 = vsub.f32 %v7347_v51, %v3727_v11 }
 0x640   : > { %4931 = vpow2.f32 %v3824_v33  ;;  %v3788_v42 = vsub.f32 %v7350_v49, %v3725_v15 }
 0x641   : > { %v3822_v57 = vmul.f32 1.442695, %v3789_v3 }
 0x642   : > { %v3820_v5 = vmul.f32 1.442695, %v3788_v42 }
 0x643   : > { %v3737_v50 = vpop.xlane.xlu1 %3736  ;;  %v3731_v21 = vpop.xlane.xlu0 %3730 }
 0x644   : > { %4933 = vpow2.f32 %v3820_v5  ;;  %v3794_v52 = vsub.f32 %v7358_v6, %v3737_v50  ;;  %v3791_v27 = vsub.f32 %v7355_v32, %v3731_v21 }
 0x646   : > { %v3832_v55 = vmul.f32 1.442695, %v3794_v52  ;;  %v3826_v59 = vmul.f32 1.442695, %v3791_v27 }
 0x647   : > { %v3733_v62 = vpop.xlane.xlu1 %3732  ;;  %v3739_v29 = vpop.xlane.xlu0 %3738 }
 0x648   : > { %4935 = vpow2.f32 %v3832_v55  ;;  %v3792_v35 = vsub.f32 %v7363_v25, %v3733_v62  ;;  %v3795_v49 = vsub.f32 %v7366_v54, %v3739_v29 }
 0x649   : > { %4937 = vpow2.f32 %v3826_v59 }
 0x64a   : > { %v7477_v38 = vpop.eup %4931  ;;  %v3828_v4 = vmul.f32 1.442695, %v3792_v35  ;;  %v3834_v6 = vmul.f32 1.442695, %v3795_v49 }
 0x64b   : > { %v3745_v8 = vpop.xlane.xlu1 %3744  ;;  %3888 = vadd.xlane.f32.xlu1 %v7477_v38  ;;  %v3735_v32 = vpop.xlane.xlu0 %3734 }
 0x64c   : > { %4939 = vpow2.f32 %v3828_v4  ;;  %v3798_v51 = vsub.f32 %v7374_v1, %v3745_v8  ;;  %v3793_v60 = vsub.f32 %v7371_v40, %v3735_v32 }
 0x64d   : > { %4941 = vpow2.f32 %v3822_v57 }
 0x64e   : > { %v7482_v13 = vpop.eup %4933  ;;  %v3840_v25 = vmul.f32 1.442695, %v3798_v51  ;;  %v3830_v14 = vmul.f32 1.442695, %v3793_v60 }
 0x64f   : > { %v3741_v43 = vpop.xlane.xlu1 %3740  ;;  %3884 = vadd.xlane.f32.xlu1 %v7482_v13  ;;  %v3747_v54 = vpop.xlane.xlu0 %3746 }
 0x650   : > { %4943 = vpow2.f32 %v3840_v25  ;;  %v3796_v22 = vsub.f32 %v7379_v56, %v3741_v43  ;;  %v3799_v0 = vsub.f32 %v7382_v47, %v3747_v54 }
 0x651   : > { %4945 = vpow2.f32 %v3834_v6 }
 0x652   : > { %v7487_v46 = vpop.eup %4935  ;;  %v3836_v1 = vmul.f32 1.442695, %v3796_v22  ;;  %v3842_v56 = vmul.f32 1.442695, %v3799_v0 }
 0x653   : > { %v7489_v36 = vpop.eup %4937  ;;  %3896 = vadd.xlane.f32.xlu1 %v7487_v46  ;;  %v3743_v45 = vpop.xlane.xlu0 %3742 }
 0x654   : > { %v3753_v40 = vpop.xlane.xlu1 %3752  ;;  %4947 = vpow2.f32 %v3836_v1  ;;  %3890 = vadd.xlane.f32.xlu0 %v7489_v36  ;;  %v3797_v12 = vsub.f32 %v7387_v9, %v3743_v45 }
 0x655   : > { %v3802_v16 = vsub.f32 %v7390_v10, %v3753_v40  ;;  %4949 = vpow2.f32 %v3830_v14 }
 0x656   : > { %v7495_v34 = vpop.eup %4939  ;;  %v3838_v15 = vmul.f32 1.442695, %v3797_v12 }
 0x657   : > { %v3848_v47 = vmul.f32 1.442695, %v3802_v16  ;;  %v7497_v30 = vpop.eup %4941  ;;  %3892 = vadd.xlane.f32.xlu1 %v7495_v34  ;;  %v3755_v33 = vpop.xlane.xlu0 %3754 }
 0x658   : > { %v3749_v58 = vpop.xlane.xlu1 %3748  ;;  %3886 = vadd.xlane.f32.xlu0 %v7497_v30  ;;  %v3803_v10 = vsub.f32 %v7398_v37, %v3755_v33 }
 0x659   : > { %4951 = vpow2.f32 %v3848_v47  ;;  %v3800_v11 = vsub.f32 %v7395_v31, %v3749_v58 }
 0x65a   : > { %4953 = vpow2.f32 %v3842_v56  ;;  %v7503_v42 = vpop.eup %4943  ;;  %v3850_v21 = vmul.f32 1.442695, %v3803_v10 }
 0x65b   : > { %v3844_v9 = vmul.f32 1.442695, %v3800_v11  ;;  %v7505_v5 = vpop.eup %4945  ;;  %3904 = vadd.xlane.f32.xlu1 %v7503_v42  ;;  %v3751_v50 = vpop.xlane.xlu0 %3750 }
 0x65c   : > { %3898 = vadd.xlane.f32.xlu0 %v7505_v5  ;;  %v3801_v31 = vsub.f32 %v7403_v24, %v3751_v50 }
 0x65d   : > { %4955 = vpow2.f32 %v3844_v9 }
 0x65e   : > { %v3761_v52 = vpop.xlane.xlu1 %3760  ;;  %4957 = vpow2.f32 %v3838_v15  ;;  %v7511_v27 = vpop.eup %4947  ;;  %v3846_v62 = vmul.f32 1.442695, %v3801_v31 }
 0x65f   : > { %v3806_v37 = vsub.f32 %v7406_v61, %v3761_v52  ;;  %v7513_v3 = vpop.eup %4949  ;;  %3900 = vadd.xlane.f32.xlu1 %v7511_v27  ;;  %4959 = vpow2.f32 %v3850_v21 }
 0x660   : > { %v3763_v59 = vpop.xlane.xlu0 %3762  ;;  %3894 = vadd.xlane.f32.xlu0 %v7513_v3 }
 0x661   : > { %v3856_v55 = vmul.f32 1.442695, %v3806_v37  ;;  %v3807_v35 = vsub.f32 %v7411_v23, %v3763_v59 }
 0x662   : > { %v3757_v29 = vpop.xlane.xlu1 %3756 }
 0x663   : > { %4961 = vpow2.f32 %v3856_v55  ;;  %v3804_v24 = vsub.f32 %v7414_v19, %v3757_v29  ;;  %v7519_v57 = vpop.eup %4951  ;;  %v3858_v8 = vmul.f32 1.442695, %v3807_v35 }
 0x664   : > { %v7521_v61 = vpop.eup %4953  ;;  %3912 = vadd.xlane.f32.xlu1 %v7519_v57  ;;  %v3759_v4 = vpop.xlane.xlu0 %3758  ;;  %4963 = vpow2.f32 %v3846_v62 }
 0x665   : > { %v3852_v49 = vmul.f32 1.442695, %v3804_v24  ;;  %3906 = vadd.xlane.f32.xlu0 %v7521_v61  ;;  %v3805_v51 = vsub.f32 %v7419_v26, %v3759_v4 }
 0x666   : > { %v3769_v32 = vpop.xlane.xlu1 %3768 }
 0x667   : > { %4965 = vpow2.f32 %v3852_v49  ;;  %v3810_v23 = vsub.f32 %v7422_v18, %v3769_v32  ;;  %v7527_v6 = vpop.eup %4955  ;;  %v3854_v43 = vmul.f32 1.442695, %v3805_v51 }
 0x668   : > { %v7529_v19 = vpop.eup %4957  ;;  %3908 = vadd.xlane.f32.xlu1 %v7527_v6  ;;  %v3771_v25 = vpop.xlane.xlu0 %3770  ;;  %4967 = vpow2.f32 %v3858_v8 }
 0x669   : > { %v3864_v60 = vmul.f32 1.442695, %v3810_v23  ;;  %3902 = vadd.xlane.f32.xlu0 %v7529_v19  ;;  %v3811_v22 = vsub.f32 %v7427_v20, %v3771_v25  ;;  %v7535_v14 = vpop.eup %4959 }
 0x66a   : > { %v3765_v54 = vpop.xlane.xlu1 %3764 }
 0x66b   : > { %4969 = vpow2.f32 %v3864_v60  ;;  %v3808_v26 = vsub.f32 %v7430_v17, %v3765_v54  ;;  %v3866_v40 = vmul.f32 1.442695, %v3811_v22 }
 0x66c   : > { %v3767_v1 = vpop.xlane.xlu0 %3766  ;;  %4971 = vpow2.f32 %v3854_v43 }
 0x66d   : > { %v7537_v18 = vpop.eup %4961  ;;  %v3860_v0 = vmul.f32 1.442695, %v3808_v26  ;;  %3914 = vadd.xlane.f32.xlu0 %v7535_v14  ;;  %v3809_v16 = vsub.f32 %v7435_v48, %v3767_v1 }
 0x66e   : > { %v3777_v45 = vpop.xlane.xlu1 %3776  ;;  %3920 = vadd.xlane.f32.xlu1 %v7537_v18  ;;  %v7543_v56 = vpop.eup %4963 }
 0x66f   : > { %4973 = vpow2.f32 %v3860_v0  ;;  %v3814_v20 = vsub.f32 %v7438_v44, %v3777_v45  ;;  %v3862_v58 = vmul.f32 1.442695, %v3809_v16 }
 0x670   : > { %v3779_v47 = vpop.xlane.xlu0 %3778  ;;  %4975 = vpow2.f32 %v3866_v40 }
 0x671   : > { %v7545_v17 = vpop.eup %4965  ;;  %v3872_v12 = vmul.f32 1.442695, %v3814_v20  ;;  %3910 = vadd.xlane.f32.xlu0 %v7543_v56  ;;  %v3815_v48 = vsub.f32 %v7443_v7, %v3779_v47 }
 0x672   : > { %v3773_v33 = vpop.xlane.xlu1 %3772  ;;  %3916 = vadd.xlane.f32.xlu1 %v7545_v17  ;;  %v7551_v10 = vpop.eup %4967 }
 0x673   : > { %4977 = vpow2.f32 %v3872_v12  ;;  %v3812_v11 = vsub.f32 %v7446_v28, %v3773_v33  ;;  %v3874_v50 = vmul.f32 1.442695, %v3815_v48 }
 0x674   : > { %v3775_v9 = vpop.xlane.xlu0 %3774  ;;  %4979 = vpow2.f32 %v3862_v58 }
 0x675   : > { %v7553_v44 = vpop.eup %4969  ;;  %v3868_v15 = vmul.f32 1.442695, %v3812_v11  ;;  %3922 = vadd.xlane.f32.xlu0 %v7551_v10  ;;  %v3813_v21 = vsub.f32 %v7451_v53, %v3775_v9 }
 0x676   : > { %3928 = vadd.xlane.f32.xlu1 %v7553_v44  ;;  %v7558_v31 = vpop.eup %4971 }
 0x677   : > { %4981 = vpow2.f32 %v3868_v15  ;;  %v3781_v52 = vpop.xlane.xlu1 %3780  ;;  %v3870_v59 = vmul.f32 1.442695, %v3813_v21 }
 0x678   : > { %v3816_v7 = vsub.f32 %v7454_v2, %v3781_v52  ;;  %4983 = vpow2.f32 %v3874_v50 }
 0x679   : > { %v7561_v28 = vpop.eup %4973  ;;  %v3783_v37 = vpop.xlane.xlu0 %3782  ;;  %3918 = vadd.xlane.f32.xlu0 %v7558_v31 }
 0x67a   : > { %v3876_v55 = vmul.f32 1.442695, %v3816_v7  ;;  %3924 = vadd.xlane.f32.xlu1 %v7561_v28  ;;  %v3817_v62 = vsub.f32 %v7461_v41, %v3783_v37  ;;  %v7566_v35 = vpop.eup %4975 }
 0x67b   : > { %v3785_v29 = vpop.xlane.xlu1 %3784 }
 0x67c   : > { %4985 = vpow2.f32 %v3876_v55  ;;  %v3818_v53 = vsub.f32 %v7465_v63, %v3785_v29  ;;  %v3878_v4 = vmul.f32 1.442695, %v3817_v62 }
 0x67d   : > { %v7569_v24 = vpop.eup %4977  ;;  %v3787_v2 = vpop.xlane.xlu0 %3786  ;;  %3930 = vadd.xlane.f32.xlu0 %v7566_v35  ;;  %4987 = vpow2.f32 %v3870_v59 }
 0x67e   : > { %v3880_v49 = vmul.f32 1.442695, %v3818_v53  ;;  %3936 = vadd.xlane.f32.xlu1 %v7569_v24  ;;  %v3819_v8 = vsub.f32 %v7458_v39, %v3787_v2  ;;  %v7574_v32 = vpop.eup %4979 }
 0x680   : > { %4989 = vpow2.f32 %v3880_v49  ;;  %v3882_v63 = vmul.f32 1.442695, %v3819_v8 }
 0x681   : > { %v7576_v41 = vpop.eup %4981  ;;  %3926 = vadd.xlane.f32.xlu0 %v7574_v32  ;;  %4991 = vpow2.f32 %v3878_v4 }
 0x682   : > { %3932 = vadd.xlane.f32.xlu1 %v7576_v41  ;;  %v7580_v51 = vpop.eup %4983  ;;  %4993 = vpow2.f32 %v3882_v63 }
 0x685   : > { %3938 = vadd.xlane.f32.xlu0 %v7580_v51 }
 0x686   : > { %v7582_v23 = vpop.eup %4985 }
 0x687   : > { %3940 = vadd.xlane.f32.xlu1 %v7582_v23  ;;  %v7586_v39 = vpop.eup %4987 }
 0x689   : > { %3934 = vadd.xlane.f32.xlu0 %v7586_v39 }
 0x68a   : > { %v7588_v60 = vpop.eup %4989 }
 0x68b   : > { %3944 = vadd.xlane.f32.xlu1 %v7588_v60  ;;  %v7592_v25 = vpop.eup %4991 }
 0x68c   : > { %v7595_v43 = vpop.eup %4993 }
 0x68d   : > { %3942 = vadd.xlane.f32.xlu0 %v7592_v25 }
 0x691   : > { %3946 = vadd.xlane.f32.xlu0 %v7595_v43 }
 0x6d8   : > { %v3889_v54 = vpop.xlane.xlu1 %3888 }
 0x6d9   : > { %4995 = vrcp.f32 %v3889_v54 }
 0x6dc   : > { %v3885_v22 = vpop.xlane.xlu1 %3884 }
 0x6dd   : > { %4997 = vrcp.f32 %v3885_v22 }
 0x6e0   : > { %v3897_v26 = vpop.xlane.xlu1 %3896 }
 0x6e1   : > { %4999 = vrcp.f32 %v3897_v26  ;;  %v3891_v0 = vpop.xlane.xlu0 %3890 }
 0x6e2   : > { %5001 = vrcp.f32 %v3891_v0 }
 0x6e3   : > { %v4996_v1 = vpop.eup %4995 }
 0x6e4   : > { %v3982_v40 = vmul.f32 %v4996_v1, %v7477_v38  ;;  %v3893_v45 = vpop.xlane.xlu1 %3892 }
 0x6e5   : > { %5003 = vrcp.f32 %v3893_v45  ;;  %v3887_v16 = vpop.xlane.xlu0 %3886 }
 0x6e6   : > { %4014 = vst [vmem:[%s5306_s15 + $0x10] sm:$0xff] %v3982_v40  ;;  %5005 = vrcp.f32 %v3887_v16 }
 0x6e7   : > { %v4998_v20 = vpop.eup %4997 }
 0x6e8   : > { %v3980_v12 = vmul.f32 %v4998_v20, %v7482_v13  ;;  %v3905_v47 = vpop.xlane.xlu1 %3904 }
 0x6e9   : > { %5007 = vrcp.f32 %v3905_v47  ;;  %v3899_v58 = vpop.xlane.xlu0 %3898 }
 0x6ea   : > { %4012 = vst [vmem:[%s5306_s15] sm:$0xff] %v3980_v12  ;;  %5009 = vrcp.f32 %v3899_v58 }
 0x6eb   : > { %v5000_v33 = vpop.eup %4999 }
 0x6ec   : > { %v5002_v11 = vpop.eup %5001  ;;  %v3986_v38 = vmul.f32 %v5000_v33, %v7487_v46  ;;  %v3901_v48 = vpop.xlane.xlu1 %3900 }
 0x6ed   : > { %v3983_v15 = vmul.f32 %v5002_v11, %v7489_v36  ;;  %5011 = vrcp.f32 %v3901_v48  ;;  %v3895_v9 = vpop.xlane.xlu0 %3894 }
 0x6ee   : > { %4018 = vst [vmem:[%s5306_s15 + $0x30] sm:$0xff] %v3986_v38  ;;  %5013 = vrcp.f32 %v3895_v9 }
 0x6ef   : > { %v5004_v13 = vpop.eup %5003  ;;  %4015 = vst [vmem:[%s5306_s15 + $0x18] sm:$0xff] %v3983_v15 }
 0x6f0   : > { %v5006_v50 = vpop.eup %5005  ;;  %v3984_v21 = vmul.f32 %v5004_v13, %v7495_v34 }
 0x6f1   : > { %v3913_v52 = vpop.xlane.xlu1 %3912  ;;  %v3981_v7 = vmul.f32 %v5006_v50, %v7497_v30 }
 0x6f2   : > { %5015 = vrcp.f32 %v3913_v52  ;;  %v3907_v46 = vpop.xlane.xlu0 %3906  ;;  %4016 = vst [vmem:[%s5306_s15 + $0x20] sm:$0xff] %v3984_v21 }
 0x6f3   : > { %5017 = vrcp.f32 %v3907_v46  ;;  %v5008_v36 = vpop.eup %5007  ;;  %4013 = vst [vmem:[%s5306_s15 + $0x8] sm:$0xff] %v3981_v7 }
 0x6f4   : > { %v5010_v37 = vpop.eup %5009  ;;  %v3990_v55 = vmul.f32 %v5008_v36, %v7503_v42 }
 0x6f5   : > { %v3909_v59 = vpop.xlane.xlu1 %3908  ;;  %v3987_v62 = vmul.f32 %v5010_v37, %v7505_v5 }
 0x6f6   : > { %5019 = vrcp.f32 %v3909_v59  ;;  %v3903_v34 = vpop.xlane.xlu0 %3902  ;;  %4022 = vst [vmem:[%s5306_s15 + $0x50] sm:$0xff] %v3990_v55 }
 0x6f7   : > { %5021 = vrcp.f32 %v3903_v34  ;;  %v5012_v30 = vpop.eup %5011  ;;  %4019 = vst [vmem:[%s5306_s15 + $0x38] sm:$0xff] %v3987_v62 }
 0x6f8   : > { %v5014_v29 = vpop.eup %5013  ;;  %v3988_v53 = vmul.f32 %v5012_v30, %v7511_v27 }
 0x6f9   : > { %v3985_v2 = vmul.f32 %v5014_v29, %v7513_v3 }
 0x6fa   : > { %v3915_v4 = vpop.xlane.xlu0 %3914  ;;  %4020 = vst [vmem:[%s5306_s15 + $0x40] sm:$0xff] %v3988_v53 }
 0x6fb   : > { %v3921_v49 = vpop.xlane.xlu1 %3920  ;;  %4017 = vst [vmem:[%s5306_s15 + $0x28] sm:$0xff] %v3985_v2 }
 0x6fc   : > { %5023 = vrcp.f32 %v3921_v49  ;;  %v5016_v42 = vpop.eup %5015 }
 0x6fd   : > { %5025 = vrcp.f32 %v3915_v4  ;;  %v5018_v5 = vpop.eup %5017  ;;  %v3994_v8 = vmul.f32 %v5016_v42, %v7519_v57 }
 0x6fe   : > { %v3991_v63 = vmul.f32 %v5018_v5, %v7521_v61  ;;  %v3911_v22 = vpop.xlane.xlu0 %3910 }
 0x6ff   : > { %v3917_v54 = vpop.xlane.xlu1 %3916  ;;  %4026 = vst [vmem:[%s5306_s15 + $0x70] sm:$0xff] %v3994_v8 }
 0x700   : > { %5027 = vrcp.f32 %v3917_v54  ;;  %v5020_v27 = vpop.eup %5019  ;;  %4023 = vst [vmem:[%s5306_s15 + $0x58] sm:$0xff] %v3991_v63 }
 0x701   : > { %5029 = vrcp.f32 %v3911_v22  ;;  %v5022_v3 = vpop.eup %5021  ;;  %v3992_v26 = vmul.f32 %v5020_v27, %v7527_v6 }
 0x702   : > { %v3989_v0 = vmul.f32 %v5022_v3, %v7529_v19  ;;  %v3923_v40 = vpop.xlane.xlu0 %3922 }
 0x703   : > { %v3929_v1 = vpop.xlane.xlu1 %3928  ;;  %4024 = vst [vmem:[%s5306_s15 + $0x60] sm:$0xff] %v3992_v26 }
 0x704   : > { %5031 = vrcp.f32 %v3929_v1  ;;  %4021 = vst [vmem:[%s5306_s15 + $0x48] sm:$0xff] %v3989_v0 }
 0x705   : > { %5033 = vrcp.f32 %v3923_v40 }
 0x706   : > { %v5024_v57 = vpop.eup %5023  ;;  %v3919_v20 = vpop.xlane.xlu0 %3918 }
 0x707   : > { %v5026_v61 = vpop.eup %5025  ;;  %v3998_v45 = vmul.f32 %v5024_v57, %v7537_v18  ;;  %v3925_v16 = vpop.xlane.xlu1 %3924 }
 0x708   : > { %v3995_v12 = vmul.f32 %v5026_v61, %v7535_v14  ;;  %5035 = vrcp.f32 %v3925_v16 }
 0x709   : > { %4030 = vst [vmem:[%s5306_s15 + $0x90] sm:$0xff] %v3998_v45  ;;  %5037 = vrcp.f32 %v3919_v20 }
 0x70a   : > { %v5028_v6 = vpop.eup %5027  ;;  %4027 = vst [vmem:[%s5306_s15 + $0x78] sm:$0xff] %v3995_v12  ;;  %v3931_v33 = vpop.xlane.xlu0 %3930 }
 0x70b   : > { %v5030_v19 = vpop.eup %5029  ;;  %v3996_v47 = vmul.f32 %v5028_v6, %v7545_v17  ;;  %v3937_v58 = vpop.xlane.xlu1 %3936 }
 0x70c   : > { %v3993_v11 = vmul.f32 %v5030_v19, %v7543_v56  ;;  %5039 = vrcp.f32 %v3937_v58 }
 0x70d   : > { %4028 = vst [vmem:[%s5306_s15 + $0x80] sm:$0xff] %v3996_v47  ;;  %5041 = vrcp.f32 %v3931_v33 }
 0x70e   : > { %v5032_v18 = vpop.eup %5031  ;;  %4025 = vst [vmem:[%s5306_s15 + $0x68] sm:$0xff] %v3993_v11  ;;  %v3927_v15 = vpop.xlane.xlu0 %3926 }
 0x70f   : > { %v5034_v14 = vpop.eup %5033  ;;  %v4002_v38 = vmul.f32 %v5032_v18, %v7553_v44  ;;  %v3933_v48 = vpop.xlane.xlu1 %3932 }
 0x710   : > { %v3999_v9 = vmul.f32 %v5034_v14, %v7551_v10  ;;  %5043 = vrcp.f32 %v3933_v48 }
 0x711   : > { %4034 = vst [vmem:[%s5306_s15 + $0xb0] sm:$0xff] %v4002_v38  ;;  %5045 = vrcp.f32 %v3927_v15 }
 0x712   : > { %v5036_v17 = vpop.eup %5035  ;;  %4031 = vst [vmem:[%s5306_s15 + $0x98] sm:$0xff] %v3999_v9  ;;  %v3939_v50 = vpop.xlane.xlu0 %3938 }
 0x713   : > { %v5038_v56 = vpop.eup %5037  ;;  %v4000_v13 = vmul.f32 %v5036_v17, %v7561_v28  ;;  %5047 = vrcp.f32 %v3939_v50 }
 0x714   : > { %v3997_v21 = vmul.f32 %v5038_v56, %v7558_v31  ;;  %v3941_v44 = vpop.xlane.xlu1 %3940 }
 0x715   : > { %4032 = vst [vmem:[%s5306_s15 + $0xa0] sm:$0xff] %v4000_v13  ;;  %5049 = vrcp.f32 %v3941_v44 }
 0x716   : > { %v5040_v52 = vpop.eup %5039  ;;  %4029 = vst [vmem:[%s5306_s15 + $0x88] sm:$0xff] %v3997_v21  ;;  %v3935_v46 = vpop.xlane.xlu0 %3934 }
 0x717   : > { %v5042_v10 = vpop.eup %5041  ;;  %v4006_v7 = vmul.f32 %v5040_v52, %v7569_v24  ;;  %5051 = vrcp.f32 %v3935_v46 }
 0x718   : > { %v4003_v36 = vmul.f32 %v5042_v10, %v7566_v35  ;;  %v3945_v28 = vpop.xlane.xlu1 %3944 }
 0x719   : > { %4038 = vst [vmem:[%s5306_s15 + $0xd0] sm:$0xff] %v4006_v7  ;;  %5053 = vrcp.f32 %v3945_v28 }
 0x71a   : > { %v5044_v31 = vpop.eup %5043  ;;  %4035 = vst [vmem:[%s5306_s15 + $0xb8] sm:$0xff] %v4003_v36  ;;  %v3943_v59 = vpop.xlane.xlu0 %3942 }
 0x71b   : > { %v5046_v37 = vpop.eup %5045  ;;  %v4004_v55 = vmul.f32 %v5044_v31, %v7576_v41  ;;  %5055 = vrcp.f32 %v3943_v59 }
 0x71c   : > { %v4001_v62 = vmul.f32 %v5046_v37, %v7574_v32 }
 0x71d   : > { %4036 = vst [vmem:[%s5306_s15 + $0xc0] sm:$0xff] %v4004_v55  ;;  %v5048_v24 = vpop.eup %5047 }
 0x71e   : > { %4033 = vst [vmem:[%s5306_s15 + $0xa8] sm:$0xff] %v4001_v62  ;;  %v4007_v34 = vmul.f32 %v5048_v24, %v7580_v51  ;;  %v3947_v30 = vpop.xlane.xlu0 %3946 }
 0x71f   : > { %v5050_v35 = vpop.eup %5049  ;;  %5057 = vrcp.f32 %v3947_v30 }
 0x720   : > { %v4008_v29 = vmul.f32 %v5050_v35, %v7582_v23  ;;  %4039 = vst [vmem:[%s5306_s15 + $0xd8] sm:$0xff] %v4007_v34 }
 0x721   : > { %v5052_v41 = vpop.eup %5051 }
 0x722   : > { %4040 = vst [vmem:[%s5306_s15 + $0xe0] sm:$0xff] %v4008_v29  ;;  %v4005_v32 = vmul.f32 %v5052_v41, %v7586_v39 }
 0x723   : > { %v5054_v53 = vpop.eup %5053 }
 0x724   : > { %v4010_v2 = vmul.f32 %v5054_v53, %v7588_v60  ;;  %4037 = vst [vmem:[%s5306_s15 + $0xc8] sm:$0xff] %v4005_v32 }
 0x725   : > { %v5056_v49 = vpop.eup %5055 }
 0x726   : > { %4042 = vst [vmem:[%s5306_s15 + $0xf0] sm:$0xff] %v4010_v2  ;;  %v4009_v4 = vmul.f32 %v5056_v49, %v7592_v25 }
 0x728   : > { %4041 = vst [vmem:[%s5306_s15 + $0xe8] sm:$0xff] %v4009_v4 }
 0x729   : > { %v5058_v51 = vpop.eup %5057 }
 0x72a   : > { %v4011_v42 = vmul.f32 %v5058_v51, %v7595_v43 }
 0x72c   : > { %4043 = vst [vmem:[%s5306_s15 + $0xf8] sm:$0xff] %v4011_v42 }
 0x72d PF: > { %s18_s11 = sadd.s32 1, %s5113_s11   ;;  %s8042_s22 = sld [smem:[#allocation6_spill]] }
 0x72e   : > { %p15_p1 = scmp.ge.s32.totalorder %s18_s11, 6   ;;  %s8043_s27 = smov %s5093_s28 }
 0x72f   : > { %s8044_s28 = smov %s5215_s18  ;;  %s8045_s29 = smov %s5105_s9 }
 0x730   : > { %s8046_s30 = smov %s5109_s10  ;;  %s8047_s9 = smov %s8050_s12 }
 0x731   :  { %17 = sbr.rel (!%p15_p1) target bundleno = 6 (0x6), region = 142 }
 0x733   : > { %s8048_s10 = smov %s8042_s22 }

</bundles_post_ra>
